<compile_context>
chip_gen: v6e
topology: v6e:2x2x1
jax: 0.10.0
libtpu: 0.0.40
codegen_flags: <defaults>
</compile_context>

<pallas_src>
import functools

import jax
import jax.numpy as jnp
from jax.experimental import pallas as pl
from jax.experimental.pallas import tpu as pltpu

MATMUL_DTYPE = jnp.bfloat16   # MXU input dtype (f32 accumulation everywhere)
MAX_T_BLOCK = 16              # max LSTM timesteps per grid step
MAX_UNROLL = 4                # inner LSTM unroll cap (vreg pressure at large H)


def _round_down(x, q):
    return max(q, (x // q) * q)


# ----------------------------- tiled linear kernel ---------------------------

def _linear_kernel(x_ref, w_ref, b_ref, o_ref):
    acc = jnp.dot(x_ref[...], w_ref[...], preferred_element_type=jnp.float32)
    o_ref[...] = (acc + b_ref[...]).astype(o_ref.dtype)


def linear(x, w, b, *, out_dtype=jnp.float32, tm_pref=256, tn_pref=512):
    """y = x @ w + b.  Columns (weight blocks) are the OUTER grid axis so the
    weight is DMA'd ~once; rows stream on the inner axis.  bf16 MXU inputs,
    f32 accumulation, N tiles 256-aligned for the v6e/v7x 2x256 MXU."""
    n, k = x.shape
    m = w.shape[1]
    tm = n if n <= tm_pref else _round_down(tm_pref, 8)
    tn = m if m <= tn_pref else _round_down(tn_pref, 256)
    grid = (pl.cdiv(m, tn), pl.cdiv(n, tm))        # cols outer -> weight read once
    return pl.pallas_call(
        _linear_kernel,
        out_shape=jax.ShapeDtypeStruct((n, m), out_dtype),
        grid_spec=pltpu.PrefetchScalarGridSpec(
            num_scalar_prefetch=0,
            grid=grid,
            in_specs=[
                pl.BlockSpec((tm, k), lambda j, i: (i, 0)),
                pl.BlockSpec((k, tn), lambda j, i: (0, j)),
                pl.BlockSpec((1, tn), lambda j, i: (0, j)),
            ],
            out_specs=pl.BlockSpec((tm, tn), lambda j, i: (i, j)),
        ),
        compiler_params=pltpu.CompilerParams(
            dimension_semantics=("parallel", "parallel")),
    )(x.astype(MATMUL_DTYPE), w.astype(MATMUL_DTYPE), b.astype(jnp.float32))


# ----------------------------- fused encoder kernel --------------------------

def _make_encoder_kernel(eb, h, w, in_c):
    hw = h * w

    def kernel(img_ref, cw_ref, cb_ref, fw_ref, fb_ref, o_ref):
        # img_ref: [eb, h+2, w+2, in_c] f32 (spatially pre-padded NHWC)
        # In-kernel im2col: 9 shifted window reads, no [B,HW,9C] HBM intermediate.
        taps = [img_ref[:, di:di + h, dj:dj + w, :]
                for di in range(3) for dj in range(3)]       # each [eb, h, w, c]
        patches = jnp.concatenate(taps, axis=-1)             # [eb, h, w, 9c] tap-major
        patches = patches.reshape(eb * hw, 9 * in_c)         # collapse into rows
        conv = jnp.dot(patches.astype(MATMUL_DTYPE), cw_ref[...],
                       preferred_element_type=jnp.float32) + cb_ref[...]
        conv = jnp.maximum(conv, 0.0)                        # [eb*hw, Cf] f32
        pooled = jnp.mean(conv.reshape(eb, hw, -1), axis=1)  # global average pool
        emb = jnp.dot(pooled.astype(MATMUL_DTYPE), fw_ref[...],
                      preferred_element_type=jnp.float32) + fb_ref[...]
        o_ref[...] = emb.astype(o_ref.dtype)                 # [eb, E]

    return kernel


def encoder_forward(images_padded, conv_w_mat, conv_b, fc_w_t, fc_b):
    # conv(3x3)+ReLU -> global-avg-pool -> fc fused in one kernel; multiple
    # images per grid step to amortize per-step overhead / fill the MXU.
    bsz, hp, wp, in_c = images_padded.shape
    h, w = hp - 2, wp - 2
    hw = h * w
    ck, cf = conv_w_mat.shape
    embed = fc_w_t.shape[1]

    cap = max(1, 4096 // hw)           # keep the conv-dot M dim <= ~4096 rows
    eb = 1
    for d in range(1, bsz + 1):
        if bsz % d == 0 and d <= cap:
            eb = d

    out = pl.pallas_call(
        _make_encoder_kernel(eb, h, w, in_c),
        out_shape=jax.ShapeDtypeStruct((bsz, embed), jnp.float32),
        grid_spec=pltpu.PrefetchScalarGridSpec(
            num_scalar_prefetch=0,
            grid=(bsz // eb,),
            in_specs=[
                pl.BlockSpec((eb, hp, wp, in_c), lambda i: (i, 0, 0, 0)),
                pl.BlockSpec((ck, cf), lambda i: (0, 0)),
                pl.BlockSpec((1, cf), lambda i: (0, 0)),
                pl.BlockSpec((cf, embed), lambda i: (0, 0)),
                pl.BlockSpec((1, embed), lambda i: (0, 0)),
            ],
            out_specs=pl.BlockSpec((eb, embed), lambda i: (i, 0)),
        ),
        compiler_params=pltpu.CompilerParams(dimension_semantics=("parallel",)),
    )(images_padded.astype(jnp.float32), conv_w_mat.astype(MATMUL_DTYPE),
      conv_b.astype(jnp.float32), fc_w_t.astype(MATMUL_DTYPE),
      fc_b.astype(jnp.float32))
    return out


# ----------------------------- fused multi-layer LSTM ------------------------

def _make_lstm_kernel(num_layers, t_block, hidden, unroll, compute_dtype):
    H = hidden

    def kernel(gx_ref, whh0_hbm, wcat_hbm, b_hbm, out_ref,
               whh0_v, wcat_v, b_v, cp_sem, h_sc, c_sc):
        # gx_ref  : [Tb, Bb, 4H] bf16  hoisted layer-0 x@W_ih + b (gate order i,f,g,o)
        # whh0_hbm: [H, 4H]            layer-0 recurrent weights (HBM)
        # wcat_hbm: [Lr, 2H, 4H]       layers>=1 fused [W_ih; W_hh] (HBM)
        # b_hbm   : [Lr, 1, 4H]        layers>=1 combined biases (HBM)
        # out_ref : [Tb, Bb, H] bf16   top-layer hidden states
        # *_v     : single-buffered VMEM copies of the weights
        # h_sc/c_sc: [L, Bb, H] f32    persistent recurrent state (per core)
        @pl.when(pl.program_id(1) == 0)
        def _init():
            # Single-buffered resident weights: one manual DMA into VMEM scratch
            # (avoids the 2x VMEM cost of auto double-buffering them).
            cp0 = pltpu.make_async_copy(whh0_hbm, whh0_v, cp_sem.at[0])
            cp1 = pltpu.make_async_copy(wcat_hbm, wcat_v, cp_sem.at[1])
            cp2 = pltpu.make_async_copy(b_hbm, b_v, cp_sem.at[2])
            cp0.start(); cp1.start(); cp2.start()
            h_sc[...] = jnp.zeros_like(h_sc)
            c_sc[...] = jnp.zeros_like(c_sc)
            cp0.wait(); cp1.wait(); cp2.wait()

        def _sig(x):
            # EUP-friendly: exp + approx reciprocal keeps the nonlinearity off the VALU.
            return pl.reciprocal(1.0 + jnp.exp(-x), approx=True)

        def gate_math(gates, c_prev):
            i_g = _sig(gates[:, 0 * H:1 * H])     # PyTorch gate order: i, f, g, o
            f_g = _sig(gates[:, 1 * H:2 * H])
            g_g = jnp.tanh(gates[:, 2 * H:3 * H])
            o_g = _sig(gates[:, 3 * H:4 * H])
            c_n = f_g * c_prev + i_g * g_g
            return o_g * jnp.tanh(c_n), c_n

        def step(t, carry):
            hs, cs = carry
            new_h, new_c = [], []
            # layer 0: hoisted input projection + ONE fused [B,H]@[H,4H] dot
            gates = gx_ref[t].astype(jnp.float32) + jnp.dot(
                hs[0].astype(compute_dtype), whh0_v[...],
                preferred_element_type=jnp.float32)
            h_n, c_n = gate_math(gates, cs[0])
            new_h.append(h_n)
            new_c.append(c_n)
            x_in = h_n
            for l in range(1, num_layers):
                # fused input+recurrent projection: [B,2H] @ [2H,4H]
                xh = jnp.concatenate([x_in.astype(compute_dtype),
                                      hs[l].astype(compute_dtype)], axis=-1)
                gates = jnp.dot(xh, wcat_v[l - 1],
                                preferred_element_type=jnp.float32) + b_v[l - 1]
                h_n, c_n = gate_math(gates, cs[l])
                new_h.append(h_n)
                new_c.append(c_n)
                x_in = h_n
            out_ref[t] = x_in.astype(out_ref.dtype)
            return tuple(new_h), tuple(new_c)

        def block_step(o, carry):
            # manual partial unroll (unroll divides t_block)
            for i in range(unroll):
                carry = step(o * unroll + i, carry)
            return carry

        h0 = tuple(h_sc[l] for l in range(num_layers))
        c0 = tuple(c_sc[l] for l in range(num_layers))
        hs, cs = jax.lax.fori_loop(0, t_block // unroll, block_step, (h0, c0))
        for l in range(num_layers):
            h_sc[l] = hs[l]
            c_sc[l] = cs[l]

    return kernel


def lstm_stack(gx, whh0_t, wcat_rest, b_rest, *, num_layers, t_block, n_bsplit,
               unroll):
    tpad, bsz, four_h = gx.shape
    hidden = four_h // 4
    b_blk = bsz // n_bsplit
    kernel = _make_lstm_kernel(num_layers, t_block, hidden, unroll, MATMUL_DTYPE)

    # Explicit VMEM budget: double-buffered gx/out blocks + single-copy weights
    # + recurrent state; capped at 64 MiB so it stays valid on v7x.  If the
    # budget is exceeded at production sizes, lower MAX_T_BLOCK.
    weight_bytes = (whh0_t.size + wcat_rest.size) * 2 + b_rest.size * 4
    stream_bytes = 2 * t_block * b_blk * (four_h + hidden) * 2
    state_bytes = 2 * num_layers * b_blk * hidden * 4
    vmem_limit = min(int(1.5 * (weight_bytes + stream_bytes + state_bytes))
                     + (8 << 20), 64 << 20)

    return pl.pallas_call(
        kernel,
        out_shape=jax.ShapeDtypeStruct((tpad, bsz, hidden), jnp.bfloat16),
        grid_spec=pltpu.PrefetchScalarGridSpec(
            num_scalar_prefetch=0,
            # leading 'parallel' batch-split axis -> 2nd TensorCore on v7x
            grid=(n_bsplit, tpad // t_block),
            in_specs=[
                pl.BlockSpec((t_block, b_blk, four_h), lambda b, t: (t, b, 0)),
                pl.BlockSpec(memory_space=pl.ANY),   # weights stay in HBM,
                pl.BlockSpec(memory_space=pl.ANY),   # copied once into VMEM
                pl.BlockSpec(memory_space=pl.ANY),   # scratch (single-buffered)
            ],
            out_specs=pl.BlockSpec((t_block, b_blk, hidden), lambda b, t: (t, b, 0)),
            scratch_shapes=[
                pltpu.VMEM(whh0_t.shape, MATMUL_DTYPE),
                pltpu.VMEM(wcat_rest.shape, MATMUL_DTYPE),
                pltpu.VMEM(b_rest.shape, jnp.float32),
                pltpu.SemaphoreType.DMA((3,)),
                pltpu.VMEM((num_layers, b_blk, hidden), jnp.float32),  # h state
                pltpu.VMEM((num_layers, b_blk, hidden), jnp.float32),  # c state
            ],
        ),
        compiler_params=pltpu.CompilerParams(
            dimension_semantics=("parallel", "arbitrary"),   # time is sequential
            vmem_limit_bytes=vmem_limit),
    )(gx.astype(jnp.bfloat16), whh0_t.astype(MATMUL_DTYPE),
      wcat_rest.astype(MATMUL_DTYPE), b_rest.astype(jnp.float32))


# ----------------------------- parameter construction ------------------------

def init_params(key, *, in_ch, conv_ch, embed, hidden, vocab, num_layers):
    keys = jax.random.split(key, 8 + num_layers)
    sc = 0.02
    nrm = lambda k, shape: sc * jax.random.normal(k, shape, jnp.float32)

    conv_w = nrm(keys[0], (conv_ch, in_ch, 3, 3))            # OIHW (PyTorch)
    conv_b = nrm(keys[1], (conv_ch,))
    fc_w = nrm(keys[2], (embed, conv_ch))                    # Linear [out, in]
    fc_b = nrm(keys[3], (embed,))
    embed_table = nrm(keys[4], (vocab, embed))
    out_w = nrm(keys[5], (vocab, hidden))
    out_b = nrm(keys[6], (vocab,))

    w_ih0_t = bias0 = whh0_t = None
    wcat_rest, b_rest = [], []
    for l in range(num_layers):
        e_in = embed if l == 0 else hidden
        k = jax.random.split(keys[7 + l], 4)
        w_ih = nrm(k[0], (4 * hidden, e_in))                 # gates i,f,g,o stacked
        w_hh = nrm(k[1], (4 * hidden, hidden))
        bias = nrm(k[2], (4 * hidden,)) + nrm(k[3], (4 * hidden,))   # b_ih + b_hh
        if l == 0:
            w_ih0_t = w_ih.T                                 # [E, 4H]
            bias0 = bias[None, :]                            # [1, 4H]
            whh0_t = w_hh.T                                  # [H, 4H]
        else:
            # fused [x ; h] projection: rows 0:H = W_ih^T, rows H:2H = W_hh^T
            wcat_rest.append(jnp.concatenate([w_ih.T, w_hh.T], axis=0))  # [2H, 4H]
            b_rest.append(bias[None, :])                     # [1, 4H]

    if wcat_rest:
        wcat_rest_a = jnp.stack(wcat_rest)                   # [L-1, 2H, 4H]
        b_rest_a = jnp.stack(b_rest)                         # [L-1, 1, 4H]
    else:                                                    # single-layer LSTM
        wcat_rest_a = jnp.zeros((1, 2 * hidden, 4 * hidden), jnp.float32)
        b_rest_a = jnp.zeros((1, 1, 4 * hidden), jnp.float32)

    return {
        # conv weight as (kh, kw, cin) x Cf to match tap-major/channel-minor patches
        "conv_w_mat": conv_w.transpose(2, 3, 1, 0).reshape(9 * in_ch, conv_ch),
        "conv_b": conv_b[None, :],
        "fc_w_t": fc_w.T,                                    # [Cf, E]
        "fc_b": fc_b[None, :],
        "embed_table": embed_table,
        "out_w_t": out_w.T,                                  # [H, V]
        "out_b": out_b[None, :],
        "w_ih0_t": w_ih0_t,
        "bias0": bias0,
        "whh0_t": whh0_t,                                    # [H, 4H]
        "wcat_rest": wcat_rest_a,                            # [max(L-1,1), 2H, 4H]
        "b_rest": b_rest_a,                                  # [max(L-1,1), 1, 4H]
    }


# ----------------------------- JAX-side glue ---------------------------------

@functools.partial(jax.jit, static_argnames=("num_layers",))
def cnn_to_rnn_forward(params, images, captions, *, num_layers):
    # ---------------- EncoderCNN (conv3x3+ReLU -> GAP -> fc stub) -------------
    x = jnp.transpose(images, (0, 2, 3, 1))                  # NCHW -> NHWC once
    xp = jnp.pad(x, ((0, 0), (1, 1), (1, 1), (0, 0)))        # 3x3 'same' halo only
    features = encoder_forward(xp, params["conv_w_mat"], params["conv_b"],
                               params["fc_w_t"], params["fc_b"])      # [B, E]

    # ---------------- DecoderRNN ----------------------------------------------
    # embeddings = dropout(embed(captions)); dropout is identity in eval mode.
    embeddings = jnp.take(params["embed_table"], captions, axis=0)    # [T, B, E]
    seq = jnp.concatenate([features[None], embeddings], axis=0)       # [T+1, B, E]
    t1, bsz, e = seq.shape
    hidden = params["whh0_t"].shape[0]
    vocab = params["out_w_t"].shape[1]

    # time-block size chosen to minimize padding (e.g. T+1=17 -> 2 blocks of 9)
    n_tb = pl.cdiv(t1, MAX_T_BLOCK)
    t_block = pl.cdiv(t1, n_tb)
    tpad = n_tb * t_block
    unroll = 1
    for cand in (MAX_UNROLL, 3, 2, 1):
        if cand <= t_block and t_block % cand == 0:
            unroll = cand
            break

    # Hoisted layer-0 input projection over all timesteps (one tiled MXU matmul),
    # emitted bf16 in [Tp*B, 4H]; no transpose back through HBM.
    seq_p = jnp.pad(seq, ((0, tpad - t1), (0, 0), (0, 0)))
    gx = linear(seq_p.reshape(tpad * bsz, e), params["w_ih0_t"], params["bias0"],
                out_dtype=jnp.bfloat16)
    gx = gx.reshape(tpad, bsz, 4 * hidden)                            # [Tp, B, 4H]

    # Split the batch across the two v7x TensorCores when it tiles cleanly.
    n_bsplit = 2 if (bsz % 2 == 0 and (bsz // 2) % 8 == 0) else 1

    hiddens = lstm_stack(gx, params["whh0_t"], params["wcat_rest"],
                         params["b_rest"], num_layers=num_layers,
                         t_block=t_block, n_bsplit=n_bsplit,
                         unroll=unroll)[:t1]                          # [T+1, B, H] bf16

    # Vocab projection: weight read ~once (col-outer grid), lane-dense tiles.
    logits = linear(hiddens.reshape(t1 * bsz, hidden),
                    params["out_w_t"], params["out_b"])
    return logits.reshape(t1, bsz, vocab)


# ----------------------------- main -------------------------------------------

if __name__ == "__main__":
    B, C_IN, IMG = 2, 3, 16
    CONV_CH = 16
    EMBED, HIDDEN, VOCAB, NUM_LAYERS = 32, 32, 64, 2
    T = 8

    key = jax.random.PRNGKey(0)
    k_img, k_cap = jax.random.split(key)
    images = jax.random.normal(k_img, (B, C_IN, IMG, IMG), jnp.float32)   # NCHW
    captions = jax.random.randint(k_cap, (T, B), 0, VOCAB, jnp.int32)     # [T, B]

    params = init_params(jax.random.PRNGKey(42), in_ch=C_IN, conv_ch=CONV_CH,
                         embed=EMBED, hidden=HIDDEN, vocab=VOCAB,
                         num_layers=NUM_LAYERS)

    out = jax.block_until_ready(
        cnn_to_rnn_forward(params, images, captions, num_layers=NUM_LAYERS))
    assert out.shape == (T + 1, B, VOCAB), out.shape
    assert bool(jnp.all(jnp.isfinite(out))), "non-finite output"
    print("KERNEL_OK")
</pallas_src>

<mosaic_0001>
module attributes {stable_mosaic.version = 11 : i64} {
  func.func @kernel(%arg0: i32, %arg1: memref<2x18x18x3xf32, #tpu.memory_space<vmem>>, %arg2: memref<27x16xbf16, #tpu.memory_space<vmem>>, %arg3: memref<1x16xf32, #tpu.memory_space<vmem>>, %arg4: memref<16x32xbf16, #tpu.memory_space<vmem>>, %arg5: memref<1x32xf32, #tpu.memory_space<vmem>>, %arg6: memref<2x32xf32, #tpu.memory_space<vmem>>) attributes {dimension_semantics = [#tpu.dimension_semantics<parallel>], iteration_bounds = array<i64: 1>, scalar_prefetch = 0 : i64, scratch_operands = 0 : i64, tpu.core_type = #tpu.core_type<tc>, window_params = [{transform_indices = @transform_0, window_bounds = array<i64: 2, 18, 18, 3>}, {pipeline_mode = #tpu.pipeline_mode<synchronous>, transform_indices = @transform_1, window_bounds = array<i64: 27, 16>}, {pipeline_mode = #tpu.pipeline_mode<synchronous>, transform_indices = @transform_2, window_bounds = array<i64: 1, 16>}, {pipeline_mode = #tpu.pipeline_mode<synchronous>, transform_indices = @transform_3, window_bounds = array<i64: 16, 32>}, {pipeline_mode = #tpu.pipeline_mode<synchronous>, transform_indices = @transform_4, window_bounds = array<i64: 1, 32>}, {transform_indices = @transform_5, window_bounds = array<i64: 2, 32>}]} {
    %c0 = arith.constant 0 : index
    %c0_0 = arith.constant 0 : index
    %c0_1 = arith.constant 0 : index
    %c0_2 = arith.constant 0 : index
    %0 = vector.load %arg1[%c0, %c0_0, %c0_1, %c0_2] : memref<2x18x18x3xf32, #tpu.memory_space<vmem>>, vector<2x16x16x3xf32>
    %c0_3 = arith.constant 0 : index
    %c0_4 = arith.constant 0 : index
    %c1 = arith.constant 1 : index
    %c0_5 = arith.constant 0 : index
    %1 = vector.load %arg1[%c0_3, %c0_4, %c1, %c0_5] : memref<2x18x18x3xf32, #tpu.memory_space<vmem>>, vector<2x16x16x3xf32>
    %c0_6 = arith.constant 0 : index
    %c0_7 = arith.constant 0 : index
    %c2 = arith.constant 2 : index
    %c0_8 = arith.constant 0 : index
    %2 = vector.load %arg1[%c0_6, %c0_7, %c2, %c0_8] : memref<2x18x18x3xf32, #tpu.memory_space<vmem>>, vector<2x16x16x3xf32>
    %c0_9 = arith.constant 0 : index
    %c1_10 = arith.constant 1 : index
    %c0_11 = arith.constant 0 : index
    %c0_12 = arith.constant 0 : index
    %3 = vector.load %arg1[%c0_9, %c1_10, %c0_11, %c0_12] : memref<2x18x18x3xf32, #tpu.memory_space<vmem>>, vector<2x16x16x3xf32>
    %c0_13 = arith.constant 0 : index
    %c1_14 = arith.constant 1 : index
    %c1_15 = arith.constant 1 : index
    %c0_16 = arith.constant 0 : index
    %4 = vector.load %arg1[%c0_13, %c1_14, %c1_15, %c0_16] : memref<2x18x18x3xf32, #tpu.memory_space<vmem>>, vector<2x16x16x3xf32>
    %c0_17 = arith.constant 0 : index
    %c1_18 = arith.constant 1 : index
    %c2_19 = arith.constant 2 : index
    %c0_20 = arith.constant 0 : index
    %5 = vector.load %arg1[%c0_17, %c1_18, %c2_19, %c0_20] : memref<2x18x18x3xf32, #tpu.memory_space<vmem>>, vector<2x16x16x3xf32>
    %c0_21 = arith.constant 0 : index
    %c2_22 = arith.constant 2 : index
    %c0_23 = arith.constant 0 : index
    %c0_24 = arith.constant 0 : index
    %6 = vector.load %arg1[%c0_21, %c2_22, %c0_23, %c0_24] : memref<2x18x18x3xf32, #tpu.memory_space<vmem>>, vector<2x16x16x3xf32>
    %c0_25 = arith.constant 0 : index
    %c2_26 = arith.constant 2 : index
    %c1_27 = arith.constant 1 : index
    %c0_28 = arith.constant 0 : index
    %7 = vector.load %arg1[%c0_25, %c2_26, %c1_27, %c0_28] : memref<2x18x18x3xf32, #tpu.memory_space<vmem>>, vector<2x16x16x3xf32>
    %c0_29 = arith.constant 0 : index
    %c2_30 = arith.constant 2 : index
    %c2_31 = arith.constant 2 : index
    %c0_32 = arith.constant 0 : index
    %8 = vector.load %arg1[%c0_29, %c2_30, %c2_31, %c0_32] : memref<2x18x18x3xf32, #tpu.memory_space<vmem>>, vector<2x16x16x3xf32>
    %9 = tpu.concatenate %0, %1, %2, %3, %4, %5, %6, %7, %8 in 3 : vector<2x16x16x3xf32>, vector<2x16x16x3xf32>, vector<2x16x16x3xf32>, vector<2x16x16x3xf32>, vector<2x16x16x3xf32>, vector<2x16x16x3xf32>, vector<2x16x16x3xf32>, vector<2x16x16x3xf32>, vector<2x16x16x3xf32> -> vector<2x16x16x27xf32>
    %10 = vector.shape_cast %9 : vector<2x16x16x27xf32> to vector<512x27xf32>
    %11 = arith.truncf %10 : vector<512x27xf32> to vector<512x27xbf16>
    %c0_33 = arith.constant 0 : index
    %c0_34 = arith.constant 0 : index
    %12 = vector.load %arg2[%c0_33, %c0_34] : memref<27x16xbf16, #tpu.memory_space<vmem>>, vector<27x16xbf16>
    %cst = arith.constant dense<0.000000e+00> : vector<512x16xf32>
    %13 = tpu.matmul %11, %12, %cst {dimension_numbers = #tpu.dot_dimension_numbers<[1], [0], [0], [1], [0, 0, 1, 1], [], []>} : vector<512x27xbf16>, vector<27x16xbf16>, vector<512x16xf32> -> vector<512x16xf32>
    %c0_35 = arith.constant 0 : index
    %c0_36 = arith.constant 0 : index
    %14 = vector.load %arg3[%c0_35, %c0_36] : memref<1x16xf32, #tpu.memory_space<vmem>>, vector<1x16xf32>
    %15 = vector.broadcast %14 : vector<1x16xf32> to vector<512x16xf32>
    %16 = arith.addf %13, %15 : vector<512x16xf32>
    %cst_37 = arith.constant 0.000000e+00 : f32
    %17 = vector.broadcast %cst_37 : f32 to vector<512x16xf32>
    %18 = arith.maximumf %16, %17 : vector<512x16xf32>
    %19 = vector.shape_cast %18 : vector<512x16xf32> to vector<2x256x16xf32>
    %cst_38 = arith.constant dense<0.000000e+00> : vector<2x16xf32>
    %20 = vector.multi_reduction <add>, %19, %cst_38 [1] : vector<2x256x16xf32> to vector<2x16xf32>
    %cst_39 = arith.constant 2.560000e+02 : f32
    %21 = vector.broadcast %cst_39 : f32 to vector<2x16xf32>
    %22 = arith.divf %20, %21 : vector<2x16xf32>
    %23 = arith.truncf %22 : vector<2x16xf32> to vector<2x16xbf16>
    %c0_40 = arith.constant 0 : index
    %c0_41 = arith.constant 0 : index
    %24 = vector.load %arg4[%c0_40, %c0_41] : memref<16x32xbf16, #tpu.memory_space<vmem>>, vector<16x32xbf16>
    %cst_42 = arith.constant dense<0.000000e+00> : vector<2x32xf32>
    %25 = tpu.matmul %23, %24, %cst_42 {dimension_numbers = #tpu.dot_dimension_numbers<[1], [0], [0], [1], [0, 0, 1, 1], [], []>} : vector<2x16xbf16>, vector<16x32xbf16>, vector<2x32xf32> -> vector<2x32xf32>
    %c0_43 = arith.constant 0 : index
    %c0_44 = arith.constant 0 : index
    %26 = vector.load %arg5[%c0_43, %c0_44] : memref<1x32xf32, #tpu.memory_space<vmem>>, vector<1x32xf32>
    %27 = vector.broadcast %26 : vector<1x32xf32> to vector<2x32xf32>
    %28 = arith.addf %25, %27 : vector<2x32xf32>
    %c0_45 = arith.constant 0 : index
    %c0_46 = arith.constant 0 : index
    %29 = vector.load %arg6[%c0_45, %c0_46] : memref<2x32xf32, #tpu.memory_space<vmem>>, vector<2x32xf32>
    tpu.vector_store %arg6[%c0_45, %c0_46], %28 {strides = array<i32>} : memref<2x32xf32, #tpu.memory_space<vmem>>, vector<2x32xf32>,
    return
  }
  func.func @transform_0(%arg0: i32) -> (i32, i32, i32, i32) {
    %c0_i32 = arith.constant 0 : i32
    %c0_i32_0 = arith.constant 0 : i32
    %c0_i32_1 = arith.constant 0 : i32
    %c0_i32_2 = arith.constant 0 : i32
    return %arg0, %c0_i32, %c0_i32_0, %c0_i32_1 : i32, i32, i32, i32
  }
  func.func @transform_1(%arg0: i32) -> (i32, i32) {
    %c0_i32 = arith.constant 0 : i32
    %c0_i32_0 = arith.constant 0 : i32
    %c0_i32_1 = arith.constant 0 : i32
    return %c0_i32, %c0_i32_0 : i32, i32
  }
  func.func @transform_2(%arg0: i32) -> (i32, i32) {
    %c0_i32 = arith.constant 0 : i32
    %c0_i32_0 = arith.constant 0 : i32
    %c0_i32_1 = arith.constant 0 : i32
    return %c0_i32, %c0_i32_0 : i32, i32
  }
  func.func @transform_3(%arg0: i32) -> (i32, i32) {
    %c0_i32 = arith.constant 0 : i32
    %c0_i32_0 = arith.constant 0 : i32
    %c0_i32_1 = arith.constant 0 : i32
    return %c0_i32, %c0_i32_0 : i32, i32
  }
  func.func @transform_4(%arg0: i32) -> (i32, i32) {
    %c0_i32 = arith.constant 0 : i32
    %c0_i32_0 = arith.constant 0 : i32
    %c0_i32_1 = arith.constant 0 : i32
    return %c0_i32, %c0_i32_0 : i32, i32
  }
  func.func @transform_5(%arg0: i32) -> (i32, i32) {
    %c0_i32 = arith.constant 0 : i32
    %c0_i32_0 = arith.constant 0 : i32
    return %arg0, %c0_i32 : i32, i32
  }
}

module attributes {stable_mosaic.version = 11 : i64} {
  func.func @_linear_kernel(%arg0: i32, %arg1: i32, %arg2: memref<18x32xbf16, #tpu.memory_space<vmem>>, %arg3: memref<32x128xbf16, #tpu.memory_space<vmem>>, %arg4: memref<1x128xf32, #tpu.memory_space<vmem>>, %arg5: memref<18x128xbf16, #tpu.memory_space<vmem>>) attributes {dimension_semantics = [#tpu.dimension_semantics<parallel>, #tpu.dimension_semantics<parallel>], iteration_bounds = array<i64: 1, 1>, scalar_prefetch = 0 : i64, scratch_operands = 0 : i64, tpu.core_type = #tpu.core_type<tc>, window_params = [{transform_indices = @transform_0, window_bounds = array<i64: 18, 32>}, {transform_indices = @transform_1, window_bounds = array<i64: 32, 128>}, {transform_indices = @transform_2, window_bounds = array<i64: 1, 128>}, {transform_indices = @transform_3, window_bounds = array<i64: 18, 128>}]} {
    %c0 = arith.constant 0 : index
    %c0_0 = arith.constant 0 : index
    %0 = vector.load %arg2[%c0, %c0_0] : memref<18x32xbf16, #tpu.memory_space<vmem>>, vector<18x32xbf16>
    %c0_1 = arith.constant 0 : index
    %c0_2 = arith.constant 0 : index
    %1 = vector.load %arg3[%c0_1, %c0_2] : memref<32x128xbf16, #tpu.memory_space<vmem>>, vector<32x128xbf16>
    %cst = arith.constant dense<0.000000e+00> : vector<18x128xf32>
    %2 = tpu.matmul %0, %1, %cst {dimension_numbers = #tpu.dot_dimension_numbers<[1], [0], [0], [1], [0, 0, 1, 1], [], []>} : vector<18x32xbf16>, vector<32x128xbf16>, vector<18x128xf32> -> vector<18x128xf32>
    %c0_3 = arith.constant 0 : index
    %c0_4 = arith.constant 0 : index
    %3 = vector.load %arg4[%c0_3, %c0_4] : memref<1x128xf32, #tpu.memory_space<vmem>>, vector<1x128xf32>
    %4 = vector.broadcast %3 : vector<1x128xf32> to vector<18x128xf32>
    %5 = arith.addf %2, %4 : vector<18x128xf32>
    %6 = arith.truncf %5 : vector<18x128xf32> to vector<18x128xbf16>
    %c0_5 = arith.constant 0 : index
    %c0_6 = arith.constant 0 : index
    %7 = vector.load %arg5[%c0_5, %c0_6] : memref<18x128xbf16, #tpu.memory_space<vmem>>, vector<18x128xbf16>
    tpu.vector_store %arg5[%c0_5, %c0_6], %6 {strides = array<i32>} : memref<18x128xbf16, #tpu.memory_space<vmem>>, vector<18x128xbf16>,
    return
  }
  func.func @transform_0(%arg0: i32, %arg1: i32) -> (i32, i32) {
    %c0_i32 = arith.constant 0 : i32
    %c0_i32_0 = arith.constant 0 : i32
    return %arg1, %c0_i32 : i32, i32
  }
  func.func @transform_1(%arg0: i32, %arg1: i32) -> (i32, i32) {
    %c0_i32 = arith.constant 0 : i32
    %c0_i32_0 = arith.constant 0 : i32
    return %c0_i32, %arg0 : i32, i32
  }
  func.func @transform_2(%arg0: i32, %arg1: i32) -> (i32, i32) {
    %c0_i32 = arith.constant 0 : i32
    %c0_i32_0 = arith.constant 0 : i32
    return %c0_i32, %arg0 : i32, i32
  }
  func.func @transform_3(%arg0: i32, %arg1: i32) -> (i32, i32) {
    %c0_i32 = arith.constant 0 : i32
    return %arg1, %arg0 : i32, i32
  }
}

module attributes {stable_mosaic.version = 11 : i64} {
  func.func @_linear_kernel(%arg0: i32, %arg1: i32, %arg2: memref<18x32xbf16, #tpu.memory_space<vmem>>, %arg3: memref<32x64xbf16, #tpu.memory_space<vmem>>, %arg4: memref<1x64xf32, #tpu.memory_space<vmem>>, %arg5: memref<18x64xf32, #tpu.memory_space<vmem>>) attributes {dimension_semantics = [#tpu.dimension_semantics<parallel>, #tpu.dimension_semantics<parallel>], iteration_bounds = array<i64: 1, 1>, scalar_prefetch = 0 : i64, scratch_operands = 0 : i64, tpu.core_type = #tpu.core_type<tc>, window_params = [{transform_indices = @transform_0, window_bounds = array<i64: 18, 32>}, {transform_indices = @transform_1, window_bounds = array<i64: 32, 64>}, {transform_indices = @transform_2, window_bounds = array<i64: 1, 64>}, {transform_indices = @transform_3, window_bounds = array<i64: 18, 64>}]} {
    %c0 = arith.constant 0 : index
    %c0_0 = arith.constant 0 : index
    %0 = vector.load %arg2[%c0, %c0_0] : memref<18x32xbf16, #tpu.memory_space<vmem>>, vector<18x32xbf16>
    %c0_1 = arith.constant 0 : index
    %c0_2 = arith.constant 0 : index
    %1 = vector.load %arg3[%c0_1, %c0_2] : memref<32x64xbf16, #tpu.memory_space<vmem>>, vector<32x64xbf16>
    %cst = arith.constant dense<0.000000e+00> : vector<18x64xf32>
    %2 = tpu.matmul %0, %1, %cst {dimension_numbers = #tpu.dot_dimension_numbers<[1], [0], [0], [1], [0, 0, 1, 1], [], []>} : vector<18x32xbf16>, vector<32x64xbf16>, vector<18x64xf32> -> vector<18x64xf32>
    %c0_3 = arith.constant 0 : index
    %c0_4 = arith.constant 0 : index
    %3 = vector.load %arg4[%c0_3, %c0_4] : memref<1x64xf32, #tpu.memory_space<vmem>>, vector<1x64xf32>
    %4 = vector.broadcast %3 : vector<1x64xf32> to vector<18x64xf32>
    %5 = arith.addf %2, %4 : vector<18x64xf32>
    %c0_5 = arith.constant 0 : index
    %c0_6 = arith.constant 0 : index
    %6 = vector.load %arg5[%c0_5, %c0_6] : memref<18x64xf32, #tpu.memory_space<vmem>>, vector<18x64xf32>
    tpu.vector_store %arg5[%c0_5, %c0_6], %5 {strides = array<i32>} : memref<18x64xf32, #tpu.memory_space<vmem>>, vector<18x64xf32>,
    return
  }
  func.func @transform_0(%arg0: i32, %arg1: i32) -> (i32, i32) {
    %c0_i32 = arith.constant 0 : i32
    %c0_i32_0 = arith.constant 0 : i32
    return %arg1, %c0_i32 : i32, i32
  }
  func.func @transform_1(%arg0: i32, %arg1: i32) -> (i32, i32) {
    %c0_i32 = arith.constant 0 : i32
    %c0_i32_0 = arith.constant 0 : i32
    return %c0_i32, %arg0 : i32, i32
  }
  func.func @transform_2(%arg0: i32, %arg1: i32) -> (i32, i32) {
    %c0_i32 = arith.constant 0 : i32
    %c0_i32_0 = arith.constant 0 : i32
    return %c0_i32, %arg0 : i32, i32
  }
  func.func @transform_3(%arg0: i32, %arg1: i32) -> (i32, i32) {
    %c0_i32 = arith.constant 0 : i32
    return %arg1, %arg0 : i32, i32
  }
}

module attributes {stable_mosaic.version = 11 : i64} {
  func.func @kernel(%arg0: i32, %arg1: i32, %arg2: memref<9x2x128xbf16, #tpu.memory_space<vmem>>, %arg3: memref<32x128xbf16, #tpu.memory_space<any>>, %arg4: memref<1x64x128xbf16, #tpu.memory_space<any>>, %arg5: memref<1x1x128xf32, #tpu.memory_space<any>>, %arg6: memref<9x2x32xbf16, #tpu.memory_space<vmem>>, %arg7: memref<32x128xbf16, #tpu.memory_space<vmem>>, %arg8: memref<1x64x128xbf16, #tpu.memory_space<vmem>>, %arg9: memref<1x1x128xf32, #tpu.memory_space<vmem>>, %arg10: memref<3x!tpu.dma_semaphore, #tpu.memory_space<semaphore_mem>>, %arg11: memref<2x2x32xf32, #tpu.memory_space<vmem>>, %arg12: memref<2x2x32xf32, #tpu.memory_space<vmem>>) attributes {dimension_semantics = [#tpu.dimension_semantics<parallel>, #tpu.dimension_semantics<arbitrary>], iteration_bounds = array<i64: 1, 1>, scalar_prefetch = 0 : i64, scratch_operands = 6 : i64, tpu.core_type = #tpu.core_type<tc>, window_params = [{transform_indices = @transform_0, window_bounds = array<i64: 9, 2, 128>}, {}, {}, {}, {transform_indices = @transform_4, window_bounds = array<i64: 9, 2, 32>}]} {
    %c0_i32 = arith.constant 0 : i32
    %0 = arith.cmpi eq, %arg1, %c0_i32 : i32
    %1 = arith.extui %0 : i1 to i32
    %c0_i32_0 = arith.constant 0 : i32
    %2 = arith.cmpi ne, %1, %c0_i32_0 : i32
    scf.if %2 {
      %c0_i32_25 = arith.constant 0 : i32
      %25 = tpu.memref_slice %arg10[%c0_i32_25] : memref<3x!tpu.dma_semaphore, #tpu.memory_space<semaphore_mem>> -> memref<1x!tpu.dma_semaphore, #tpu.memory_space<semaphore_mem>>
      %26 = tpu.memref_squeeze %25 : memref<1x!tpu.dma_semaphore, #tpu.memory_space<semaphore_mem>> -> memref<!tpu.dma_semaphore, #tpu.memory_space<semaphore_mem>>
      tpu.enqueue_dma source(%arg3 : memref<32x128xbf16, #tpu.memory_space<any>>) target(%arg7 : memref<32x128xbf16, #tpu.memory_space<vmem>>) target_semaphore(%26 : memref<!tpu.dma_semaphore, #tpu.memory_space<semaphore_mem>>)
      %c1_i32_26 = arith.constant 1 : i32
      %27 = tpu.memref_slice %arg10[%c1_i32_26] : memref<3x!tpu.dma_semaphore, #tpu.memory_space<semaphore_mem>> -> memref<1x!tpu.dma_semaphore, #tpu.memory_space<semaphore_mem>>
      %28 = tpu.memref_squeeze %27 : memref<1x!tpu.dma_semaphore, #tpu.memory_space<semaphore_mem>> -> memref<!tpu.dma_semaphore, #tpu.memory_space<semaphore_mem>>
      tpu.enqueue_dma source(%arg4 : memref<1x64x128xbf16, #tpu.memory_space<any>>) target(%arg8 : memref<1x64x128xbf16, #tpu.memory_space<vmem>>) target_semaphore(%28 : memref<!tpu.dma_semaphore, #tpu.memory_space<semaphore_mem>>)
      %c2_i32 = arith.constant 2 : i32
      %29 = tpu.memref_slice %arg10[%c2_i32] : memref<3x!tpu.dma_semaphore, #tpu.memory_space<semaphore_mem>> -> memref<1x!tpu.dma_semaphore, #tpu.memory_space<semaphore_mem>>
      %30 = tpu.memref_squeeze %29 : memref<1x!tpu.dma_semaphore, #tpu.memory_space<semaphore_mem>> -> memref<!tpu.dma_semaphore, #tpu.memory_space<semaphore_mem>>
      tpu.enqueue_dma source(%arg5 : memref<1x1x128xf32, #tpu.memory_space<any>>) target(%arg9 : memref<1x1x128xf32, #tpu.memory_space<vmem>>) target_semaphore(%30 : memref<!tpu.dma_semaphore, #tpu.memory_space<semaphore_mem>>)
      %cst = arith.constant 0.000000e+00 : f32
      %31 = vector.broadcast %cst : f32 to vector<2x2x32xf32>
      %c0_27 = arith.constant 0 : index
      %c0_28 = arith.constant 0 : index
      %c0_29 = arith.constant 0 : index
      %32 = vector.load %arg11[%c0_27, %c0_28, %c0_29] : memref<2x2x32xf32, #tpu.memory_space<vmem>>, vector<2x2x32xf32>
      tpu.vector_store %arg11[%c0_27, %c0_28, %c0_29], %31 {strides = array<i32>} : memref<2x2x32xf32, #tpu.memory_space<vmem>>, vector<2x2x32xf32>,
      %cst_30 = arith.constant 0.000000e+00 : f32
      %33 = vector.broadcast %cst_30 : f32 to vector<2x2x32xf32>
      %c0_31 = arith.constant 0 : index
      %c0_32 = arith.constant 0 : index
      %c0_33 = arith.constant 0 : index
      %34 = vector.load %arg12[%c0_31, %c0_32, %c0_33] : memref<2x2x32xf32, #tpu.memory_space<vmem>>, vector<2x2x32xf32>
      tpu.vector_store %arg12[%c0_31, %c0_32, %c0_33], %33 {strides = array<i32>} : memref<2x2x32xf32, #tpu.memory_space<vmem>>, vector<2x2x32xf32>,
      %c0_i32_34 = arith.constant 0 : i32
      %35 = tpu.memref_slice %arg10[%c0_i32_34] : memref<3x!tpu.dma_semaphore, #tpu.memory_space<semaphore_mem>> -> memref<1x!tpu.dma_semaphore, #tpu.memory_space<semaphore_mem>>
      %36 = tpu.memref_squeeze %35 : memref<1x!tpu.dma_semaphore, #tpu.memory_space<semaphore_mem>> -> memref<!tpu.dma_semaphore, #tpu.memory_space<semaphore_mem>>
      tpu.wait_dma2 semaphore(%36 : memref<!tpu.dma_semaphore, #tpu.memory_space<semaphore_mem>>) src(%arg3 : memref<32x128xbf16, #tpu.memory_space<any>>) dst(%arg7 : memref<32x128xbf16, #tpu.memory_space<vmem>>)
      %c1_i32_35 = arith.constant 1 : i32
      %37 = tpu.memref_slice %arg10[%c1_i32_35] : memref<3x!tpu.dma_semaphore, #tpu.memory_space<semaphore_mem>> -> memref<1x!tpu.dma_semaphore, #tpu.memory_space<semaphore_mem>>
      %38 = tpu.memref_squeeze %37 : memref<1x!tpu.dma_semaphore, #tpu.memory_space<semaphore_mem>> -> memref<!tpu.dma_semaphore, #tpu.memory_space<semaphore_mem>>
      tpu.wait_dma2 semaphore(%38 : memref<!tpu.dma_semaphore, #tpu.memory_space<semaphore_mem>>) src(%arg4 : memref<1x64x128xbf16, #tpu.memory_space<any>>) dst(%arg8 : memref<1x64x128xbf16, #tpu.memory_space<vmem>>)
      %c2_i32_36 = arith.constant 2 : i32
      %39 = tpu.memref_slice %arg10[%c2_i32_36] : memref<3x!tpu.dma_semaphore, #tpu.memory_space<semaphore_mem>> -> memref<1x!tpu.dma_semaphore, #tpu.memory_space<semaphore_mem>>
      %40 = tpu.memref_squeeze %39 : memref<1x!tpu.dma_semaphore, #tpu.memory_space<semaphore_mem>> -> memref<!tpu.dma_semaphore, #tpu.memory_space<semaphore_mem>>
      tpu.wait_dma2 semaphore(%40 : memref<!tpu.dma_semaphore, #tpu.memory_space<semaphore_mem>>) src(%arg5 : memref<1x1x128xf32, #tpu.memory_space<any>>) dst(%arg9 : memref<1x1x128xf32, #tpu.memory_space<vmem>>)
    } else {
    }
    %c0 = arith.constant 0 : index
    %c0_1 = arith.constant 0 : index
    %c0_2 = arith.constant 0 : index
    %3 = vector.load %arg11[%c0, %c0_1, %c0_2] : memref<2x2x32xf32, #tpu.memory_space<vmem>>, vector<1x2x32xf32>
    %4 = vector.shape_cast %3 : vector<1x2x32xf32> to vector<2x32xf32>
    %c1 = arith.constant 1 : index
    %c0_3 = arith.constant 0 : index
    %c0_4 = arith.constant 0 : index
    %5 = vector.load %arg11[%c1, %c0_3, %c0_4] : memref<2x2x32xf32, #tpu.memory_space<vmem>>, vector<1x2x32xf32>
    %6 = vector.shape_cast %5 : vector<1x2x32xf32> to vector<2x32xf32>
    %c0_5 = arith.constant 0 : index
    %c0_6 = arith.constant 0 : index
    %c0_7 = arith.constant 0 : index
    %7 = vector.load %arg12[%c0_5, %c0_6, %c0_7] : memref<2x2x32xf32, #tpu.memory_space<vmem>>, vector<1x2x32xf32>
    %8 = vector.shape_cast %7 : vector<1x2x32xf32> to vector<2x32xf32>
    %c1_8 = arith.constant 1 : index
    %c0_9 = arith.constant 0 : index
    %c0_10 = arith.constant 0 : index
    %9 = vector.load %arg12[%c1_8, %c0_9, %c0_10] : memref<2x2x32xf32, #tpu.memory_space<vmem>>, vector<1x2x32xf32>
    %10 = vector.shape_cast %9 : vector<1x2x32xf32> to vector<2x32xf32>
    %c0_i32_11 = arith.constant 0 : i32
    %c3_i32 = arith.constant 3 : i32
    %11 = arith.addi %c0_i32_11, %c3_i32 : i32
    %c1_i32 = arith.constant 1 : i32
    %12:4 = scf.for %arg13 = %c0_i32_11 to %11 step %c1_i32 iter_args(%arg14 = %4, %arg15 = %6, %arg16 = %8, %arg17 = %10) -> (vector<2x32xf32>, vector<2x32xf32>, vector<2x32xf32>, vector<2x32xf32>)  : i32 {
      %c3_i32_25 = arith.constant 3 : i32
      %25 = arith.muli %arg13, %c3_i32_25 : i32
      %c0_i32_26 = arith.constant 0 : i32
      %26 = arith.addi %25, %c0_i32_26 : i32
      %27 = arith.index_cast %26 : i32 to index
      %c0_27 = arith.constant 0 : index
      %c0_28 = arith.constant 0 : index
      %28 = vector.load %arg2[%27, %c0_27, %c0_28] : memref<9x2x128xbf16, #tpu.memory_space<vmem>>, vector<1x2x128xbf16>
      %29 = vector.shape_cast %28 : vector<1x2x128xbf16> to vector<2x128xbf16>
      %30 = arith.extf %29 : vector<2x128xbf16> to vector<2x128xf32>
      %31 = arith.truncf %arg14 : vector<2x32xf32> to vector<2x32xbf16>
      %c0_29 = arith.constant 0 : index
      %c0_30 = arith.constant 0 : index
      %32 = vector.load %arg7[%c0_29, %c0_30] : memref<32x128xbf16, #tpu.memory_space<vmem>>, vector<32x128xbf16>
      %cst = arith.constant dense<0.000000e+00> : vector<2x128xf32>
      %33 = tpu.matmul %31, %32, %cst {dimension_numbers = #tpu.dot_dimension_numbers<[1], [0], [0], [1], [0, 0, 1, 1], [], []>} : vector<2x32xbf16>, vector<32x128xbf16>, vector<2x128xf32> -> vector<2x128xf32>
      %34 = arith.addf %30, %33 : vector<2x128xf32>
      %35 = vector.extract_strided_slice %34 {offsets = [0, 0], sizes = [2, 32], strides = [1, 1]} : vector<2x128xf32> to vector<2x32xf32>
      %cst_31 = arith.constant 0.000000e+00 : f32
      %36 = vector.broadcast %cst_31 : f32 to vector<2x32xf32>
      %37 = arith.subf %36, %35 : vector<2x32xf32>
      %38 = math.exp %37 : vector<2x32xf32>
      %cst_32 = arith.constant 1.000000e+00 : f32
      %39 = vector.broadcast %cst_32 : f32 to vector<2x32xf32>
      %40 = arith.addf %39, %38 : vector<2x32xf32>
      %41 = tpu.reciprocal %40 {approx = true} : vector<2x32xf32> -> vector<2x32xf32>
      %42 = vector.extract_strided_slice %34 {offsets = [0, 32], sizes = [2, 32], strides = [1, 1]} : vector<2x128xf32> to vector<2x32xf32>
      %cst_33 = arith.constant 0.000000e+00 : f32
      %43 = vector.broadcast %cst_33 : f32 to vector<2x32xf32>
      %44 = arith.subf %43, %42 : vector<2x32xf32>
      %45 = math.exp %44 : vector<2x32xf32>
      %cst_34 = arith.constant 1.000000e+00 : f32
      %46 = vector.broadcast %cst_34 : f32 to vector<2x32xf32>
      %47 = arith.addf %46, %45 : vector<2x32xf32>
      %48 = tpu.reciprocal %47 {approx = true} : vector<2x32xf32> -> vector<2x32xf32>
      %49 = vector.extract_strided_slice %34 {offsets = [0, 64], sizes = [2, 32], strides = [1, 1]} : vector<2x128xf32> to vector<2x32xf32>
      %50 = math.tanh %49 : vector<2x32xf32>
      %51 = vector.extract_strided_slice %34 {offsets = [0, 96], sizes = [2, 32], strides = [1, 1]} : vector<2x128xf32> to vector<2x32xf32>
      %cst_35 = arith.constant 0.000000e+00 : f32
      %52 = vector.broadcast %cst_35 : f32 to vector<2x32xf32>
      %53 = arith.subf %52, %51 : vector<2x32xf32>
      %54 = math.exp %53 : vector<2x32xf32>
      %cst_36 = arith.constant 1.000000e+00 : f32
      %55 = vector.broadcast %cst_36 : f32 to vector<2x32xf32>
      %56 = arith.addf %55, %54 : vector<2x32xf32>
      %57 = tpu.reciprocal %56 {approx = true} : vector<2x32xf32> -> vector<2x32xf32>
      %58 = arith.mulf %48, %arg16 : vector<2x32xf32>
      %59 = arith.mulf %41, %50 : vector<2x32xf32>
      %60 = arith.addf %58, %59 : vector<2x32xf32>
      %61 = math.tanh %60 : vector<2x32xf32>
      %62 = arith.mulf %57, %61 : vector<2x32xf32>
      %63 = arith.truncf %62 : vector<2x32xf32> to vector<2x32xbf16>
      %64 = arith.truncf %arg15 : vector<2x32xf32> to vector<2x32xbf16>
      %65 = tpu.concatenate %63, %64 in 1 : vector<2x32xbf16>, vector<2x32xbf16> -> vector<2x64xbf16>
      %c0_37 = arith.constant 0 : index
      %c0_38 = arith.constant 0 : index
      %c0_39 = arith.constant 0 : index
      %66 = vector.load %arg8[%c0_37, %c0_38, %c0_39] : memref<1x64x128xbf16, #tpu.memory_space<vmem>>, vector<1x64x128xbf16>
      %67 = vector.shape_cast %66 : vector<1x64x128xbf16> to vector<64x128xbf16>
      %cst_40 = arith.constant dense<0.000000e+00> : vector<2x128xf32>
      %68 = tpu.matmul %65, %67, %cst_40 {dimension_numbers = #tpu.dot_dimension_numbers<[1], [0], [0], [1], [0, 0, 1, 1], [], []>} : vector<2x64xbf16>, vector<64x128xbf16>, vector<2x128xf32> -> vector<2x128xf32>
      %c0_41 = arith.constant 0 : index
      %c0_42 = arith.constant 0 : index
      %c0_43 = arith.constant 0 : index
      %69 = vector.load %arg9[%c0_41, %c0_42, %c0_43] : memref<1x1x128xf32, #tpu.memory_space<vmem>>, vector<1x1x128xf32>
      %70 = vector.shape_cast %69 : vector<1x1x128xf32> to vector<1x128xf32>
      %71 = vector.broadcast %70 : vector<1x128xf32> to vector<2x128xf32>
      %72 = arith.addf %68, %71 : vector<2x128xf32>
      %73 = vector.extract_strided_slice %72 {offsets = [0, 0], sizes = [2, 32], strides = [1, 1]} : vector<2x128xf32> to vector<2x32xf32>
      %cst_44 = arith.constant 0.000000e+00 : f32
      %74 = vector.broadcast %cst_44 : f32 to vector<2x32xf32>
      %75 = arith.subf %74, %73 : vector<2x32xf32>
      %76 = math.exp %75 : vector<2x32xf32>
      %cst_45 = arith.constant 1.000000e+00 : f32
      %77 = vector.broadcast %cst_45 : f32 to vector<2x32xf32>
      %78 = arith.addf %77, %76 : vector<2x32xf32>
      %79 = tpu.reciprocal %78 {approx = true} : vector<2x32xf32> -> vector<2x32xf32>
      %80 = vector.extract_strided_slice %72 {offsets = [0, 32], sizes = [2, 32], strides = [1, 1]} : vector<2x128xf32> to vector<2x32xf32>
      %cst_46 = arith.constant 0.000000e+00 : f32
      %81 = vector.broadcast %cst_46 : f32 to vector<2x32xf32>
      %82 = arith.subf %81, %80 : vector<2x32xf32>
      %83 = math.exp %82 : vector<2x32xf32>
      %cst_47 = arith.constant 1.000000e+00 : f32
      %84 = vector.broadcast %cst_47 : f32 to vector<2x32xf32>
      %85 = arith.addf %84, %83 : vector<2x32xf32>
      %86 = tpu.reciprocal %85 {approx = true} : vector<2x32xf32> -> vector<2x32xf32>
      %87 = vector.extract_strided_slice %72 {offsets = [0, 64], sizes = [2, 32], strides = [1, 1]} : vector<2x128xf32> to vector<2x32xf32>
      %88 = math.tanh %87 : vector<2x32xf32>
      %89 = vector.extract_strided_slice %72 {offsets = [0, 96], sizes = [2, 32], strides = [1, 1]} : vector<2x128xf32> to vector<2x32xf32>
      %cst_48 = arith.constant 0.000000e+00 : f32
      %90 = vector.broadcast %cst_48 : f32 to vector<2x32xf32>
      %91 = arith.subf %90, %89 : vector<2x32xf32>
      %92 = math.exp %91 : vector<2x32xf32>
      %cst_49 = arith.constant 1.000000e+00 : f32
      %93 = vector.broadcast %cst_49 : f32 to vector<2x32xf32>
      %94 = arith.addf %93, %92 : vector<2x32xf32>
      %95 = tpu.reciprocal %94 {approx = true} : vector<2x32xf32> -> vector<2x32xf32>
      %96 = arith.mulf %86, %arg17 : vector<2x32xf32>
      %97 = arith.mulf %79, %88 : vector<2x32xf32>
      %98 = arith.addf %96, %97 : vector<2x32xf32>
      %99 = math.tanh %98 : vector<2x32xf32>
      %100 = arith.mulf %95, %99 : vector<2x32xf32>
      %101 = arith.truncf %100 : vector<2x32xf32> to vector<2x32xbf16>
      %102 = arith.index_cast %26 : i32 to index
      %c0_50 = arith.constant 0 : index
      %c0_51 = arith.constant 0 : index
      %103 = vector.load %arg6[%102, %c0_50, %c0_51] : memref<9x2x32xbf16, #tpu.memory_space<vmem>>, vector<1x2x32xbf16>
      %104 = vector.shape_cast %103 : vector<1x2x32xbf16> to vector<2x32xbf16>
      %105 = vector.shape_cast %101 : vector<2x32xbf16> to vector<1x2x32xbf16>
      tpu.vector_store %arg6[%102, %c0_50, %c0_51], %105 {strides = array<i32>} : memref<9x2x32xbf16, #tpu.memory_space<vmem>>, vector<1x2x32xbf16>,
      %c3_i32_52 = arith.constant 3 : i32
      %106 = arith.muli %arg13, %c3_i32_52 : i32
      %c1_i32_53 = arith.constant 1 : i32
      %107 = arith.addi %106, %c1_i32_53 : i32
      %108 = arith.index_cast %107 : i32 to index
      %c0_54 = arith.constant 0 : index
      %c0_55 = arith.constant 0 : index
      %109 = vector.load %arg2[%108, %c0_54, %c0_55] : memref<9x2x128xbf16, #tpu.memory_space<vmem>>, vector<1x2x128xbf16>
      %110 = vector.shape_cast %109 : vector<1x2x128xbf16> to vector<2x128xbf16>
      %111 = arith.extf %110 : vector<2x128xbf16> to vector<2x128xf32>
      %112 = arith.truncf %62 : vector<2x32xf32> to vector<2x32xbf16>
      %c0_56 = arith.constant 0 : index
      %c0_57 = arith.constant 0 : index
      %113 = vector.load %arg7[%c0_56, %c0_57] : memref<32x128xbf16, #tpu.memory_space<vmem>>, vector<32x128xbf16>
      %cst_58 = arith.constant dense<0.000000e+00> : vector<2x128xf32>
      %114 = tpu.matmul %112, %113, %cst_58 {dimension_numbers = #tpu.dot_dimension_numbers<[1], [0], [0], [1], [0, 0, 1, 1], [], []>} : vector<2x32xbf16>, vector<32x128xbf16>, vector<2x128xf32> -> vector<2x128xf32>
      %115 = arith.addf %111, %114 : vector<2x128xf32>
      %116 = vector.extract_strided_slice %115 {offsets = [0, 0], sizes = [2, 32], strides = [1, 1]} : vector<2x128xf32> to vector<2x32xf32>
      %cst_59 = arith.constant 0.000000e+00 : f32
      %117 = vector.broadcast %cst_59 : f32 to vector<2x32xf32>
      %118 = arith.subf %117, %116 : vector<2x32xf32>
      %119 = math.exp %118 : vector<2x32xf32>
      %cst_60 = arith.constant 1.000000e+00 : f32
      %120 = vector.broadcast %cst_60 : f32 to vector<2x32xf32>
      %121 = arith.addf %120, %119 : vector<2x32xf32>
      %122 = tpu.reciprocal %121 {approx = true} : vector<2x32xf32> -> vector<2x32xf32>
      %123 = vector.extract_strided_slice %115 {offsets = [0, 32], sizes = [2, 32], strides = [1, 1]} : vector<2x128xf32> to vector<2x32xf32>
      %cst_61 = arith.constant 0.000000e+00 : f32
      %124 = vector.broadcast %cst_61 : f32 to vector<2x32xf32>
      %125 = arith.subf %124, %123 : vector<2x32xf32>
      %126 = math.exp %125 : vector<2x32xf32>
      %cst_62 = arith.constant 1.000000e+00 : f32
      %127 = vector.broadcast %cst_62 : f32 to vector<2x32xf32>
      %128 = arith.addf %127, %126 : vector<2x32xf32>
      %129 = tpu.reciprocal %128 {approx = true} : vector<2x32xf32> -> vector<2x32xf32>
      %130 = vector.extract_strided_slice %115 {offsets = [0, 64], sizes = [2, 32], strides = [1, 1]} : vector<2x128xf32> to vector<2x32xf32>
      %131 = math.tanh %130 : vector<2x32xf32>
      %132 = vector.extract_strided_slice %115 {offsets = [0, 96], sizes = [2, 32], strides = [1, 1]} : vector<2x128xf32> to vector<2x32xf32>
      %cst_63 = arith.constant 0.000000e+00 : f32
      %133 = vector.broadcast %cst_63 : f32 to vector<2x32xf32>
      %134 = arith.subf %133, %132 : vector<2x32xf32>
      %135 = math.exp %134 : vector<2x32xf32>
      %cst_64 = arith.constant 1.000000e+00 : f32
      %136 = vector.broadcast %cst_64 : f32 to vector<2x32xf32>
      %137 = arith.addf %136, %135 : vector<2x32xf32>
      %138 = tpu.reciprocal %137 {approx = true} : vector<2x32xf32> -> vector<2x32xf32>
      %139 = arith.mulf %129, %60 : vector<2x32xf32>
      %140 = arith.mulf %122, %131 : vector<2x32xf32>
      %141 = arith.addf %139, %140 : vector<2x32xf32>
      %142 = math.tanh %141 : vector<2x32xf32>
      %143 = arith.mulf %138, %142 : vector<2x32xf32>
      %144 = arith.truncf %143 : vector<2x32xf32> to vector<2x32xbf16>
      %145 = arith.truncf %100 : vector<2x32xf32> to vector<2x32xbf16>
      %146 = tpu.concatenate %144, %145 in 1 : vector<2x32xbf16>, vector<2x32xbf16> -> vector<2x64xbf16>
      %c0_65 = arith.constant 0 : index
      %c0_66 = arith.constant 0 : index
      %c0_67 = arith.constant 0 : index
      %147 = vector.load %arg8[%c0_65, %c0_66, %c0_67] : memref<1x64x128xbf16, #tpu.memory_space<vmem>>, vector<1x64x128xbf16>
      %148 = vector.shape_cast %147 : vector<1x64x128xbf16> to vector<64x128xbf16>
      %cst_68 = arith.constant dense<0.000000e+00> : vector<2x128xf32>
      %149 = tpu.matmul %146, %148, %cst_68 {dimension_numbers = #tpu.dot_dimension_numbers<[1], [0], [0], [1], [0, 0, 1, 1], [], []>} : vector<2x64xbf16>, vector<64x128xbf16>, vector<2x128xf32> -> vector<2x128xf32>
      %c0_69 = arith.constant 0 : index
      %c0_70 = arith.constant 0 : index
      %c0_71 = arith.constant 0 : index
      %150 = vector.load %arg9[%c0_69, %c0_70, %c0_71] : memref<1x1x128xf32, #tpu.memory_space<vmem>>, vector<1x1x128xf32>
      %151 = vector.shape_cast %150 : vector<1x1x128xf32> to vector<1x128xf32>
      %152 = vector.broadcast %151 : vector<1x128xf32> to vector<2x128xf32>
      %153 = arith.addf %149, %152 : vector<2x128xf32>
      %154 = vector.extract_strided_slice %153 {offsets = [0, 0], sizes = [2, 32], strides = [1, 1]} : vector<2x128xf32> to vector<2x32xf32>
      %cst_72 = arith.constant 0.000000e+00 : f32
      %155 = vector.broadcast %cst_72 : f32 to vector<2x32xf32>
      %156 = arith.subf %155, %154 : vector<2x32xf32>
      %157 = math.exp %156 : vector<2x32xf32>
      %cst_73 = arith.constant 1.000000e+00 : f32
      %158 = vector.broadcast %cst_73 : f32 to vector<2x32xf32>
      %159 = arith.addf %158, %157 : vector<2x32xf32>
      %160 = tpu.reciprocal %159 {approx = true} : vector<2x32xf32> -> vector<2x32xf32>
      %161 = vector.extract_strided_slice %153 {offsets = [0, 32], sizes = [2, 32], strides = [1, 1]} : vector<2x128xf32> to vector<2x32xf32>
      %cst_74 = arith.constant 0.000000e+00 : f32
      %162 = vector.broadcast %cst_74 : f32 to vector<2x32xf32>
      %163 = arith.subf %162, %161 : vector<2x32xf32>
      %164 = math.exp %163 : vector<2x32xf32>
      %cst_75 = arith.constant 1.000000e+00 : f32
      %165 = vector.broadcast %cst_75 : f32 to vector<2x32xf32>
      %166 = arith.addf %165, %164 : vector<2x32xf32>
      %167 = tpu.reciprocal %166 {approx = true} : vector<2x32xf32> -> vector<2x32xf32>
      %168 = vector.extract_strided_slice %153 {offsets = [0, 64], sizes = [2, 32], strides = [1, 1]} : vector<2x128xf32> to vector<2x32xf32>
      %169 = math.tanh %168 : vector<2x32xf32>
      %170 = vector.extract_strided_slice %153 {offsets = [0, 96], sizes = [2, 32], strides = [1, 1]} : vector<2x128xf32> to vector<2x32xf32>
      %cst_76 = arith.constant 0.000000e+00 : f32
      %171 = vector.broadcast %cst_76 : f32 to vector<2x32xf32>
      %172 = arith.subf %171, %170 : vector<2x32xf32>
      %173 = math.exp %172 : vector<2x32xf32>
      %cst_77 = arith.constant 1.000000e+00 : f32
      %174 = vector.broadcast %cst_77 : f32 to vector<2x32xf32>
      %175 = arith.addf %174, %173 : vector<2x32xf32>
      %176 = tpu.reciprocal %175 {approx = true} : vector<2x32xf32> -> vector<2x32xf32>
      %177 = arith.mulf %167, %98 : vector<2x32xf32>
      %178 = arith.mulf %160, %169 : vector<2x32xf32>
      %179 = arith.addf %177, %178 : vector<2x32xf32>
      %180 = math.tanh %179 : vector<2x32xf32>
      %181 = arith.mulf %176, %180 : vector<2x32xf32>
      %182 = arith.truncf %181 : vector<2x32xf32> to vector<2x32xbf16>
      %183 = arith.index_cast %107 : i32 to index
      %c0_78 = arith.constant 0 : index
      %c0_79 = arith.constant 0 : index
      %184 = vector.load %arg6[%183, %c0_78, %c0_79] : memref<9x2x32xbf16, #tpu.memory_space<vmem>>, vector<1x2x32xbf16>
      %185 = vector.shape_cast %184 : vector<1x2x32xbf16> to vector<2x32xbf16>
      %186 = vector.shape_cast %182 : vector<2x32xbf16> to vector<1x2x32xbf16>
      tpu.vector_store %arg6[%183, %c0_78, %c0_79], %186 {strides = array<i32>} : memref<9x2x32xbf16, #tpu.memory_space<vmem>>, vector<1x2x32xbf16>,
      %c3_i32_80 = arith.constant 3 : i32
      %187 = arith.muli %arg13, %c3_i32_80 : i32
      %c2_i32 = arith.constant 2 : i32
      %188 = arith.addi %187, %c2_i32 : i32
      %189 = arith.index_cast %188 : i32 to index
      %c0_81 = arith.constant 0 : index
      %c0_82 = arith.constant 0 : index
      %190 = vector.load %arg2[%189, %c0_81, %c0_82] : memref<9x2x128xbf16, #tpu.memory_space<vmem>>, vector<1x2x128xbf16>
      %191 = vector.shape_cast %190 : vector<1x2x128xbf16> to vector<2x128xbf16>
      %192 = arith.extf %191 : vector<2x128xbf16> to vector<2x128xf32>
      %193 = arith.truncf %143 : vector<2x32xf32> to vector<2x32xbf16>
      %c0_83 = arith.constant 0 : index
      %c0_84 = arith.constant 0 : index
      %194 = vector.load %arg7[%c0_83, %c0_84] : memref<32x128xbf16, #tpu.memory_space<vmem>>, vector<32x128xbf16>
      %cst_85 = arith.constant dense<0.000000e+00> : vector<2x128xf32>
      %195 = tpu.matmul %193, %194, %cst_85 {dimension_numbers = #tpu.dot_dimension_numbers<[1], [0], [0], [1], [0, 0, 1, 1], [], []>} : vector<2x32xbf16>, vector<32x128xbf16>, vector<2x128xf32> -> vector<2x128xf32>
      %196 = arith.addf %192, %195 : vector<2x128xf32>
      %197 = vector.extract_strided_slice %196 {offsets = [0, 0], sizes = [2, 32], strides = [1, 1]} : vector<2x128xf32> to vector<2x32xf32>
      %cst_86 = arith.constant 0.000000e+00 : f32
      %198 = vector.broadcast %cst_86 : f32 to vector<2x32xf32>
      %199 = arith.subf %198, %197 : vector<2x32xf32>
      %200 = math.exp %199 : vector<2x32xf32>
      %cst_87 = arith.constant 1.000000e+00 : f32
      %201 = vector.broadcast %cst_87 : f32 to vector<2x32xf32>
      %202 = arith.addf %201, %200 : vector<2x32xf32>
      %203 = tpu.reciprocal %202 {approx = true} : vector<2x32xf32> -> vector<2x32xf32>
      %204 = vector.extract_strided_slice %196 {offsets = [0, 32], sizes = [2, 32], strides = [1, 1]} : vector<2x128xf32> to vector<2x32xf32>
      %cst_88 = arith.constant 0.000000e+00 : f32
      %205 = vector.broadcast %cst_88 : f32 to vector<2x32xf32>
      %206 = arith.subf %205, %204 : vector<2x32xf32>
      %207 = math.exp %206 : vector<2x32xf32>
      %cst_89 = arith.constant 1.000000e+00 : f32
      %208 = vector.broadcast %cst_89 : f32 to vector<2x32xf32>
      %209 = arith.addf %208, %207 : vector<2x32xf32>
      %210 = tpu.reciprocal %209 {approx = true} : vector<2x32xf32> -> vector<2x32xf32>
      %211 = vector.extract_strided_slice %196 {offsets = [0, 64], sizes = [2, 32], strides = [1, 1]} : vector<2x128xf32> to vector<2x32xf32>
      %212 = math.tanh %211 : vector<2x32xf32>
      %213 = vector.extract_strided_slice %196 {offsets = [0, 96], sizes = [2, 32], strides = [1, 1]} : vector<2x128xf32> to vector<2x32xf32>
      %cst_90 = arith.constant 0.000000e+00 : f32
      %214 = vector.broadcast %cst_90 : f32 to vector<2x32xf32>
      %215 = arith.subf %214, %213 : vector<2x32xf32>
      %216 = math.exp %215 : vector<2x32xf32>
      %cst_91 = arith.constant 1.000000e+00 : f32
      %217 = vector.broadcast %cst_91 : f32 to vector<2x32xf32>
      %218 = arith.addf %217, %216 : vector<2x32xf32>
      %219 = tpu.reciprocal %218 {approx = true} : vector<2x32xf32> -> vector<2x32xf32>
      %220 = arith.mulf %210, %141 : vector<2x32xf32>
      %221 = arith.mulf %203, %212 : vector<2x32xf32>
      %222 = arith.addf %220, %221 : vector<2x32xf32>
      %223 = math.tanh %222 : vector<2x32xf32>
      %224 = arith.mulf %219, %223 : vector<2x32xf32>
      %225 = arith.truncf %224 : vector<2x32xf32> to vector<2x32xbf16>
      %226 = arith.truncf %181 : vector<2x32xf32> to vector<2x32xbf16>
      %227 = tpu.concatenate %225, %226 in 1 : vector<2x32xbf16>, vector<2x32xbf16> -> vector<2x64xbf16>
      %c0_92 = arith.constant 0 : index
      %c0_93 = arith.constant 0 : index
      %c0_94 = arith.constant 0 : index
      %228 = vector.load %arg8[%c0_92, %c0_93, %c0_94] : memref<1x64x128xbf16, #tpu.memory_space<vmem>>, vector<1x64x128xbf16>
      %229 = vector.shape_cast %228 : vector<1x64x128xbf16> to vector<64x128xbf16>
      %cst_95 = arith.constant dense<0.000000e+00> : vector<2x128xf32>
      %230 = tpu.matmul %227, %229, %cst_95 {dimension_numbers = #tpu.dot_dimension_numbers<[1], [0], [0], [1], [0, 0, 1, 1], [], []>} : vector<2x64xbf16>, vector<64x128xbf16>, vector<2x128xf32> -> vector<2x128xf32>
      %c0_96 = arith.constant 0 : index
      %c0_97 = arith.constant 0 : index
      %c0_98 = arith.constant 0 : index
      %231 = vector.load %arg9[%c0_96, %c0_97, %c0_98] : memref<1x1x128xf32, #tpu.memory_space<vmem>>, vector<1x1x128xf32>
      %232 = vector.shape_cast %231 : vector<1x1x128xf32> to vector<1x128xf32>
      %233 = vector.broadcast %232 : vector<1x128xf32> to vector<2x128xf32>
      %234 = arith.addf %230, %233 : vector<2x128xf32>
      %235 = vector.extract_strided_slice %234 {offsets = [0, 0], sizes = [2, 32], strides = [1, 1]} : vector<2x128xf32> to vector<2x32xf32>
      %cst_99 = arith.constant 0.000000e+00 : f32
      %236 = vector.broadcast %cst_99 : f32 to vector<2x32xf32>
      %237 = arith.subf %236, %235 : vector<2x32xf32>
      %238 = math.exp %237 : vector<2x32xf32>
      %cst_100 = arith.constant 1.000000e+00 : f32
      %239 = vector.broadcast %cst_100 : f32 to vector<2x32xf32>
      %240 = arith.addf %239, %238 : vector<2x32xf32>
      %241 = tpu.reciprocal %240 {approx = true} : vector<2x32xf32> -> vector<2x32xf32>
      %242 = vector.extract_strided_slice %234 {offsets = [0, 32], sizes = [2, 32], strides = [1, 1]} : vector<2x128xf32> to vector<2x32xf32>
      %cst_101 = arith.constant 0.000000e+00 : f32
      %243 = vector.broadcast %cst_101 : f32 to vector<2x32xf32>
      %244 = arith.subf %243, %242 : vector<2x32xf32>
      %245 = math.exp %244 : vector<2x32xf32>
      %cst_102 = arith.constant 1.000000e+00 : f32
      %246 = vector.broadcast %cst_102 : f32 to vector<2x32xf32>
      %247 = arith.addf %246, %245 : vector<2x32xf32>
      %248 = tpu.reciprocal %247 {approx = true} : vector<2x32xf32> -> vector<2x32xf32>
      %249 = vector.extract_strided_slice %234 {offsets = [0, 64], sizes = [2, 32], strides = [1, 1]} : vector<2x128xf32> to vector<2x32xf32>
      %250 = math.tanh %249 : vector<2x32xf32>
      %251 = vector.extract_strided_slice %234 {offsets = [0, 96], sizes = [2, 32], strides = [1, 1]} : vector<2x128xf32> to vector<2x32xf32>
      %cst_103 = arith.constant 0.000000e+00 : f32
      %252 = vector.broadcast %cst_103 : f32 to vector<2x32xf32>
      %253 = arith.subf %252, %251 : vector<2x32xf32>
      %254 = math.exp %253 : vector<2x32xf32>
      %cst_104 = arith.constant 1.000000e+00 : f32
      %255 = vector.broadcast %cst_104 : f32 to vector<2x32xf32>
      %256 = arith.addf %255, %254 : vector<2x32xf32>
      %257 = tpu.reciprocal %256 {approx = true} : vector<2x32xf32> -> vector<2x32xf32>
      %258 = arith.mulf %248, %179 : vector<2x32xf32>
      %259 = arith.mulf %241, %250 : vector<2x32xf32>
      %260 = arith.addf %258, %259 : vector<2x32xf32>
      %261 = math.tanh %260 : vector<2x32xf32>
      %262 = arith.mulf %257, %261 : vector<2x32xf32>
      %263 = arith.truncf %262 : vector<2x32xf32> to vector<2x32xbf16>
      %264 = arith.index_cast %188 : i32 to index
      %c0_105 = arith.constant 0 : index
      %c0_106 = arith.constant 0 : index
      %265 = vector.load %arg6[%264, %c0_105, %c0_106] : memref<9x2x32xbf16, #tpu.memory_space<vmem>>, vector<1x2x32xbf16>
      %266 = vector.shape_cast %265 : vector<1x2x32xbf16> to vector<2x32xbf16>
      %267 = vector.shape_cast %263 : vector<2x32xbf16> to vector<1x2x32xbf16>
      tpu.vector_store %arg6[%264, %c0_105, %c0_106], %267 {strides = array<i32>} : memref<9x2x32xbf16, #tpu.memory_space<vmem>>, vector<1x2x32xbf16>,
      scf.yield %224, %262, %222, %260 : vector<2x32xf32>, vector<2x32xf32>, vector<2x32xf32>, vector<2x32xf32>
    }
    %c3_i32_12 = arith.constant 3 : i32
    %c0_13 = arith.constant 0 : index
    %c0_14 = arith.constant 0 : index
    %c0_15 = arith.constant 0 : index
    %13 = vector.load %arg11[%c0_13, %c0_14, %c0_15] : memref<2x2x32xf32, #tpu.memory_space<vmem>>, vector<1x2x32xf32>
    %14 = vector.shape_cast %13 : vector<1x2x32xf32> to vector<2x32xf32>
    %15 = vector.shape_cast %12#0 : vector<2x32xf32> to vector<1x2x32xf32>
    tpu.vector_store %arg11[%c0_13, %c0_14, %c0_15], %15 {strides = array<i32>} : memref<2x2x32xf32, #tpu.memory_space<vmem>>, vector<1x2x32xf32>,
    %c0_16 = arith.constant 0 : index
    %c0_17 = arith.constant 0 : index
    %c0_18 = arith.constant 0 : index
    %16 = vector.load %arg12[%c0_16, %c0_17, %c0_18] : memref<2x2x32xf32, #tpu.memory_space<vmem>>, vector<1x2x32xf32>
    %17 = vector.shape_cast %16 : vector<1x2x32xf32> to vector<2x32xf32>
    %18 = vector.shape_cast %12#2 : vector<2x32xf32> to vector<1x2x32xf32>
    tpu.vector_store %arg12[%c0_16, %c0_17, %c0_18], %18 {strides = array<i32>} : memref<2x2x32xf32, #tpu.memory_space<vmem>>, vector<1x2x32xf32>,
    %c1_19 = arith.constant 1 : index
    %c0_20 = arith.constant 0 : index
    %c0_21 = arith.constant 0 : index
    %19 = vector.load %arg11[%c1_19, %c0_20, %c0_21] : memref<2x2x32xf32, #tpu.memory_space<vmem>>, vector<1x2x32xf32>
    %20 = vector.shape_cast %19 : vector<1x2x32xf32> to vector<2x32xf32>
    %21 = vector.shape_cast %12#1 : vector<2x32xf32> to vector<1x2x32xf32>
    tpu.vector_store %arg11[%c1_19, %c0_20, %c0_21], %21 {strides = array<i32>} : memref<2x2x32xf32, #tpu.memory_space<vmem>>, vector<1x2x32xf32>,
    %c1_22 = arith.constant 1 : index
    %c0_23 = arith.constant 0 : index
    %c0_24 = arith.constant 0 : index
    %22 = vector.load %arg12[%c1_22, %c0_23, %c0_24] : memref<2x2x32xf32, #tpu.memory_space<vmem>>, vector<1x2x32xf32>
    %23 = vector.shape_cast %22 : vector<1x2x32xf32> to vector<2x32xf32>
    %24 = vector.shape_cast %12#3 : vector<2x32xf32> to vector<1x2x32xf32>
    tpu.vector_store %arg12[%c1_22, %c0_23, %c0_24], %24 {strides = array<i32>} : memref<2x2x32xf32, #tpu.memory_space<vmem>>, vector<1x2x32xf32>,
    return
  }
  func.func @transform_0(%arg0: i32, %arg1: i32) -> (i32, i32, i32) {
    %c0_i32 = arith.constant 0 : i32
    %c0_i32_0 = arith.constant 0 : i32
    return %arg1, %arg0, %c0_i32 : i32, i32, i32
  }
  func.func @transform_4(%arg0: i32, %arg1: i32) -> (i32, i32, i32) {
    %c0_i32 = arith.constant 0 : i32
    %c0_i32_0 = arith.constant 0 : i32
    return %arg1, %arg0, %c0_i32 : i32, i32, i32
  }
}

</mosaic_0001>

<bundles_post_ra>
// kernel: cnn_to_rnn_forward.5
= control target key start
LH: loop header
LB: loop body
LE: loop exit
PB: predicated region body
PF: predicated region fallthrough
CT: control target
= control target key end

     0   :  { %vm49_vm0 = vcmask 261120   ;;  %s199_s1 = inlined_call_operand.vmem [shape: bf16[32,128], index: 1, kind: input, shape index: {}]   ;;  %s200_s0 = inlined_call_operand.vmem [shape: bf16[18,32], index: 0, kind: input, shape index: {}]   ;;  %s201_s2 = inlined_call_operand.vmem [shape: f32[1,128], index: 2, kind: input, shape index: {}]   ;;  %s202_s3 = inlined_call_operand.vmem [shape: bf16[18,128], index: 3, kind: output, shape index: {}]  }
   0x1   :  { %v154_v0 = vld [vmem:[%s199_s1 + $0x8] sm:$0xff]   ;;  %v155_v1 = vld [vmem:[%s199_s1] sm:$0xff]  }
   0x2   :  { %146 = vmatprep.subr.bf16.mxu0 %v154_v0  ;;  %v156_v2 = vld [vmem:[%s200_s0] sm:$0xff]   ;;  %v157_v3 = vld [vmem:[%s200_s0 + $0x8] ss:$0 sps:$4 sm:$0x11]  }
   0x3   :  { %147 = vmatpush3.bf16.msra.mxu0 %v154_v0  ;;  %150 = vmatprep.mubr.msk.bf16.mxu0 %vm49_vm0, %v156_v2  ;;  %v124_v4 = vld [vmem:[%s201_s2] ss:$0 sm:$0xff] }
   0x4   :  { %148 = vmatprep.subr.bf16.mxu0 %v155_v1 }
   0x7   :  { %149 = vmatpush3.bf16.msra.mxu0 %v155_v1 }
   0xa   :  { %151 = vmatmul.mubr.msk.bf16.vlgmr.msra.gmra.mxu0 %vm49_vm0, %v157_v3 }
  0xca   :  { %v152_v5 = vpop.f32.mrf.mxu0 }
  0xcb   :  { %v99_v6 = vadd.f32 %v152_v5, %v124_v4 }
  0xcc   :  { %v90_v7 = vpop.f32.mrf.mxu0 }
  0xcd   :  { %v136_v8 = vpack.c.bf16 %v99_v6, %v99_v6  ;;  %v91_v11 = vadd.f32 %v124_v4, %v90_v7 }
  0xce   :  { %v153_v9 = vpop.f32.mrf.mxu0 }
  0xcf   :  { %119 = vst [vmem:[%s202_s3 + $0x8] sm:$0x1] %v136_v8 }
  0xd0   :  { %v93_v10 = vpop.f32.mrf.mxu0 }
  0xd1   :  { %v94_v12 = vadd.f32 %v124_v4, %v93_v10 }
  0xd3   :  { %v140_v13 = vpack.c.bf16 %v94_v12, %v91_v11 }
  0xd5   :  { %141 = vst [vmem:[%s202_s3] sm:$0xff] %v140_v13  }

// kernel: cnn_to_rnn_forward.7
= control target key start
LH: loop header
LB: loop body
LE: loop exit
PB: predicated region body
PF: predicated region fallthrough
CT: control target
= control target key end

     0   :  { %vm49_vm0 = vcmask 261120   ;;  %vm107_vm1 = vcmask 517120   ;;  %vm104_vm2 = vcmask 523264   ;;  %s180_s1 = inlined_call_operand.vmem [shape: bf16[32,64], index: 1, kind: input, shape index: {}]   ;;  %s181_s0 = inlined_call_operand.vmem [shape: bf16[18,32], index: 0, kind: input, shape index: {}]   ;;  %s182_s2 = inlined_call_operand.vmem [shape: f32[1,64], index: 2, kind: input, shape index: {}]   ;;  %s183_s3 = inlined_call_operand.vmem [shape: f32[18,64], index: 3, kind: output, shape index: {}]  }
   0x1   :  { %v132_v0 = vld [vmem:[%s180_s1 + $0x8] sm:$0xff]   ;;  %v133_v1 = vld [vmem:[%s180_s1] sm:$0xff]  }
   0x2   :  { %124 = vmatprep.subr.bf16.mxu0 %v132_v0  ;;  %v134_v2 = vld [vmem:[%s181_s0] sm:$0xff]   ;;  %v135_v3 = vld [vmem:[%s181_s0 + $0x8] ss:$0 sps:$4 sm:$0x11]  }
   0x3   :  { %125 = vmatpush3.bf16.msra.mxu0 %v132_v0  ;;  %128 = vmatprep.mubr.msk.bf16.mxu0 %vm49_vm0, %v134_v2  ;;  %v113_v4 = vld [vmem:[%s182_s2] ss:$0 sm:$0xff] }
   0x4   :  { %126 = vmatprep.subr.bf16.mxu0 %v133_v1 }
   0x7   :  { %127 = vmatpush3.bf16.msra.mxu0 %v133_v1 }
   0xa   :  { %129 = vmatmul.mubr.msk.bf16.vlgmr.msra.gmra.mxu0 %vm49_vm0, %v135_v3 }
  0xca   :  { %v130_v5 = vpop.f32.mrf.mxu0 }
  0xcb   :  { %v99_v6 = vadd.f32 %v130_v5, %v113_v4 }
  0xcc   :  { %v90_v7 = vpop.f32.mrf.mxu0 }
  0xcd   :  { %108 = vst.msk [vmem:[%s183_s3 + $0x10] sm:$0x3] %vm107_vm1, %v99_v6  ;;  %v91_v8 = vadd.f32 %v113_v4, %v90_v7 }
  0xce   :  { %v131_v9 = vpop.f32.mrf.mxu0 }
  0xcf   :  { %105 = vst.msk [vmem:[%s183_s3] sm:$0xff] %vm104_vm2, %v91_v8 }
  0xd0   :  { %v93_v10 = vpop.f32.mrf.mxu0 }
  0xd1   :  { %v94_v11 = vadd.f32 %v113_v4, %v93_v10 }
  0xd3   :  { %106 = vst.msk [vmem:[%s183_s3 + $0x8] sm:$0xff] %vm104_vm2, %v94_v11 }

// kernel: cnn_to_rnn_forward.6
= control target key start
LH: loop header
LB: loop body
LE: loop exit
PB: predicated region body
PF: predicated region fallthrough
CT: control target
= control target key end

     0   :  { %s1490_s0 = inlined_call_operand.vmem [shape: bf16[9,2,128], index: 0, kind: input, shape index: {}]   ;;  %s1491_s1 = inlined_call_operand.vmem [shape: bf16[32,128], index: 1, kind: input, shape index: {}]   ;;  %s1492_s2 = inlined_call_operand.vmem [shape: bf16[1,64,128], index: 2, kind: input, shape index: {}]   ;;  %s1493_s3 = inlined_call_operand.vmem [shape: f32[1,1,128], index: 3, kind: input, shape index: {}]   ;;  %s1494_s4 = inlined_call_operand.vmem [shape: bf16[9,2,32], index: 4, kind: output, shape index: {}]  }
   0x1   :  { %v49_v0 = vld [vmem:[%s1491_s1] sm:$0xff]  ;;  %v51_v1 = vld [vmem:[%s1491_s1 + $0x8] sm:$0xff] }
   0x2   :  { %50 = vst [vmem:[#allocation2] sm:$0xff] %v49_v0  ;;  %52 = vst [vmem:[#allocation2 + $0x8] sm:$0xff] %v51_v1 }
   0x3   :  { %60 = vsyncadd [#allocation5], 256  ;;  %v95_v2 = vld [vmem:[%s1492_s2] sm:$0xff]  ;;  %v97_v3 = vld [vmem:[%s1492_s2 + $0x8] sm:$0xff] }
   0x4   :  { %96 = vst [vmem:[#allocation3] sm:$0xff] %v95_v2  ;;  %98 = vst [vmem:[#allocation3 + $0x8] sm:$0xff] %v97_v3  ;;  %v99_v4 = vld [vmem:[%s1492_s2 + $0x10] sm:$0xff]  ;;  %v101_v5 = vld [vmem:[%s1492_s2 + $0x18] sm:$0xff] }
   0x5   :  { %100 = vst [vmem:[#allocation3 + $0x10] sm:$0xff] %v99_v4  ;;  %102 = vst [vmem:[#allocation3 + $0x18] sm:$0xff] %v101_v5 }
   0x6   :  { %110 = vsyncadd [#allocation5 + $0x1], 512  ;;  %v130_v6 = vld [vmem:[%s1493_s3] sm:$0x1] }
   0x7   :  { %131 = vst [vmem:[#allocation4] sm:$0x1] %v130_v6 }
   0x8   :  { %157 = vsyncadd [#allocation5 + $0x2], 16  ;;  %vm158_vm0 = vcmask 254976   ;;  %v1270_v7 = vmov 0.0  }
   0x9   :  { %159 = vst.msk [vmem:[#allocation6] sm:$0x3] %vm158_vm0, %v1270_v7  ;;  %160 = vst.msk [vmem:[#allocation6 + $0x2] sm:$0x3] %vm158_vm0, %v1270_v7 }
   0xa   :  { %161 = vst.msk [vmem:[#allocation7] sm:$0x3] %vm158_vm0, %v1270_v7  ;;  %162 = vst.msk [vmem:[#allocation7 + $0x2] sm:$0x3] %vm158_vm0, %v1270_v7 }
   0xb   :  { %1244 = dma.done.wait [#allocation5], 256 }
   0xc   :  { %1245 = vsyncadd [#allocation5], 4294967040 }
   0xd   :  { %1246 = dma.done.wait [#allocation5 + $0x1], 512 }
   0xe   :  { %1247 = vsyncadd [#allocation5 + $0x1], 4294966784 }
   0xf   :  { %1248 = dma.done.wait [#allocation5 + $0x2], 16 }
  0x10   :  { %1249 = vsyncadd [#allocation5 + $0x2], 4294967280  ;;  %v176_v8 = vld [vmem:[#allocation6] sm:$0x3]   ;;  %v178_v9 = vld [vmem:[#allocation6 + $0x2] sm:$0x3]  }
  0x11   :  { %v179_v10 = vld [vmem:[#allocation7] sm:$0x3]   ;;  %v181_v11 = vld [vmem:[#allocation7 + $0x2] sm:$0x3]   ;;  %s1336_s2 = smov 0  }
  0x12 LB: > { %v1158_v12 = vld [vmem:[#allocation2 + $0x8] sm:$0xff]   ;;  %v1271_v13 = vmov 0.0   ;;  %v1159_v14 = vld [vmem:[#allocation2] sm:$0xff]   ;;  %vm1272_vm1 = vmmov 0   ;;  %v196_v15 = vpack.c.bf16 %v1264_v8, %v1264_v8  ;;  %vm213_vm2 = vcmask 261120   ;;  %s192_s3 = smul.u32 3, %s1268_s2  ;;  %s1268_s2 = sphi %s1336_s2, %s187_s2   ;;  %v1264_v8 = vphi %v176_v8, %v1498_v8   ;;  %v1260_v9 = vphi %v178_v9, %v1497_v9   ;;  %v1256_v10 = vphi %v179_v10, %v1496_v10   ;;  %v1252_v11 = vphi %v181_v11, %v1495_v11  }
  0x13   : > { %1050 = vmatprep.subr.bf16.mxu0 %v1271_v13  ;;  %1058 = vmatprep.subr.bf16.mxu1 %v1271_v13  ;;  %v1273_v22 = vmov 1983009808   ;;  %v268_v24 = vlaneseq  ;;  %s1274_s5 = smov 64   ;;  %s1275_s6 = smov 32   ;;  %v1160_v42 = vld [vmem:[#allocation3 + $0x18] sm:$0xff]   ;;  %v1161_v44 = vld [vmem:[#allocation3 + $0x10] sm:$0xff]   ;;  %v293_v48 = vpack.c.bf16 %v1260_v9, %v1260_v9 }
  0x14   : > { %1051 = vmatpush3.bf16.msra.mxu0 %v1158_v12  ;;  %1054 = vmatprep.mubr.msk.bf16.mxu0 %vm1272_vm1, %v1271_v13  ;;  %s1366_s30 = scalar_lea.vmem %s1490_s0, %s192_s3  ;;  %v266_v23 = vunpack.c.l.s4 %v1273_v22  ;;  %v1162_v43 = vld [vmem:[#allocation2 + $0x8] sm:$0xff]   ;;  %v1164_v45 = vld [vmem:[#allocation2] sm:$0xff]   ;;  %v1163_v46 = vld [vmem:[#allocation3 + $0x8] sm:$0xff]   ;;  %vm342_vm3 = vcmask 523264   ;;  %s431_s9 = scalar_lea.vmem %s1494_s4, %s192_s3  ;;  %vm432_vm4 = vcmask 253952  }
  0x15   : > { %1052 = vmatprep.subr.bf16.mxu0 %v1271_v13  ;;  %1066 = vmatprep.mubr.msk.bf16.mxu1 %vm1272_vm1, %v1271_v13  ;;  %v194_v16 = vld [vmem:[%s1366_s30] sm:$0x1]  ;;  %v1369_v27 = vshrl.u32 %v268_v24, 7  ;;  %v1165_v49 = vld [vmem:[#allocation3] sm:$0xff]   ;;  %v1001_v56 = vld [vmem:[%s1366_s30 + $0x1] sm:$0x1] }
  0x16   : > { %v195_v17 = vunpack.c.l.bf16 %v194_v16  ;;  %v267_v26 = vunpack.c.0.s8 %v266_v23  ;;  %1059 = vmatpush3.bf16.msra.mxu1 %v1160_v42  ;;  %v437_v57 = vunpack.c.l.bf16 %v1001_v56  ;;  %v1400_v58 = vld [vmem:[#allocation4] ss:$0 sm:$0xff]  ;;  %s1277_s10 = smov 96   ;;  %s187_s2 = sadd.s32 1, %s1268_s2  }
  0x17   : > { %1060 = vmatprep.subr.bf16.mxu1 %v1271_v13  ;;  %p184_p0 = scmp.ge.s32.totalorder %s187_s2, 3  }
  0x18   : > { %1053 = vmatpush3.bf16.msra.mxu0 %v1159_v14  ;;  %v1372_v28 = vsub.s32 %v267_v26, %v1369_v27 }
  0x19   : > { %1070 = vmatprep.subr.bf16.mxu0 %v1271_v13 }
  0x1a   : > { %v271_v30 = vrot.slane %v1256_v10, %v1372_v28  ;;  %1061 = vmatpush3.bf16.msra.mxu1 %v1161_v44 }
  0x1b   : > { %1055 = vmatmul.mubr.msk.bf16.vlgmr.msra.gmra.mxu0 %vm213_vm2, %v196_v15  ;;  %1062 = vmatprep.subr.bf16.mxu1 %v1271_v13 }
  0x1c   : > { %1074 = vmatprep.mubr.msk.bf16.mxu0 %vm1272_vm1, %v1271_v13  ;;  %1071 = vmatpush3.bf16.msra.mxu0 %v1162_v43 }
  0x1d   : > { %1072 = vmatprep.subr.bf16.mxu0 %v1271_v13 }
  0x1e   : > { %1063 = vmatpush3.bf16.msra.mxu1 %v1163_v46 }
  0x1f   : > { %1064 = vmatprep.subr.bf16.mxu1 %v1271_v13 }
  0x20   : > { %1073 = vmatpush3.bf16.msra.mxu0 %v1164_v45 }
  0x21   : > { %1078 = vmatprep.subr.bf16.mxu0 %v1271_v13 }
  0x22   : > { %1065 = vmatpush3.bf16.msra.mxu1 %v1165_v49 }
  0x23   : > { %1090 = vmatprep.subr.bf16.mxu1 %v1271_v13 }
  0xdb   : > { %v251_v18 = vpop.f32.mrf.mxu0 }
  0xdc   : > { %v257_v19 = vadd.f32 %v251_v18, %v195_v17 }
  0xdd   : > { %v1056_v20 = vpop.f32.mrf.mxu0 }
  0xde   : > { %1176 = vtanh.f32 %v257_v19  ;;  %v258_v31 = vsub.f32 0.0, %v257_v19 }
  0xdf   : > { %v254_v21 = vpop.f32.mrf.mxu0 }
  0xe0   : > { %v259_v32 = vmul.f32 1.442695, %v258_v31  ;;  %v1166_v31 = vld [vmem:[#allocation3 + $0x18] sm:$0xff]  }
  0xe1   : > { %v1057_v25 = vpop.f32.mrf.mxu0 }
  0xe2   : > { %1178 = vpow2.f32 %v259_v32  ;;  %v1168_v32 = vld [vmem:[#allocation2 + $0x8] sm:$0xff]  }
  0xeb   : > { %v1177_v29 = vpop.eup %1176 }
  0xec   : > { %277 = vrot.lane.b32.xlu0 %v1177_v29, %s1274_s5 }
  0xef   : > { %v1179_v33 = vpop.eup %1178 }
  0xf0   : > { %272 = vrot.lane.b32.xlu0 %v271_v30, %s1275_s6  ;;  %v261_v34 = vadd.f32 1.0, %v1179_v33  ;;  %v1167_v33 = vld [vmem:[#allocation3 + $0x10] sm:$0xff]  }
  0xf2   : > { %1180 = vrcp.f32 %v261_v34  ;;  %v1170_v34 = vld [vmem:[#allocation2] sm:$0xff]  }
  0xff   : > { %v1181_v35 = vpop.eup %1180 }
 0x15e   : > { %v278_v36 = vpop.permute.xlu0 %277 }
 0x15f   : > { %v280_v37 = vmul.f32 %v1181_v35, %v278_v36 }
 0x161   : > { %282 = vrot.lane.b32.xlu1 %v280_v37, %s1275_s6 }
 0x162   : > { %v273_v38 = vpop.permute.xlu0 %272 }
 0x163   : > { %v275_v39 = vmul.f32 %v1181_v35, %v273_v38  ;;  %v1171_v38 = vld [vmem:[#allocation3] sm:$0xff]  }
 0x1d3   : > { %v283_v40 = vpop.permute.xlu1 %282 }
 0x1d4   : > { %v1378_v41 = vadd.f32 %v283_v40, %v275_v39 }
 0x1d6   : > { %1182 = vtanh.f32 %v1378_v41 }
 0x1e3   : > { %v1183_v47 = vpop.eup %1182 }
 0x1e4   : > { %288 = vrot.lane.b32.xlu1 %v1183_v47, %s1274_s5 }
 0x1e8   : > { %298 = vrot.lane.b32.xlu1 %v293_v48, %s1275_s6  ;;  %v1012_v48 = vld [vmem:[%s1366_s30 + $0x2] sm:$0x1] }
 0x1e9   : > { %v657_v49 = vunpack.c.l.bf16 %v1012_v48 }
 0x256   : > { %v289_v50 = vpop.permute.xlu1 %288 }
 0x257   : > { %v291_v51 = vmul.f32 %v1181_v35, %v289_v50  ;;  %v1169_v35 = vld [vmem:[#allocation3 + $0x8] sm:$0xff]  }
 0x259   : > { %v292_v52 = vpack.c.bf16 %v291_v51, %v291_v51 }
 0x25a   : > { %v299_v53 = vpop.permute.xlu1 %298 }
 0x25b   : > { %295 = vrot.lane.b32.xlu0 %v292_v52, %s1275_s6 }
 0x2cd   : > { %v296_v54 = vpop.permute.xlu0 %295 }
 0x2ce   : > { %v302_v55 = vsel %vm213_vm2, %v296_v54, %v299_v53  ;;  %1075 = vmatmul.mubr.msk.bf16.vlgmr.msra.gmra.mxu0 %vm213_vm2, %v296_v54 }
 0x2cf   : > { %1067 = vmatmul.mubr.msk.bf16.vlgmr.msra.gmra.mxu1 %vm342_vm3, %v302_v55  ;;  %1086 = vmatprep.mubr.msk.bf16.mxu0 %vm1272_vm1, %v1271_v13 }
 0x2d0   : > { %1094 = vmatprep.mubr.msk.bf16.mxu1 %vm1272_vm1, %v1271_v13  ;;  %1079 = vmatpush3.bf16.msra.mxu0 %v1166_v31 }
 0x2d1   : > { %1091 = vmatpush3.bf16.msra.mxu1 %v1168_v32  ;;  %1080 = vmatprep.subr.bf16.mxu0 %v1271_v13 }
 0x2d2   : > { %1092 = vmatprep.subr.bf16.mxu1 %v1271_v13 }
 0x2d4   : > { %1081 = vmatpush3.bf16.msra.mxu0 %v1167_v33 }
 0x2d5   : > { %1093 = vmatpush3.bf16.msra.mxu1 %v1170_v34  ;;  %1082 = vmatprep.subr.bf16.mxu0 %v1271_v13 }
 0x2d6   : > { %1098 = vmatprep.subr.bf16.mxu1 %v1271_v13 }
 0x2d8   : > { %1083 = vmatpush3.bf16.msra.mxu0 %v1169_v35 }
 0x2d9   : > { %1084 = vmatprep.subr.bf16.mxu0 %v1271_v13 }
 0x2dc   : > { %1085 = vmatpush3.bf16.msra.mxu0 %v1171_v38 }
 0x38e   : > { %v490_v59 = vpop.f32.mrf.mxu0 }
 0x38f   : > { %v496_v60 = vadd.f32 %v490_v59, %v437_v57  ;;  %v379_v61 = vpop.f32.mrf.mxu1 }
 0x390   : > { %v380_v62 = vadd.f32 %v1400_v58, %v379_v61  ;;  %v1076_v63 = vpop.f32.mrf.mxu0 }
 0x391   : > { %1184 = vtanh.f32 %v496_v60  ;;  %v1068_v0 = vpop.f32.mrf.mxu1  ;;  %v497_v7 = vsub.f32 0.0, %v496_v60 }
 0x392   : > { %1186 = vtanh.f32 %v380_v62  ;;  %v493_v1 = vpop.f32.mrf.mxu0  ;;  %v385_v8 = vsub.f32 0.0, %v380_v62 }
 0x393   : > { %v382_v2 = vpop.f32.mrf.mxu1  ;;  %v498_v9 = vmul.f32 1.442695, %v497_v7 }
 0x394   : > { %v1077_v3 = vpop.f32.mrf.mxu0  ;;  %v386_v10 = vmul.f32 1.442695, %v385_v8 }
 0x395   : > { %v1069_v4 = vpop.f32.mrf.mxu1  ;;  %1188 = vpow2.f32 %v498_v9 }
 0x396   : > { %1190 = vpow2.f32 %v386_v10 }
 0x39e   : > { %v1185_v5 = vpop.eup %1184 }
 0x39f   : > { %v1187_v6 = vpop.eup %1186  ;;  %505 = vrot.lane.b32.xlu1 %v1185_v5, %s1274_s5 }
 0x3a0   : > { %397 = vrot.lane.b32.xlu0 %v1187_v6, %s1274_s5 }
 0x3a2   : > { %v1189_v12 = vpop.eup %1188 }
 0x3a3   : > { %v1191_v14 = vpop.eup %1190  ;;  %v500_v15 = vadd.f32 1.0, %v1189_v12 }
 0x3a4   : > { %392 = vrot.lane.b32.xlu0 %v1252_v11, %s1275_s6  ;;  %v388_v16 = vadd.f32 1.0, %v1191_v14 }
 0x3a5   : > { %1192 = vrcp.f32 %v500_v15 }
 0x3a6   : > { %1194 = vrcp.f32 %v388_v16 }
 0x3b2   : > { %v1193_v17 = vpop.eup %1192 }
 0x3b3   : > { %v1195_v19 = vpop.eup %1194  ;;  %v503_v23 = vmul.f32 %v1193_v17, %v1378_v41 }
 0x411   : > { %v506_v18 = vpop.permute.xlu1 %505 }
 0x412   : > { %v508_v20 = vmul.f32 %v1193_v17, %v506_v18  ;;  %v398_v21 = vpop.permute.xlu0 %397 }
 0x413   : > { %v400_v22 = vmul.f32 %v1195_v19, %v398_v21  ;;  %v1172_v21 = vld [vmem:[#allocation3 + $0x18] sm:$0xff]  }
 0x414   : > { %510 = vrot.lane.b32.xlu0 %v508_v20, %s1275_s6 }
 0x415   : > { %402 = vrot.lane.b32.xlu1 %v400_v22, %s1275_s6  ;;  %v1173_v22 = vld [vmem:[#allocation3 + $0x10] sm:$0xff]  }
 0x416   : > { %v393_v11 = vpop.permute.xlu0 %392 }
 0x417   : > { %v395_v24 = vmul.f32 %v1195_v19, %v393_v11 }
 0x486   : > { %v511_v25 = vpop.permute.xlu0 %510 }
 0x487   : > { %v1410_v26 = vadd.f32 %v511_v25, %v503_v23  ;;  %v403_v29 = vpop.permute.xlu1 %402  ;;  %v1174_v23 = vld [vmem:[#allocation3 + $0x8] sm:$0xff]   ;;  %v1175_v25 = vld [vmem:[#allocation3] sm:$0xff]  }
 0x488   : > { %v1412_v30 = vadd.f32 %v403_v29, %v395_v24 }
 0x489   : > { %1196 = vtanh.f32 %v1410_v26 }
 0x48a   : > { %1198 = vtanh.f32 %v1412_v30 }
 0x496   : > { %v1197_v36 = vpop.eup %1196 }
 0x497   : > { %v1199_v37 = vpop.eup %1198  ;;  %516 = vrot.lane.b32.xlu0 %v1197_v36, %s1274_s5 }
 0x498   : > { %408 = vrot.lane.b32.xlu1 %v1199_v37, %s1274_s5 }
 0x509   : > { %v517_v39 = vpop.permute.xlu0 %516 }
 0x50a   : > { %v519_v40 = vmul.f32 %v1193_v17, %v517_v39  ;;  %v409_v41 = vpop.permute.xlu1 %408 }
 0x50b   : > { %v411_v42 = vmul.f32 %v1195_v19, %v409_v41 }
 0x50c   : > { %v520_v43 = vpack.c.bf16 %v519_v40, %v519_v40 }
 0x50d   : > { %v1423_v44 = vpack.c.bf16 %v411_v42, %v411_v42 }
 0x50e   : > { %522 = vrot.lane.b32.xlu1 %v520_v43, %s1275_s6 }
 0x50f   : > { %524 = vrot.lane.b32.xlu0 %v1423_v44, %s1274_s5 }
 0x580   : > { %v523_v45 = vpop.permute.xlu1 %522 }
 0x581   : > { %1095 = vmatmul.mubr.msk.bf16.vlgmr.msra.gmra.mxu1 %vm213_vm2, %v523_v45  ;;  %v525_v46 = vpop.permute.xlu0 %524 }
 0x582   : > { %v528_v47 = vsel %vm213_vm2, %v523_v45, %v525_v46  ;;  %1106 = vmatprep.mubr.msk.bf16.mxu1 %vm1272_vm1, %v1271_v13  ;;  %1099 = vmatpush3.bf16.msra.mxu1 %v1172_v21 }
 0x583   : > { %1087 = vmatmul.mubr.msk.bf16.vlgmr.msra.gmra.mxu0 %vm342_vm3, %v528_v47  ;;  %1100 = vmatprep.subr.bf16.mxu1 %v1271_v13  ;;  %v1276_v47 = vmov 1966171168  }
 0x584   : > { %v415_v48 = vunpack.c.l.s4 %v1276_v47 }
 0x586   : > { %1101 = vmatpush3.bf16.msra.mxu1 %v1173_v22 }
 0x587   : > { %1102 = vmatprep.subr.bf16.mxu1 %v1271_v13 }
 0x58a   : > { %1103 = vmatpush3.bf16.msra.mxu1 %v1174_v23 }
 0x58b   : > { %1104 = vmatprep.subr.bf16.mxu1 %v1271_v13 }
 0x58e   : > { %1105 = vmatpush3.bf16.msra.mxu1 %v1175_v25 }
 0x641   : > { %v710_v50 = vpop.f32.mrf.mxu1 }
 0x642   : > { %v716_v51 = vadd.f32 %v710_v50, %v657_v49  ;;  %v416_v49 = vunpack.c.0.s8 %v415_v48 }
 0x643   : > { %v604_v52 = vpop.f32.mrf.mxu0  ;;  %v1096_v53 = vpop.f32.mrf.mxu1 }
 0x644   : > { %1200 = vtanh.f32 %v716_v51  ;;  %v605_v54 = vadd.f32 %v1400_v58, %v604_v52  ;;  %v717_v63 = vsub.f32 0.0, %v716_v51  ;;  %v419_v50 = vsub.s32 %v416_v49, %v1369_v27 }
 0x645   : > { %v1088_v55 = vpop.f32.mrf.mxu0  ;;  %v713_v56 = vpop.f32.mrf.mxu1 }
 0x646   : > { %1202 = vtanh.f32 %v605_v54  ;;  %v610_v0 = vsub.f32 0.0, %v605_v54  ;;  %v718_v1 = vmul.f32 1.442695, %v717_v63  ;;  %v420_v52 = vrot.slane %v1423_v44, %v419_v50 }
 0x647   : > { %v607_v57 = vpop.f32.mrf.mxu0  ;;  %v1097_v59 = vpop.f32.mrf.mxu1 }
 0x648   : > { %v611_v2 = vmul.f32 1.442695, %v610_v0  ;;  %1204 = vpow2.f32 %v718_v1  ;;  %v427_v54 = vrot.slane %v420_v52, %v419_v50 }
 0x649   : > { %v1089_v60 = vpop.f32.mrf.mxu0 }
 0x64a   : > { %1206 = vpow2.f32 %v611_v2 }
 0x651   : > { %v1201_v61 = vpop.eup %1200 }
 0x652   : > { %725 = vrot.lane.b32.xlu0 %v1201_v61, %s1274_s5 }
 0x653   : > { %v1203_v62 = vpop.eup %1202 }
 0x654   : > { %618 = vrot.lane.b32.xlu1 %v1203_v62, %s1274_s5 }
 0x655   : > { %v1205_v3 = vpop.eup %1204 }
 0x656   : > { %v720_v5 = vadd.f32 1.0, %v1205_v3 }
 0x657   : > { %v1207_v4 = vpop.eup %1206 }
 0x658   : > { %v613_v6 = vadd.f32 1.0, %v1207_v4  ;;  %1208 = vrcp.f32 %v720_v5 }
 0x65a   : > { %1210 = vrcp.f32 %v613_v6 }
 0x665   : > { %v1209_v7 = vpop.eup %1208 }
 0x666   : > { %v723_v15 = vmul.f32 %v1209_v7, %v1410_v26 }
 0x667   : > { %v1211_v10 = vpop.eup %1210 }
 0x668   : > { %v616_v18 = vmul.f32 %v1211_v10, %v1412_v30 }
 0x6c4   : > { %v726_v8 = vpop.permute.xlu0 %725 }
 0x6c5   : > { %v728_v9 = vmul.f32 %v1209_v7, %v726_v8 }
 0x6c6   : > { %v619_v12 = vpop.permute.xlu1 %618 }
 0x6c7   : > { %v621_v14 = vmul.f32 %v1211_v10, %v619_v12  ;;  %730 = vrot.lane.b32.xlu0 %v728_v9, %s1275_s6 }
 0x6c9   : > { %623 = vrot.lane.b32.xlu1 %v621_v14, %s1275_s6 }
 0x739   : > { %v731_v16 = vpop.permute.xlu0 %730 }
 0x73a   : > { %v1440_v17 = vadd.f32 %v731_v16, %v723_v15 }
 0x73b   : > { %v624_v19 = vpop.permute.xlu1 %623 }
 0x73c   : > { %1212 = vtanh.f32 %v1440_v17  ;;  %v626_v20 = vadd.f32 %v624_v19, %v616_v18  ;;  %v896_v62 = vrot.slane %v1440_v17, %v1372_v28 }
 0x73e   : > { %1214 = vtanh.f32 %v626_v20 }
 0x749   : > { %v1213_v11 = vpop.eup %1212 }
 0x74a   : > { %736 = vrot.lane.b32.xlu0 %v1213_v11, %s1274_s5 }
 0x74b   : > { %v1215_v24 = vpop.eup %1214 }
 0x74c   : > { %629 = vrot.lane.b32.xlu1 %v1215_v24, %s1274_s5 }
 0x7bc   : > { %v737_v26 = vpop.permute.xlu0 %736 }
 0x7bd   : > { %v739_v29 = vmul.f32 %v1209_v7, %v737_v26 }
 0x7be   : > { %v630_v30 = vpop.permute.xlu1 %629 }
 0x7bf   : > { %v740_v31 = vpack.c.bf16 %v739_v29, %v739_v29  ;;  %v632_v32 = vmul.f32 %v1211_v10, %v630_v30  ;;  %v881_v61 = vrot.slane %v739_v29, %v1372_v28 }
 0x7c1   : > { %v633_v33 = vpack.c.bf16 %v632_v32, %v632_v32  ;;  %742 = vrot.lane.b32.xlu1 %v740_v31, %s1275_s6 }
 0x7c3   : > { %744 = vrot.lane.b32.xlu0 %v633_v33, %s1274_s5  ;;  %v641_v44 = vrot.slane %v633_v33, %v419_v50 }
 0x7c5   : > { %v648_v60 = vrot.slane %v641_v44, %v419_v50 }
 0x833   : > { %v743_v34 = vpop.permute.xlu1 %742 }
 0x835   : > { %v745_v35 = vpop.permute.xlu0 %744 }
 0x836   : > { %v748_v36 = vsel %vm213_vm2, %v743_v34, %v745_v35 }
 0x837   : > { %1107 = vmatmul.mubr.msk.bf16.vlgmr.msra.gmra.mxu1 %vm342_vm3, %v748_v36 }
 0x8f7   : > { %v824_v37 = vpop.f32.mrf.mxu1 }
 0x8f8   : > { %v825_v13 = vadd.f32 %v1400_v58, %v824_v37 }
 0x8f9   : > { %v1108_v38 = vpop.f32.mrf.mxu1 }
 0x8fa   : > { %1216 = vtanh.f32 %v825_v13  ;;  %v830_v42 = vsub.f32 0.0, %v825_v13 }
 0x8fb   : > { %v827_v39 = vpop.f32.mrf.mxu1 }
 0x8fc   : > { %v831_v43 = vmul.f32 1.442695, %v830_v42 }
 0x8fd   : > { %v1109_v40 = vpop.f32.mrf.mxu1 }
 0x8fe   : > { %1218 = vpow2.f32 %v831_v43 }
 0x907   : > { %v1217_v41 = vpop.eup %1216 }
 0x908   : > { %838 = vrot.lane.b32.xlu1 %v1217_v41, %s1274_s5 }
 0x90b   : > { %v1219_v45 = vpop.eup %1218 }
 0x90c   : > { %v833_v46 = vadd.f32 1.0, %v1219_v45 }
 0x90e   : > { %1220 = vrcp.f32 %v833_v46 }
 0x91b   : > { %v1221_v58 = vpop.eup %1220 }
 0x91c   : > { %v836_v55 = vmul.f32 %v1221_v58, %v626_v20 }
 0x97a   : > { %v839_v51 = vpop.permute.xlu1 %838 }
 0x97b   : > { %v841_v53 = vmul.f32 %v1221_v58, %v839_v51 }
 0x97d   : > { %843 = vrot.lane.b32.xlu0 %v841_v53, %s1275_s6 }
 0x981   : > { %428 = vrot.lane.b32.xlu0 %v427_v54, %s1275_s6 }
 0x9ef   : > { %v844_v56 = vpop.permute.xlu0 %843 }
 0x9f0   : > { %v846_v57 = vadd.f32 %v844_v56, %v836_v55 }
 0x9f2   : > { %1222 = vtanh.f32 %v846_v57 }
 0x9f3   : > { %v429_v27 = vpop.permute.xlu0 %428 }
 0x9f4   : > { %433 = vst.msk [vmem:[%s431_s9] sm:$0x1] %vm432_vm4, %v429_v27 }
 0x9ff   : > { %v1223_v59 = vpop.eup %1222 }
 0xa00   : > { %849 = vrot.lane.b32.xlu1 %v1223_v59, %s1274_s5 }
 0xa04   : > { %649 = vrot.lane.b32.xlu1 %v648_v60, %s1275_s6 }
 0xa08   : > { %882 = vrot.lane.b32.xlu1 %v881_v61, %s1275_s6 }
 0xa0c   : > { %897 = vrot.lane.b32.xlu1 %v896_v62, %s1277_s10 }
 0xa72   : > { %v850_v63 = vpop.permute.xlu1 %849 }
 0xa73   : > { %v852_v0 = vmul.f32 %v1221_v58, %v850_v63 }
 0xa75   : > { %v853_v1 = vpack.c.bf16 %v852_v0, %v852_v0  ;;  %886 = vrot.lane.b32.xlu0 %v852_v0, %s1275_s6 }
 0xa76   : > { %v650_v2 = vpop.permute.xlu1 %649 }
 0xa77   : > { %v861_v3 = vrot.slane %v853_v1, %v419_v50  ;;  %1011 = vst.msk [vmem:[%s431_s9 + $0x1] sm:$0x1] %vm432_vm4, %v650_v2 }
 0xa79   : > { %v868_v4 = vrot.slane %v861_v3, %v419_v50 }
 0xa7a   : > { %v883_v5 = vpop.permute.xlu1 %882  }
 0xa7b   : > { %869 = vrot.lane.b32.xlu0 %v868_v4, %s1275_s6  ;;  %905 = vst.msk [vmem:[#allocation6] sm:$0x3] (%p184_p0), %vm158_vm0, %v883_v5 }
 0xa7e   : > { %v898_v6 = vpop.permute.xlu1 %897  }
 0xa7f   : > { %901 = vrot.lane.b32.xlu0 %v846_v57, %s1277_s10  ;;  %v1496_v10 = vmov %v898_v6  ;;  %906 = vst.msk [vmem:[#allocation7] sm:$0x3] (%p184_p0), %vm158_vm0, %v898_v6 }
 0xae7   : > { %v887_v7 = vpop.permute.xlu0 %886  }
 0xae8   : > { %v1497_v9 = vmov %v887_v7  ;;  %907 = vst.msk [vmem:[#allocation6 + $0x2] sm:$0x3] (%p184_p0), %vm158_vm0, %v887_v7 }
 0xaed   : > { %v870_v8 = vpop.permute.xlu0 %869 }
 0xaee   : > { %1022 = vst.msk [vmem:[%s431_s9 + $0x2] sm:$0x1] %vm432_vm4, %v870_v8  ;;  %v1498_v8 = vmov %v883_v5  ;;  %186 = sbr.rel (!%p184_p0) target bundleno = 18 (0x12), region = 171 }
 0xaf1   : > { %v902_v28 = vpop.permute.xlu0 %901  }
 0xaf2   : > { %v1495_v11 = vmov %v902_v28  ;;  %908 = vst.msk [vmem:[#allocation7 + $0x2] sm:$0x3] (%p184_p0), %vm158_vm0, %v902_v28 }
 0xaf3   :  { %913 = vsyncmov [#allocation5] }
 0xaf6   :  { %s914_s11 = vpop.sfrf %913 }
 0xaf7   :  { %p1023_p1 = scmp.ne.s32.totalorder %s914_s11, 0 }
 0xaf9   :  { %918 = shalt.err (%p1023_p1)  }
 0xafa   :  { %920 = vsyncmov [#allocation5 + $0x1] }
 0xafd   :  { %s921_s12 = vpop.sfrf %920 }
 0xafe   :  { %p1024_p2 = scmp.ne.s32.totalorder %s921_s12, 0 }
 0xb00   :  { %925 = shalt.err (%p1024_p2)  }
 0xb01   :  { %927 = vsyncmov [#allocation5 + $0x2] }
 0xb04   :  { %s928_s13 = vpop.sfrf %927 }
 0xb05   :  { %p1025_p3 = scmp.ne.s32.totalorder %s928_s13, 0 }
 0xb07   :  { %932 = shalt.err (%p1025_p3)  }

// kernel: cnn_to_rnn_forward.4
= control target key start
LH: loop header
LB: loop body
LE: loop exit
PB: predicated region body
PF: predicated region fallthrough
CT: control target
= control target key end

     0   :  { %s5738_s9 = smov 3   ;;  %s5739_s18 = smov 6   ;;  %vm2647_vm0 = vcmask 23552   ;;  %vm2712_vm1 = vcmask 48128   ;;  %vm3318_vm2 = vcmask 1044480   ;;  %vm3319_vm3 = vcmask 1045504   ;;  %s8937_s0 = inlined_call_operand.vmem [shape: f32[2,18,18,3], index: 0, kind: input, shape index: {}]   ;;  %s8938_s1 = inlined_call_operand.vmem [shape: bf16[27,16], index: 1, kind: input, shape index: {}]   ;;  %s8939_s2 = inlined_call_operand.vmem [shape: f32[1,16], index: 2, kind: input, shape index: {}]   ;;  %s8940_s3 = inlined_call_operand.vmem [shape: bf16[16,32], index: 3, kind: input, shape index: {}]   ;;  %s8941_s4 = inlined_call_operand.vmem [shape: f32[1,32], index: 4, kind: input, shape index: {}]   ;;  %s8942_s5 = inlined_call_operand.vmem [shape: f32[2,32], index: 5, kind: output, shape index: {}]  }
   0x1   :  { %v89_v0 = vld [vmem:[%s8937_s0 + $0x31] sm:$0xff]  ;;  %v90_v1 = vld [vmem:[%s8937_s0 + $0x39] sm:$0xff]  ;;  %v85_v2 = vld [vmem:[%s8937_s0 + $0x1] sm:$0xff]  ;;  %s5741_s8 = smov 12   ;;  %s5743_s12 = smov 15   ;;  %vm2777_vm4 = vcmask 72704  }
   0x2   :  { %v4450_v3 = vpack.i.bf16 %v90_v1, %v89_v0  ;;  %v86_v4 = vld [vmem:[%s8937_s0 + $0x9] sm:$0xff]  ;;  %v92_v6 = vld [vmem:[%s8937_s0 + $0x51] sm:$0xff]  ;;  %v87_v8 = vld [vmem:[%s8937_s0 + $0x19] sm:$0xff]  ;;  %s5744_s19 = smov 18   ;;  %s5746_s20 = smov 24   ;;  %vm2842_vm5 = vcmask 97280  }
   0x3   :  { %v91_v5 = vld [vmem:[%s8937_s0 + $0x49] sm:$0xff]  ;;  %v4440_v7 = vpack.i.bf16 %v86_v4, %v85_v2  ;;  %v88_v9 = vld [vmem:[%s8937_s0 + $0x21] sm:$0xff]  ;;  %v95_v12 = vld [vmem:[%s8937_s0 + $0x79] sm:$0xff]  ;;  %vm2907_vm6 = vcmask 121856   ;;  %vm2972_vm7 = vcmask 146432   ;;  %vm3037_vm8 = vcmask 171008  }
   0x4   :  { %4451 = vrot.lane.b32.xlu1 %v4450_v3, %s5738_s9  ;;  %v4455_v10 = vpack.i.bf16 %v92_v6, %v91_v5  ;;  %v4445_v11 = vpack.i.bf16 %v88_v9, %v87_v8  ;;  %v96_v13 = vld [vmem:[%s8937_s0 + $0x81] sm:$0xff]  ;;  %v94_v15 = vld [vmem:[%s8937_s0 + $0x69] sm:$0xff]  ;;  %v100_v19 = vld [vmem:[%s8937_s0 + $0xb1] sm:$0xff]  ;;  %vm3102_vm9 = vcmask 195584   ;;  %vm3221_vm10 = vcmask 220160  }
   0x5   :  { %4441 = vrot.lane.b32.xlu0 %v4440_v7, %s5738_s9  ;;  %v93_v14 = vld [vmem:[%s8937_s0 + $0x61] sm:$0xff]  ;;  %v4465_v16 = vpack.i.bf16 %v96_v13, %v95_v12  ;;  %v99_v18 = vld [vmem:[%s8937_s0 + $0xa9] sm:$0xff]  ;;  %v97_v20 = vld [vmem:[%s8937_s0 + $0x91] sm:$0xff]  ;;  %vm3678_vm11 = vcmask 130048   ;;  %vm5748_vm12 = vmmov 0   ;;  %vm3835_vm13 = vcmask 1041409  }
   0x6   :  { %v4460_v17 = vpack.i.bf16 %v94_v15, %v93_v14  ;;  %v98_v21 = vld [vmem:[%s8937_s0 + $0x99] sm:$0xff]  ;;  %v4475_v22 = vpack.i.bf16 %v100_v19, %v99_v18  ;;  %v104_v25 = vld [vmem:[%s8937_s0 + $0xe1] sm:$0xff]  ;;  %v102_v27 = vld [vmem:[%s8937_s0 + $0xc9] sm:$0xff]  ;;  %vm3887_vm14 = vcmask 254976  }
   0x7   :  { %v4470_v23 = vpack.i.bf16 %v98_v21, %v97_v20  ;;  %v103_v24 = vld [vmem:[%s8937_s0 + $0xd9] sm:$0xff]  ;;  %v101_v26 = vld [vmem:[%s8937_s0 + $0xc1] sm:$0xff]  ;;  %v107_v30 = vld [vmem:[%s8937_s0 + $0x109] sm:$0xff] }
   0x8   :  { %4456 = vrot.lane.b32.xlu1 %v4455_v10, %s5738_s9  ;;  %v4485_v28 = vpack.i.bf16 %v104_v25, %v103_v24  ;;  %v4480_v29 = vpack.i.bf16 %v102_v27, %v101_v26  ;;  %v108_v31 = vld [vmem:[%s8937_s0 + $0x111] sm:$0xff]  ;;  %v106_v33 = vld [vmem:[%s8937_s0 + $0xf9] sm:$0xff]  ;;  %v112_v37 = vld [vmem:[%s8937_s0 + $0x141] sm:$0xff] }
   0x9   :  { %4446 = vrot.lane.b32.xlu0 %v4445_v11, %s5738_s9  ;;  %v105_v32 = vld [vmem:[%s8937_s0 + $0xf1] sm:$0xff]  ;;  %v4495_v34 = vpack.i.bf16 %v108_v31, %v107_v30  ;;  %v111_v36 = vld [vmem:[%s8937_s0 + $0x139] sm:$0xff]  ;;  %v109_v38 = vld [vmem:[%s8937_s0 + $0x121] sm:$0xff] }
   0xa   :  { %v4490_v35 = vpack.i.bf16 %v106_v33, %v105_v32  ;;  %v110_v39 = vld [vmem:[%s8937_s0 + $0x129] sm:$0xff]  ;;  %v4505_v40 = vpack.i.bf16 %v112_v37, %v111_v36  ;;  %v116_v43 = vld [vmem:[%s8937_s0 + $0x171] sm:$0xff]  ;;  %v114_v45 = vld [vmem:[%s8937_s0 + $0x159] sm:$0xff] }
   0xb   :  { %v4500_v41 = vpack.i.bf16 %v110_v39, %v109_v38  ;;  %v115_v42 = vld [vmem:[%s8937_s0 + $0x169] sm:$0xff]  ;;  %v113_v44 = vld [vmem:[%s8937_s0 + $0x151] sm:$0xff]  ;;  %v118_v51 = vld [vmem:[%s8937_s0 + $0x1b9] sm:$0xff] }
   0xc   :  { %4466 = vrot.lane.b32.xlu1 %v4465_v16, %s5738_s9  ;;  %v4515_v46 = vpack.i.bf16 %v116_v43, %v115_v42  ;;  %v4510_v47 = vpack.i.bf16 %v114_v45, %v113_v44  ;;  %v119_v48 = vld [vmem:[%s8937_s0 + $0x1c9] sm:$0xff]  ;;  %v120_v49 = vld [vmem:[%s8937_s0 + $0x1d1] sm:$0xff]  ;;  %v123_v54 = vld [vmem:[%s8937_s0 + $0x1f9] sm:$0xff] }
   0xd   :  { %4461 = vrot.lane.b32.xlu0 %v4460_v17, %s5738_s9  ;;  %v117_v50 = vld [vmem:[%s8937_s0 + $0x1b1] sm:$0xff]  ;;  %v4525_v52 = vpack.i.bf16 %v120_v49, %v119_v48  ;;  %v124_v55 = vld [vmem:[%s8937_s0 + $0x201] sm:$0xff]  ;;  %v122_v57 = vld [vmem:[%s8937_s0 + $0x1e9] sm:$0xff] }
   0xe   :  { %v4520_v53 = vpack.i.bf16 %v118_v51, %v117_v50  ;;  %v121_v56 = vld [vmem:[%s8937_s0 + $0x1e1] sm:$0xff]  ;;  %v4535_v58 = vpack.i.bf16 %v124_v55, %v123_v54  ;;  %v127_v60 = vld [vmem:[%s8937_s0 + $0x229] sm:$0xff]  ;;  %v128_v61 = vld [vmem:[%s8937_s0 + $0x231] sm:$0xff] }
   0xf   :  { %v4530_v59 = vpack.i.bf16 %v122_v57, %v121_v56  ;;  %v125_v62 = vld [vmem:[%s8937_s0 + $0x211] sm:$0xff]  ;;  %v126_v63 = vld [vmem:[%s8937_s0 + $0x219] sm:$0xff]  ;;  %v4545_v0 = vpack.i.bf16 %v128_v61, %v127_v60  ;;  %v132_v3 = vld [vmem:[%s8937_s0 + $0x261] sm:$0xff] }
  0x10   :  { %4476 = vrot.lane.b32.xlu1 %v4475_v22, %s5738_s9  ;;  %v4540_v1 = vpack.i.bf16 %v126_v63, %v125_v62  ;;  %v131_v2 = vld [vmem:[%s8937_s0 + $0x259] sm:$0xff]  ;;  %v129_v4 = vld [vmem:[%s8937_s0 + $0x241] sm:$0xff]  ;;  %v130_v5 = vld [vmem:[%s8937_s0 + $0x249] sm:$0xff] }
  0x11   :  { %4471 = vrot.lane.b32.xlu0 %v4470_v23, %s5738_s9  ;;  %v4555_v6 = vpack.i.bf16 %v132_v3, %v131_v2  ;;  %v4550_v7 = vpack.i.bf16 %v130_v5, %v129_v4  ;;  %v135_v8 = vld [vmem:[%s8937_s0 + $0x289] sm:$0xff]  ;;  %v136_v9 = vld [vmem:[%s8937_s0 + $0x291] sm:$0xff]  ;;  %v134_v11 = vld [vmem:[%s8937_s0 + $0x279] sm:$0xff] }
  0x12   :  { %v133_v10 = vld [vmem:[%s8937_s0 + $0x271] sm:$0xff]  ;;  %v4565_v12 = vpack.i.bf16 %v136_v9, %v135_v8  ;;  %v139_v14 = vld [vmem:[%s8937_s0 + $0x2b9] sm:$0xff]  ;;  %v140_v15 = vld [vmem:[%s8937_s0 + $0x2c1] sm:$0xff] }
  0x13   :  { %v4560_v13 = vpack.i.bf16 %v134_v11, %v133_v10  ;;  %v137_v16 = vld [vmem:[%s8937_s0 + $0x2a1] sm:$0xff]  ;;  %v138_v17 = vld [vmem:[%s8937_s0 + $0x2a9] sm:$0xff]  ;;  %v4575_v18 = vpack.i.bf16 %v140_v15, %v139_v14  ;;  %v144_v21 = vld [vmem:[%s8937_s0 + $0x2f1] sm:$0xff] }
  0x14   :  { %4486 = vrot.lane.b32.xlu1 %v4485_v28, %s5738_s9  ;;  %v4570_v19 = vpack.i.bf16 %v138_v17, %v137_v16  ;;  %v143_v20 = vld [vmem:[%s8937_s0 + $0x2e9] sm:$0xff]  ;;  %v141_v22 = vld [vmem:[%s8937_s0 + $0x2d1] sm:$0xff]  ;;  %v142_v23 = vld [vmem:[%s8937_s0 + $0x2d9] sm:$0xff] }
  0x15   :  { %4481 = vrot.lane.b32.xlu0 %v4480_v29, %s5738_s9  ;;  %v4585_v24 = vpack.i.bf16 %v144_v21, %v143_v20  ;;  %v4580_v25 = vpack.i.bf16 %v142_v23, %v141_v22  ;;  %v147_v26 = vld [vmem:[%s8937_s0 + $0x319] sm:$0xff]  ;;  %v148_v27 = vld [vmem:[%s8937_s0 + $0x321] sm:$0xff]  ;;  %v146_v29 = vld [vmem:[%s8937_s0 + $0x309] sm:$0xff] }
  0x16   :  { %v145_v28 = vld [vmem:[%s8937_s0 + $0x301] sm:$0xff]  ;;  %v4595_v30 = vpack.i.bf16 %v148_v27, %v147_v26  ;;  %v155_v38 = vld [vmem:[%s8937_s0 + $0x4a] sm:$0xff]  ;;  %v156_v39 = vld [vmem:[%s8937_s0 + $0x52] sm:$0xff] }
  0x17   :  { %v4590_v31 = vpack.i.bf16 %v146_v29, %v145_v28  ;;  %v151_v32 = vld [vmem:[%s8937_s0 + $0x1a] sm:$0xff]  ;;  %v152_v33 = vld [vmem:[%s8937_s0 + $0x22] sm:$0xff]  ;;  %v4615_v42 = vpack.i.bf16 %v156_v39, %v155_v38  ;;  %v163_v50 = vld [vmem:[%s8937_s0 + $0xaa] sm:$0xff] }
  0x18   :  { %4496 = vrot.lane.b32.xlu1 %v4495_v34, %s5738_s9  ;;  %v149_v34 = vld [vmem:[%s8937_s0 + $0x2] sm:$0xff]  ;;  %v4605_v36 = vpack.i.bf16 %v152_v33, %v151_v32  ;;  %v159_v44 = vld [vmem:[%s8937_s0 + $0x7a] sm:$0xff]  ;;  %v164_v51 = vld [vmem:[%s8937_s0 + $0xb2] sm:$0xff] }
  0x19   :  { %4491 = vrot.lane.b32.xlu0 %v4490_v35, %s5738_s9  ;;  %v150_v35 = vld [vmem:[%s8937_s0 + $0xa] sm:$0xff]  ;;  %v160_v45 = vld [vmem:[%s8937_s0 + $0x82] sm:$0xff]  ;;  %v4635_v54 = vpack.i.bf16 %v164_v51, %v163_v50  ;;  %v167_v56 = vld [vmem:[%s8937_s0 + $0xda] sm:$0xff] }
  0x1a   :  { %v4600_v37 = vpack.i.bf16 %v150_v35, %v149_v34  ;;  %v4625_v48 = vpack.i.bf16 %v160_v45, %v159_v44  ;;  %v168_v57 = vld [vmem:[%s8937_s0 + $0xe2] sm:$0xff]  ;;  %v171_v62 = vld [vmem:[%s8937_s0 + $0x10a] sm:$0xff]  ;;  %v172_v63 = vld [vmem:[%s8937_s0 + $0x112] sm:$0xff] }
  0x1b   :  { %v4645_v60 = vpack.i.bf16 %v168_v57, %v167_v56  ;;  %v4655_v2 = vpack.i.bf16 %v172_v63, %v171_v62  ;;  %v175_v4 = vld [vmem:[%s8937_s0 + $0x13a] sm:$0xff]  ;;  %v176_v5 = vld [vmem:[%s8937_s0 + $0x142] sm:$0xff]  ;;  %v179_v10 = vld [vmem:[%s8937_s0 + $0x16a] sm:$0xff] }
  0x1c   :  { %4506 = vrot.lane.b32.xlu1 %v4505_v40, %s5738_s9  ;;  %v153_v40 = vld [vmem:[%s8937_s0 + $0x32] sm:$0xff]  ;;  %v4665_v8 = vpack.i.bf16 %v176_v5, %v175_v4  ;;  %v183_v16 = vld [vmem:[%s8937_s0 + $0x1ca] sm:$0xff]  ;;  %v187_v22 = vld [vmem:[%s8937_s0 + $0x1fa] sm:$0xff] }
  0x1d   :  { %4501 = vrot.lane.b32.xlu0 %v4500_v41, %s5738_s9  ;;  %v154_v41 = vld [vmem:[%s8937_s0 + $0x3a] sm:$0xff]  ;;  %v180_v11 = vld [vmem:[%s8937_s0 + $0x172] sm:$0xff]  ;;  %v188_v23 = vld [vmem:[%s8937_s0 + $0x202] sm:$0xff] }
  0x1e   :  { %v4610_v43 = vpack.i.bf16 %v154_v41, %v153_v40  ;;  %v4675_v14 = vpack.i.bf16 %v180_v11, %v179_v10  ;;  %v184_v17 = vld [vmem:[%s8937_s0 + $0x1d2] sm:$0xff]  ;;  %v4695_v26 = vpack.i.bf16 %v188_v23, %v187_v22  ;;  %v191_v28 = vld [vmem:[%s8937_s0 + $0x22a] sm:$0xff]  ;;  %v195_v34 = vld [vmem:[%s8937_s0 + $0x25a] sm:$0xff] }
  0x1f   :  { %v4685_v20 = vpack.i.bf16 %v184_v17, %v183_v16  ;;  %v192_v29 = vld [vmem:[%s8937_s0 + $0x232] sm:$0xff]  ;;  %v196_v35 = vld [vmem:[%s8937_s0 + $0x262] sm:$0xff]  ;;  %v199_v40 = vld [vmem:[%s8937_s0 + $0x28a] sm:$0xff] }
  0x20   :  { %4516 = vrot.lane.b32.xlu1 %v4515_v46, %s5738_s9  ;;  %v157_v46 = vld [vmem:[%s8937_s0 + $0x62] sm:$0xff]  ;;  %v4705_v32 = vpack.i.bf16 %v192_v29, %v191_v28  ;;  %v4715_v38 = vpack.i.bf16 %v196_v35, %v195_v34  ;;  %v200_v41 = vld [vmem:[%s8937_s0 + $0x292] sm:$0xff]  ;;  %v206_v56 = vld [vmem:[%s8937_s0 + $0x2da] sm:$0xff] }
  0x21   :  { %4511 = vrot.lane.b32.xlu0 %v4510_v47, %s5738_s9  ;;  %v158_v47 = vld [vmem:[%s8937_s0 + $0x6a] sm:$0xff]  ;;  %v4725_v44 = vpack.i.bf16 %v200_v41, %v199_v40  ;;  %v209_v63 = vld [vmem:[%s8937_s0 + $0x302] sm:$0xff]  ;;  %v34_v22 = vld [vmem:[%s8937_s0 + $0x98] sm:$0xff] }
  0x22   :  { %v4620_v49 = vpack.i.bf16 %v158_v47, %v157_v46  ;;  %v203_v46 = vld [vmem:[%s8937_s0 + $0x2ba] sm:$0xff]  ;;  %v204_v47 = vld [vmem:[%s8937_s0 + $0x2c2] sm:$0xff]  ;;  %v25_v5 = vld [vmem:[%s8937_s0 + $0x30] sm:$0xff] }
  0x23   :  { %v4735_v50 = vpack.i.bf16 %v204_v47, %v203_v46  ;;  %v27_v16 = vld [vmem:[%s8937_s0 + $0x48] sm:$0xff]  ;;  %v28_v17 = vld [vmem:[%s8937_s0 + $0x50] sm:$0xff]  ;;  %v6298_v29 = vld [vmem:[%s8937_s0 + $0xc0] sm:$0xff] }
  0x24   :  { %4526 = vrot.lane.b32.xlu1 %v4525_v52, %s5738_s9  ;;  %v161_v52 = vld [vmem:[%s8937_s0 + $0x92] sm:$0xff]  ;;  %v6339_v41 = vld [vmem:[%s8937_s0 + $0xe0] sm:$0xff]  ;;  %v6357_v46 = vld [vmem:[%s8937_s0 + $0x128] sm:$0xff] }
  0x25   :  { %4521 = vrot.lane.b32.xlu0 %v4520_v53, %s5738_s9  ;;  %v162_v53 = vld [vmem:[%s8937_s0 + $0x9a] sm:$0xff] }
  0x26   :  { %v4630_v55 = vpack.i.bf16 %v162_v53, %v161_v52  ;;  %v207_v52 = vld [vmem:[%s8937_s0 + $0x2ea] sm:$0xff]  ;;  %v208_v53 = vld [vmem:[%s8937_s0 + $0x2f2] sm:$0xff] }
  0x27   :  { %v6334_v40 = vld [vmem:[%s8937_s0 + $0xd8] sm:$0xff] }
  0x28   :  { %4536 = vrot.lane.b32.xlu1 %v4535_v58, %s5738_s9  ;;  %v165_v58 = vld [vmem:[%s8937_s0 + $0xc2] sm:$0xff] }
  0x29   :  { %4531 = vrot.lane.b32.xlu0 %v4530_v59, %s5738_s9  ;;  %v166_v59 = vld [vmem:[%s8937_s0 + $0xca] sm:$0xff] }
  0x2a   :  { %v4640_v61 = vpack.i.bf16 %v166_v59, %v165_v58  ;;  %v4745_v58 = vpack.i.bf16 %v208_v53, %v207_v52  ;;  %v6382_v53 = vld [vmem:[%s8937_s0 + $0x150] sm:$0xff] }
  0x2c   :  { %4546 = vrot.lane.b32.xlu1 %v4545_v0, %s5738_s9  ;;  %v169_v0 = vld [vmem:[%s8937_s0 + $0xf2] sm:$0xff] }
  0x2d   :  { %4541 = vrot.lane.b32.xlu0 %v4540_v1, %s5738_s9  ;;  %v170_v1 = vld [vmem:[%s8937_s0 + $0xfa] sm:$0xff] }
  0x2e   :  { %v4650_v3 = vpack.i.bf16 %v170_v1, %v169_v0  ;;  %v210_v0 = vld [vmem:[%s8937_s0 + $0x30a] sm:$0xff] }
  0x30   :  { %4556 = vrot.lane.b32.xlu1 %v4555_v6, %s5738_s9  ;;  %v173_v6 = vld [vmem:[%s8937_s0 + $0x122] sm:$0xff] }
  0x31   :  { %4551 = vrot.lane.b32.xlu0 %v4550_v7, %s5738_s9  ;;  %v174_v7 = vld [vmem:[%s8937_s0 + $0x12a] sm:$0xff] }
  0x32   :  { %v4660_v9 = vpack.i.bf16 %v174_v7, %v173_v6  ;;  %v26_v6 = vld [vmem:[%s8937_s0 + $0x38] sm:$0xff] }
  0x33   :  { %v6250_v10 = vpack.i.bf16 %v26_v6, %v25_v5  ;;  %v6420_v5 = vld [vmem:[%s8937_s0 + $0x168] sm:$0xff]  ;;  %v6425_v6 = vld [vmem:[%s8937_s0 + $0x170] sm:$0xff] }
  0x34   :  { %4566 = vrot.lane.b32.xlu1 %v4565_v12, %s5738_s9  ;;  %v177_v12 = vld [vmem:[%s8937_s0 + $0x152] sm:$0xff] }
  0x35   :  { %4561 = vrot.lane.b32.xlu0 %v4560_v13, %s5738_s9  ;;  %v178_v13 = vld [vmem:[%s8937_s0 + $0x15a] sm:$0xff] }
  0x36   :  { %v4670_v15 = vpack.i.bf16 %v178_v13, %v177_v12  ;;  %v29_v13 = vld [vmem:[%s8937_s0 + $0x60] sm:$0xff] }
  0x38   :  { %4576 = vrot.lane.b32.xlu1 %v4575_v18, %s5738_s9  ;;  %v181_v18 = vld [vmem:[%s8937_s0 + $0x1b2] sm:$0xff] }
  0x39   :  { %4571 = vrot.lane.b32.xlu0 %v4570_v19, %s5738_s9  ;;  %v182_v19 = vld [vmem:[%s8937_s0 + $0x1ba] sm:$0xff] }
  0x3a   :  { %v4680_v21 = vpack.i.bf16 %v182_v19, %v181_v18  ;;  %v6272_v19 = vpack.i.bf16 %v28_v17, %v27_v16  ;;  %v6448_v17 = vld [vmem:[%s8937_s0 + $0x1c8] sm:$0xff] }
  0x3c   :  { %4586 = vrot.lane.b32.xlu1 %v4585_v24, %s5738_s9  ;;  %v185_v24 = vld [vmem:[%s8937_s0 + $0x1e2] sm:$0xff]  ;;  %9011 = vst [vmem:[#allocation10_spill] sm:$0xff] %v6272_v19 }
  0x3d   :  { %4581 = vrot.lane.b32.xlu0 %v4580_v25, %s5738_s9  ;;  %v186_v25 = vld [vmem:[%s8937_s0 + $0x1ea] sm:$0xff] }
  0x3e   :  { %v4690_v27 = vpack.i.bf16 %v186_v25, %v185_v24  ;;  %v31_v24 = vld [vmem:[%s8937_s0 + $0x78] sm:$0xff]  ;;  %v32_v25 = vld [vmem:[%s8937_s0 + $0x80] sm:$0xff] }
  0x40   :  { %4596 = vrot.lane.b32.xlu1 %v4595_v30, %s5738_s9  ;;  %v189_v30 = vld [vmem:[%s8937_s0 + $0x212] sm:$0xff] }
  0x41   :  { %4591 = vrot.lane.b32.xlu0 %v4590_v31, %s5738_s9  ;;  %v190_v31 = vld [vmem:[%s8937_s0 + $0x21a] sm:$0xff] }
  0x42   :  { %v4700_v33 = vpack.i.bf16 %v190_v31, %v189_v30  ;;  %v6303_v30 = vld [vmem:[%s8937_s0 + $0xc8] sm:$0xff] }
  0x43   :  { %v4795_v34 = vpack.i.bf16 %v6303_v30, %v6298_v29 }
  0x44   :  { %4606 = vrot.lane.b32.xlu1 %v4605_v36, %s5739_s18  ;;  %v193_v36 = vld [vmem:[%s8937_s0 + $0x242] sm:$0xff] }
  0x45   :  { %4601 = vrot.lane.b32.xlu0 %v4600_v37, %s5739_s18  ;;  %v194_v37 = vld [vmem:[%s8937_s0 + $0x24a] sm:$0xff] }
  0x46   :  { %v4710_v39 = vpack.i.bf16 %v194_v37, %v193_v36  ;;  %v6322_v37 = vld [vmem:[%s8937_s0 + $0xf0] sm:$0xff] }
  0x48   :  { %4616 = vrot.lane.b32.xlu1 %v4615_v42, %s5739_s18  ;;  %v197_v42 = vld [vmem:[%s8937_s0 + $0x272] sm:$0xff] }
  0x49   :  { %4611 = vrot.lane.b32.xlu0 %v4610_v43, %s5739_s18  ;;  %v198_v43 = vld [vmem:[%s8937_s0 + $0x27a] sm:$0xff] }
  0x4a   :  { %v4720_v45 = vpack.i.bf16 %v198_v43, %v197_v42  ;;  %v4800_v43 = vpack.i.bf16 %v6339_v41, %v6334_v40 }
  0x4c   :  { %4626 = vrot.lane.b32.xlu1 %v4625_v48, %s5739_s18  ;;  %v201_v48 = vld [vmem:[%s8937_s0 + $0x2a2] sm:$0xff] }
  0x4d   :  { %4621 = vrot.lane.b32.xlu0 %v4620_v49, %s5739_s18  ;;  %v202_v49 = vld [vmem:[%s8937_s0 + $0x2aa] sm:$0xff] }
  0x4e   :  { %v4730_v51 = vpack.i.bf16 %v202_v49, %v201_v48  ;;  %v6364_v48 = vld [vmem:[%s8937_s0 + $0x108] sm:$0xff]  ;;  %v6369_v49 = vld [vmem:[%s8937_s0 + $0x110] sm:$0xff] }
  0x50   :  { %4636 = vrot.lane.b32.xlu1 %v4635_v54, %s5739_s18 }
  0x51   :  { %4631 = vrot.lane.b32.xlu0 %v4630_v55, %s5739_s18  ;;  %v205_v55 = vld [vmem:[%s8937_s0 + $0x2d2] sm:$0xff] }
  0x52   :  { %v4740_v59 = vpack.i.bf16 %v206_v56, %v205_v55  ;;  %v6387_v55 = vld [vmem:[%s8937_s0 + $0x158] sm:$0xff] }
  0x54   :  { %4646 = vrot.lane.b32.xlu1 %v4645_v60, %s5739_s18  ;;  %v211_v60 = vld [vmem:[%s8937_s0 + $0x31a] sm:$0xff] }
  0x55   :  { %4641 = vrot.lane.b32.xlu0 %v4640_v61, %s5739_s18  ;;  %v212_v61 = vld [vmem:[%s8937_s0 + $0x322] sm:$0xff] }
  0x58   :  { %4656 = vrot.lane.b32.xlu1 %v4655_v2, %s5739_s18  ;;  %v4755_v2 = vpack.i.bf16 %v212_v61, %v211_v60  ;;  %v4825_v60 = vpack.i.bf16 %v6387_v55, %v6382_v53 }
  0x59   :  { %4651 = vrot.lane.b32.xlu0 %v4650_v3, %s5739_s18  ;;  %v4750_v3 = vpack.i.bf16 %v210_v0, %v209_v63  ;;  %v3923_v63 = vld [vmem:[%s8937_s0 + $0x180] sm:$0xff]  ;;  %v3924_v0 = vld [vmem:[%s8937_s0 + $0x188] sm:$0xff] }
  0x5c   :  { %4666 = vrot.lane.b32.xlu1 %v4665_v8, %s5739_s18  ;;  %v23_v8 = vld [vmem:[%s8937_s0 + $0x18] sm:$0xff] }
  0x5d   :  { %4661 = vrot.lane.b32.xlu0 %v4660_v9, %s5739_s18  ;;  %v24_v9 = vld [vmem:[%s8937_s0 + $0x20] sm:$0xff] }
  0x5e   :  { %v4760_v11 = vpack.i.bf16 %v24_v9, %v23_v8  ;;  %v4835_v8 = vpack.i.bf16 %v3924_v0, %v3923_v63  ;;  %v4830_v9 = vpack.i.bf16 %v6425_v6, %v6420_v5 }
  0x60   :  { %4676 = vrot.lane.b32.xlu1 %v4675_v14, %s5739_s18  ;;  %v30_v14 = vld [vmem:[%s8937_s0 + $0x68] sm:$0xff] }
  0x61   :  { %4671 = vrot.lane.b32.xlu0 %v4670_v15, %s5739_s18  ;;  %v4775_v18 = vpack.i.bf16 %v30_v14, %v29_v13  ;;  %v6436_v13 = vld [vmem:[%s8937_s0 + $0x1e0] sm:$0xff]  ;;  %v6441_v14 = vld [vmem:[%s8937_s0 + $0x1e8] sm:$0xff] }
  0x62   :  { %9014 = vst [vmem:[#allocation13_spill] sm:$0xff] %v6436_v13  ;;  %9015 = vst [vmem:[#allocation14_spill] sm:$0xff] %v6441_v14 }
  0x64   :  { %4686 = vrot.lane.b32.xlu1 %v4685_v20, %s5739_s18 }
  0x65   :  { %4681 = vrot.lane.b32.xlu0 %v4680_v21, %s5739_s18  ;;  %v33_v21 = vld [vmem:[%s8937_s0 + $0x90] sm:$0xff] }
  0x68   :  { %4696 = vrot.lane.b32.xlu1 %v4695_v26, %s5739_s18  ;;  %v4785_v26 = vpack.i.bf16 %v34_v22, %v33_v21  ;;  %v4845_v21 = vpack.i.bf16 %v6441_v14, %v6436_v13  ;;  %v4027_v14 = vld [vmem:[%s8937_s0 + $0x62] sm:$0xff]  ;;  %v4028_v13 = vld [vmem:[%s8937_s0 + $0x6a] sm:$0xff] }
  0x69   :  { %4691 = vrot.lane.b32.xlu0 %v4690_v27, %s5739_s18  ;;  %v4780_v27 = vpack.i.bf16 %v32_v25, %v31_v24  ;;  %v6466_v25 = vld [vmem:[%s8937_s0 + $0x210] sm:$0xff] }
  0x6a   :  { %9018 = vst [vmem:[#allocation17_spill] sm:$0xff] %v6466_v25 }
  0x6c   :  { %4706 = vrot.lane.b32.xlu1 %v4705_v32, %s5739_s18  ;;  %v35_v32 = vld [vmem:[%s8937_s0 + $0xa8] sm:$0xff] }
  0x6d   :  { %4701 = vrot.lane.b32.xlu0 %v4700_v33, %s5739_s18  ;;  %v36_v33 = vld [vmem:[%s8937_s0 + $0xb0] sm:$0xff] }
  0x6e   :  { %v4790_v35 = vpack.i.bf16 %v36_v33, %v35_v32  ;;  %v6478_v32 = vld [vmem:[%s8937_s0 + $0x1f8] sm:$0xff]  ;;  %v6483_v33 = vld [vmem:[%s8937_s0 + $0x200] sm:$0xff] }
  0x6f   :  { %9021 = vst [vmem:[#allocation20_spill] sm:$0xff] %v6478_v32  ;;  %9022 = vst [vmem:[#allocation21_spill] sm:$0xff] %v6483_v33 }
  0x70   :  { %4716 = vrot.lane.b32.xlu1 %v4715_v38, %s5739_s18  ;;  %v6327_v38 = vld [vmem:[%s8937_s0 + $0xf8] sm:$0xff] }
  0x71   :  { %4711 = vrot.lane.b32.xlu0 %v4710_v39, %s5739_s18  ;;  %v4805_v42 = vpack.i.bf16 %v6327_v38, %v6322_v37 }
  0x74   :  { %4726 = vrot.lane.b32.xlu1 %v4725_v44, %s5739_s18 }
  0x75   :  { %4721 = vrot.lane.b32.xlu0 %v4720_v45, %s5739_s18  ;;  %v6352_v45 = vld [vmem:[%s8937_s0 + $0x120] sm:$0xff] }
  0x76   :  { %v6203_v54 = vpop.permute.xlu1 %4451 }
  0x77   :  { %9003 = vst [vmem:[#allocation2_spill] sm:$0xff] %v6203_v54  ;;  %v6211_v57 = vpop.permute.xlu0 %4441 }
  0x78   :  { %9004 = vst [vmem:[#allocation3_spill] sm:$0xff] %v6211_v57  ;;  %4736 = vrot.lane.b32.xlu1 %v4735_v50, %s5739_s18  ;;  %v4815_v50 = vpack.i.bf16 %v6357_v46, %v6352_v45 }
  0x79   :  { %4731 = vrot.lane.b32.xlu0 %v4730_v51, %s5739_s18  ;;  %v4810_v51 = vpack.i.bf16 %v6369_v49, %v6364_v48 }
  0x7a   :  { %v6221_v62 = vpop.permute.xlu1 %4456 }
  0x7b   :  { %9005 = vst [vmem:[#allocation4_spill] sm:$0xff] %v6221_v62  ;;  %v6229_v1 = vpop.permute.xlu0 %4446  ;;  %v6573_v62 = vld [vmem:[%s8937_s0 + $0x290] sm:$0xff] }
  0x7c   :  { %9006 = vst [vmem:[#allocation5_spill] sm:$0xff] %v6229_v1  ;;  %4746 = vrot.lane.b32.xlu1 %v4745_v58, %s5739_s18  ;;  %v6394_v58 = vld [vmem:[%s8937_s0 + $0x138] sm:$0xff]  ;;  %v6561_v1 = vld [vmem:[%s8937_s0 + $0x2a8] sm:$0xff]  ;;  %9040 = vst [vmem:[#allocation39_spill] sm:$0xff] %v6573_v62 }
  0x7d   :  { %4741 = vrot.lane.b32.xlu0 %v4740_v59, %s5739_s18  ;;  %v6399_v59 = vld [vmem:[%s8937_s0 + $0x140] sm:$0xff]  ;;  %9037 = vst [vmem:[#allocation36_spill] sm:$0xff] %v6561_v1 }
  0x7e   :  { %v6233_v4 = vpop.permute.xlu1 %4466  ;;  %v4820_v61 = vpack.i.bf16 %v6399_v59, %v6394_v58 }
  0x7f   :  { %9007 = vst [vmem:[#allocation6_spill] sm:$0xff] %v6233_v4  ;;  %v6241_v7 = vpop.permute.xlu0 %4461  ;;  %v6556_v4 = vld [vmem:[%s8937_s0 + $0x2a0] sm:$0xff] }
  0x80   :  { %9008 = vst [vmem:[#allocation7_spill] sm:$0xff] %v6241_v7  ;;  %4756 = vrot.lane.b32.xlu1 %v4755_v2, %s5739_s18  ;;  %9036 = vst [vmem:[#allocation35_spill] sm:$0xff] %v6556_v4  ;;  %v4885_v57 = vpack.i.bf16 %v6561_v1, %v6556_v4 }
  0x81   :  { %4751 = vrot.lane.b32.xlu0 %v4750_v3, %s5739_s18  ;;  %s5740_s18 = smov 9  }
  0x82   :  { %v6253_v12 = vpop.permute.xlu1 %4476 }
  0x83   :  { %9009 = vst [vmem:[#allocation8_spill] sm:$0xff] %v6253_v12  ;;  %v6261_v15 = vpop.permute.xlu0 %4471 }
  0x84   :  { %9010 = vst [vmem:[#allocation9_spill] sm:$0xff] %v6261_v15  ;;  %4766 = vrot.lane.b32.xlu1 %v6250_v10, %s5740_s18 }
  0x85   :  { %4761 = vrot.lane.b32.xlu0 %v4760_v11, %s5740_s18 }
  0x86   :  { %v6274_v20 = vpop.permute.xlu1 %4486 }
  0x87   :  { %v6282_v23 = vpop.permute.xlu0 %4481 }
  0x88   :  { %4776 = vrot.lane.b32.xlu1 %v4775_v18, %s5740_s18  ;;  %v6453_v18 = vld [vmem:[%s8937_s0 + $0x1d0] sm:$0xff] }
  0x89   :  { %4771 = vrot.lane.b32.xlu0 %v6272_v19, %s5740_s18  ;;  %v4840_v22 = vpack.i.bf16 %v6453_v18, %v6448_v17 }
  0x8a   :  { %v6293_v28 = vpop.permute.xlu1 %4496 }
  0x8b   :  { %v6305_v31 = vpop.permute.xlu0 %4491 }
  0x8c   :  { %4786 = vrot.lane.b32.xlu1 %v4785_v26, %s5740_s18  ;;  %v6471_v26 = vld [vmem:[%s8937_s0 + $0x218] sm:$0xff] }
  0x8d   :  { %4781 = vrot.lane.b32.xlu0 %v4780_v27, %s5740_s18  ;;  %9019 = vst [vmem:[#allocation18_spill] sm:$0xff] %v6471_v26 }
  0x8e   :  { %v6317_v36 = vpop.permute.xlu1 %4506 }
  0x8f   :  { %v6329_v39 = vpop.permute.xlu0 %4501 }
  0x90   :  { %4796 = vrot.lane.b32.xlu1 %v4795_v34, %s5740_s18  ;;  %v4855_v34 = vpack.i.bf16 %v6471_v26, %v6466_v25  ;;  %v4024_v26 = vld [vmem:[%s8937_s0 + $0x3a] sm:$0xff] }
  0x91   :  { %4791 = vrot.lane.b32.xlu0 %v4790_v35, %s5740_s18  ;;  %v4850_v35 = vpack.i.bf16 %v6483_v33, %v6478_v32  ;;  %v6767_v32 = vld [vmem:[%s8937_s0 + $0x78] sm:$0xff] }
  0x92   :  { %v6347_v44 = vpop.permute.xlu1 %4516 }
  0x93   :  { %v6359_v47 = vpop.permute.xlu0 %4511 }
  0x94   :  { %4806 = vrot.lane.b32.xlu1 %v4805_v42, %s5740_s18 }
  0x95   :  { %4801 = vrot.lane.b32.xlu0 %v4800_v43, %s5740_s18  ;;  %v6496_v43 = vld [vmem:[%s8937_s0 + $0x240] sm:$0xff] }
  0x96   :  { %v6377_v52 = vpop.permute.xlu1 %4526  ;;  %9024 = vst [vmem:[#allocation23_spill] sm:$0xff] %v6496_v43 }
  0x97   :  { %v6389_v56 = vpop.permute.xlu0 %4521 }
  0x98   :  { %4816 = vrot.lane.b32.xlu1 %v4815_v50, %s5740_s18  ;;  %v6501_v50 = vld [vmem:[%s8937_s0 + $0x248] sm:$0xff] }
  0x99   :  { %4811 = vrot.lane.b32.xlu0 %v4810_v51, %s5740_s18  ;;  %9025 = vst [vmem:[#allocation24_spill] sm:$0xff] %v6501_v50  ;;  %v4865_v63 = vpack.i.bf16 %v6501_v50, %v6496_v43  ;;  %v3967_v50 = vld [vmem:[%s8937_s0 + $0x91] sm:$0xff]  ;;  %v3968_v43 = vld [vmem:[%s8937_s0 + $0x99] sm:$0xff] }
  0x9a   :  { %v6413_v2 = vpop.permute.xlu1 %4536  ;;  %v6762_v33 = vpack.i.bf16 %v3968_v43, %v3967_v50  ;;  %v4032_v50 = vld [vmem:[%s8937_s0 + $0x9a] sm:$0xff] }
  0x9b   :  { %v6415_v3 = vpop.permute.xlu0 %4531 }
  0x9c   :  { %9012 = vst [vmem:[#allocation11_spill] sm:$0xff] %v6415_v3  ;;  %4826 = vrot.lane.b32.xlu1 %v4825_v60, %s5740_s18  ;;  %v6508_v60 = vld [vmem:[%s8937_s0 + $0x228] sm:$0xff] }
  0x9d   :  { %4821 = vrot.lane.b32.xlu0 %v4820_v61, %s5740_s18  ;;  %9027 = vst [vmem:[#allocation26_spill] sm:$0xff] %v6508_v60  ;;  %v6513_v61 = vld [vmem:[%s8937_s0 + $0x230] sm:$0xff] }
  0x9e   :  { %v6431_v11 = vpop.permute.xlu1 %4546  ;;  %9028 = vst [vmem:[#allocation27_spill] sm:$0xff] %v6513_v61  ;;  %v4860_v0 = vpack.i.bf16 %v6513_v61, %v6508_v60 }
  0x9f   :  { %9013 = vst [vmem:[#allocation12_spill] sm:$0xff] %v6431_v11  ;;  %v6443_v16 = vpop.permute.xlu0 %4541 }
  0xa0   :  { %9016 = vst [vmem:[#allocation15_spill] sm:$0xff] %v6443_v16  ;;  %4836 = vrot.lane.b32.xlu1 %v4835_v8, %s5740_s18  ;;  %v6772_v16 = vld [vmem:[%s8937_s0 + $0x80] sm:$0xff] }
  0xa1   :  { %4831 = vrot.lane.b32.xlu0 %v4830_v9, %s5740_s18  ;;  %v6526_v9 = vld [vmem:[%s8937_s0 + $0x270] sm:$0xff] }
  0xa2   :  { %v6461_v24 = vpop.permute.xlu1 %4556  ;;  %9030 = vst [vmem:[#allocation29_spill] sm:$0xff] %v6526_v9 }
  0xa3   :  { %9017 = vst [vmem:[#allocation16_spill] sm:$0xff] %v6461_v24  ;;  %v6473_v27 = vpop.permute.xlu0 %4551  ;;  %v4023_v24 = vld [vmem:[%s8937_s0 + $0x32] sm:$0xff] }
  0xa4   :  { %9020 = vst [vmem:[#allocation19_spill] sm:$0xff] %v6473_v27  ;;  %4846 = vrot.lane.b32.xlu1 %v4845_v21, %s5740_s18  ;;  %v6531_v21 = vld [vmem:[%s8937_s0 + $0x278] sm:$0xff]  ;;  %v6710_v27 = vld [vmem:[%s8937_s0 + $0x22] sm:$0xff] }
  0xa5   :  { %4841 = vrot.lane.b32.xlu0 %v4840_v22, %s5740_s18  ;;  %9031 = vst [vmem:[#allocation30_spill] sm:$0xff] %v6531_v21  ;;  %v4875_v15 = vpack.i.bf16 %v6531_v21, %v6526_v9  ;;  %v6621_v21 = vld [vmem:[%s8937_s0 + $0x308] sm:$0xff] }
  0xa6   :  { %v6491_v42 = vpop.permute.xlu1 %4566  ;;  %9049 = vst [vmem:[#allocation48_spill] sm:$0xff] %v6621_v21  ;;  %v6675_v9 = vld [vmem:[%s8937_s0 + $0x21] sm:$0xff] }
  0xa7   :  { %9023 = vst [vmem:[#allocation22_spill] sm:$0xff] %v6491_v42  ;;  %v6503_v51 = vpop.permute.xlu0 %4561  ;;  %v6705_v42 = vld [vmem:[%s8937_s0 + $0x1a] sm:$0xff] }
  0xa8   :  { %9026 = vst [vmem:[#allocation25_spill] sm:$0xff] %v6503_v51  ;;  %4856 = vrot.lane.b32.xlu1 %v4855_v34, %s5740_s18  ;;  %v6538_v34 = vld [vmem:[%s8937_s0 + $0x258] sm:$0xff]  ;;  %v3966_v51 = vld [vmem:[%s8937_s0 + $0x81] sm:$0xff] }
  0xa9   :  { %4851 = vrot.lane.b32.xlu0 %v4850_v35, %s5740_s18  ;;  %9033 = vst [vmem:[#allocation32_spill] sm:$0xff] %v6538_v34  ;;  %v6543_v35 = vld [vmem:[%s8937_s0 + $0x260] sm:$0xff] }
  0xaa   :  { %v6521_v8 = vpop.permute.xlu1 %4576  ;;  %9034 = vst [vmem:[#allocation33_spill] sm:$0xff] %v6543_v35  ;;  %v4870_v12 = vpack.i.bf16 %v6543_v35, %v6538_v34  ;;  %v3965_v34 = vld [vmem:[%s8937_s0 + $0x79] sm:$0xff] }
  0xab   :  { %9029 = vst [vmem:[#allocation28_spill] sm:$0xff] %v6521_v8  ;;  %v6533_v22 = vpop.permute.xlu0 %4571  ;;  %v6616_v8 = vld [vmem:[%s8937_s0 + $0x300] sm:$0xff]  ;;  %v6779_v43 = vpack.i.bf16 %v3966_v51, %v3965_v34  ;;  %v4489_v51 = vunpack.i.h.bf16 %v6274_v20  ;;  %v4484_v34 = vunpack.i.h.bf16 %v6282_v23 }
  0xac   :  { %9032 = vst [vmem:[#allocation31_spill] sm:$0xff] %v6533_v22  ;;  %4866 = vrot.lane.b32.xlu1 %v4865_v63, %s5740_s18  ;;  %v6591_v22 = vld [vmem:[%s8937_s0 + $0x2d8] sm:$0xff]  ;;  %9048 = vst [vmem:[#allocation47_spill] sm:$0xff] %v6616_v8 }
  0xad   :  { %4861 = vrot.lane.b32.xlu0 %v4860_v0, %s5740_s18  ;;  %v6568_v0 = vld [vmem:[%s8937_s0 + $0x288] sm:$0xff]  ;;  %9043 = vst [vmem:[#allocation42_spill] sm:$0xff] %v6591_v22 }
  0xae   :  { %v6551_v7 = vpop.permute.xlu1 %4586  ;;  %9039 = vst [vmem:[#allocation38_spill] sm:$0xff] %v6568_v0  ;;  %v4880_v54 = vpack.i.bf16 %v6573_v62, %v6568_v0  ;;  %v3964_v62 = vld [vmem:[%s8937_s0 + $0x69] sm:$0xff]  ;;  %v3962_v0 = vld [vmem:[%s8937_s0 + $0x51] sm:$0xff] }
  0xaf   :  { %9035 = vst [vmem:[#allocation34_spill] sm:$0xff] %v6551_v7  ;;  %v6563_v63 = vpop.permute.xlu0 %4581  ;;  %v6586_v7 = vld [vmem:[%s8937_s0 + $0x2d0] sm:$0xff] }
  0xb0   :  { %9038 = vst [vmem:[#allocation37_spill] sm:$0xff] %v6563_v63  ;;  %4876 = vrot.lane.b32.xlu1 %v4875_v15, %s5740_s18  ;;  %9042 = vst [vmem:[#allocation41_spill] sm:$0xff] %v6586_v7  ;;  %v4895_v1 = vpack.i.bf16 %v6591_v22, %v6586_v7  ;;  %v4905_v22 = vpack.i.bf16 %v6621_v21, %v6616_v8  ;;  %v3955_v7 = vld [vmem:[%s8937_s0 + $0x330] sm:$0xff] }
  0xb1   :  { %4871 = vrot.lane.b32.xlu0 %v4870_v12, %s5740_s18  ;;  %v6598_v12 = vld [vmem:[%s8937_s0 + $0x2b8] sm:$0xff] }
  0xb2   :  { %v6581_v63 = vpop.permute.xlu1 %4596  ;;  %9045 = vst [vmem:[#allocation44_spill] sm:$0xff] %v6598_v12  ;;  %v3959_v8 = vld [vmem:[%s8937_s0 + $0x31] sm:$0xff] }
  0xb3   :  { %9041 = vst [vmem:[#allocation40_spill] sm:$0xff] %v6581_v63  ;;  %v6593_v15 = vpop.permute.xlu0 %4591  ;;  %v6603_v63 = vld [vmem:[%s8937_s0 + $0x2c0] sm:$0xff] }
  0xb4   :  { %9044 = vst [vmem:[#allocation43_spill] sm:$0xff] %v6593_v15  ;;  %9046 = vst [vmem:[#allocation45_spill] sm:$0xff] %v6603_v63  ;;  %4886 = vrot.lane.b32.xlu1 %v4885_v57, %s5740_s18  ;;  %v4890_v15 = vpack.i.bf16 %v6603_v63, %v6598_v12  ;;  %v3956_v63 = vld [vmem:[%s8937_s0 + $0x338] sm:$0xff] }
  0xb5   :  { %4881 = vrot.lane.b32.xlu0 %v4880_v54, %s5740_s18  ;;  %v6628_v54 = vld [vmem:[%s8937_s0 + $0x2e8] sm:$0xff]  ;;  %v6670_v12 = vld [vmem:[%s8937_s0 + $0x19] sm:$0xff]  ;;  %v4915_v35 = vpack.i.bf16 %v3956_v63, %v3955_v7  ;;  %v3970_v63 = vld [vmem:[%s8937_s0 + $0xb1] sm:$0xff] }
  0xb6   :  { %v6611_v4 = vpop.permute.xlu1 %4606  ;;  %9051 = vst [vmem:[#allocation50_spill] sm:$0xff] %v6628_v54  ;;  %v3969_v7 = vld [vmem:[%s8937_s0 + $0xa9] sm:$0xff] }
  0xb7   :  { %9047 = vst [vmem:[#allocation46_spill] sm:$0xff] %v6611_v4  ;;  %v6623_v57 = vpop.permute.xlu0 %4601  ;;  %v6633_v4 = vld [vmem:[%s8937_s0 + $0x2f0] sm:$0xff] }
  0xb8   :  { %9050 = vst [vmem:[#allocation49_spill] sm:$0xff] %v6623_v57  ;;  %9052 = vst [vmem:[#allocation51_spill] sm:$0xff] %v6633_v4  ;;  %4896 = vrot.lane.b32.xlu1 %v4895_v1, %s5740_s18  ;;  %v4900_v57 = vpack.i.bf16 %v6633_v4, %v6628_v54  ;;  %v6650_v1 = vld [vmem:[%s8937_s0 + $0x318] sm:$0xff] }
  0xb9   :  { %4891 = vrot.lane.b32.xlu0 %v4890_v15, %s5740_s18  ;;  %9053 = vst [vmem:[#allocation52_spill] sm:$0xff] %v6650_v1  ;;  %v6655_v15 = vld [vmem:[%s8937_s0 + $0x320] sm:$0xff] }
  0xba   :  { %9054 = vst [vmem:[#allocation53_spill] sm:$0xff] %v6655_v15  ;;  %v6657_v21 = vpop.permute.xlu1 %4616  ;;  %v3960_v4 = vld [vmem:[%s8937_s0 + $0x39] sm:$0xff] }
  0xbb   :  { %9055 = vst [vmem:[#allocation54_spill] sm:$0xff] %v6657_v21  ;;  %v6665_v54 = vpop.permute.xlu0 %4611  ;;  %v3963_v21 = vld [vmem:[%s8937_s0 + $0x61] sm:$0xff]  ;;  %v6742_v60 = vpack.i.bf16 %v3960_v4, %v3959_v8  ;;  %v4920_v4 = vpack.i.bf16 %v6675_v9, %v6670_v12  ;;  %v6796_v12 = vld [vmem:[%s8937_s0 + $0x98] sm:$0xff] }
  0xbc   :  { %9056 = vst [vmem:[#allocation55_spill] sm:$0xff] %v6665_v54  ;;  %v3961_v54 = vld [vmem:[%s8937_s0 + $0x49] sm:$0xff]  ;;  %4906 = vrot.lane.b32.xlu1 %v4905_v22, %s5740_s18  ;;  %v4910_v22 = vpack.i.bf16 %v6655_v15, %v6650_v1  ;;  %v4026_v15 = vld [vmem:[%s8937_s0 + $0x52] sm:$0xff]  ;;  %v6738_v1 = vld [vmem:[%s8937_s0 + $0x60] sm:$0xff]  ;;  %v6758_v8 = vpack.i.bf16 %v3964_v62, %v3963_v21  ;;  %v4488_v62 = vunpack.i.l.bf16 %v6274_v20  ;;  %v6783_v21 = vpack.i.bf16 %v3970_v63, %v3969_v7 }
  0xbd   :  { %4901 = vrot.lane.b32.xlu0 %v4900_v57, %s5740_s18  ;;  %v4025_v57 = vld [vmem:[%s8937_s0 + $0x4a] sm:$0xff]  ;;  %v4029_v9 = vld [vmem:[%s8937_s0 + $0x7a] sm:$0xff]  ;;  %v4031_v63 = vld [vmem:[%s8937_s0 + $0x92] sm:$0xff] }
  0xbe   :  { %v6727_v25 = vpop.permute.xlu1 %4626  ;;  %v6813_v19 = vpack.i.bf16 %v4026_v15, %v4025_v57  ;;  %v4493_v57 = vunpack.i.l.bf16 %v6305_v31  ;;  %v4508_v15 = vunpack.i.l.bf16 %v6317_v36 }
  0xbf   :  { %9057 = vst [vmem:[#allocation56_spill] sm:$0xff] %v6727_v25  ;;  %v6740_v61 = vpop.permute.xlu0 %4621  ;;  %v6747_v25 = vld [vmem:[%s8937_s0 + $0x68] sm:$0xff] }
  0xc0   :  { %9058 = vst [vmem:[#allocation57_spill] sm:$0xff] %v6740_v61  ;;  %4916 = vrot.lane.b32.xlu1 %v4915_v35, %s5740_s18  ;;  %v6760_v61 = vpack.i.bf16 %v3962_v0, %v3961_v54  ;;  %v4030_v35 = vld [vmem:[%s8937_s0 + $0x82] sm:$0xff]  ;;  %v6791_v0 = vld [vmem:[%s8937_s0 + $0x90] sm:$0xff]  ;;  %v4483_v54 = vunpack.i.l.bf16 %v6282_v23  ;;  %v6817_v23 = vpack.i.bf16 %v4028_v13, %v4027_v14  ;;  %v2666_v13 = vsel %vm2647_vm0, %v6334_v40, %v4488_v62 }
  0xc1   :  { %4911 = vrot.lane.b32.xlu0 %v4910_v22, %s5740_s18  ;;  %v6803_v22 = vpack.i.bf16 %v4024_v26, %v4023_v24  ;;  %v4499_v26 = vunpack.i.h.bf16 %v6293_v28  ;;  %v6825_v3 = vpack.i.bf16 %v4030_v35, %v4029_v9  ;;  %v4494_v14 = vunpack.i.h.bf16 %v6305_v31 }
  0xc2   :  { %v6801_v7 = vpop.permute.xlu1 %4636  ;;  %v6834_v24 = vpack.i.bf16 %v4032_v50, %v4031_v63  ;;  %v2664_v9 = vsel %vm2647_vm0, %v6298_v29, %v4483_v54  ;;  %v2665_v35 = vsel %vm2647_vm0, %v6303_v30, %v4484_v34  ;;  %v4509_v62 = vunpack.i.h.bf16 %v6317_v36 }
  0xc3   :  { %9059 = vst [vmem:[#allocation58_spill] sm:$0xff] %v6801_v7  ;;  %v6811_v11 = vpop.permute.xlu0 %4631  ;;  %v4498_v7 = vunpack.i.l.bf16 %v6293_v28  ;;  %v2667_v28 = vsel %vm2647_vm0, %v6339_v41, %v4489_v51  ;;  %v4503_v31 = vunpack.i.l.bf16 %v6329_v39  ;;  %v2671_v41 = vsel %vm2647_vm0, %v6369_v49, %v4499_v26 }
  0xc4   :  { %9060 = vst [vmem:[#allocation59_spill] sm:$0xff] %v6811_v11  ;;  %4926 = vrot.lane.b32.xlu1 %v6742_v60, %s5741_s8  ;;  %v2668_v30 = vsel %vm2647_vm0, %v6322_v37, %v4493_v57  ;;  %v2669_v36 = vsel %vm2647_vm0, %v6327_v38, %v4494_v14  ;;  %v4504_v49 = vunpack.i.h.bf16 %v6329_v39  ;;  %v2675_v26 = vsel %vm2647_vm0, %v6399_v59, %v4509_v62  ;;  %v5720_v62 = vld [vmem:[%s8938_s1 + $0x8] sm:$0x3f]  }
  0xc5   :  { %4921 = vrot.lane.b32.xlu0 %v4920_v4, %s5741_s8  ;;  %v2670_v63 = vsel %vm2647_vm0, %v6364_v48, %v4498_v7  ;;  %v2674_v48 = vsel %vm2647_vm0, %v6394_v58, %v4508_v15  ;;  %v4518_v39 = vunpack.i.l.bf16 %v6347_v44 }
  0xc6   :  { %v4647_v40 = vpop.permute.xlu1 %4646 }
  0xc7   :  { %v4649_v20 = vunpack.i.h.bf16 %v4647_v40  ;;  %v4648_v4 = vunpack.i.l.bf16 %v4647_v40  ;;  %v4642_v50 = vpop.permute.xlu0 %4641 }
  0xc8   :  { %v4644_v29 = vunpack.i.h.bf16 %v4642_v50  ;;  %v4643_v51 = vunpack.i.l.bf16 %v4642_v50  ;;  %4936 = vrot.lane.b32.xlu1 %v6758_v8, %s5741_s8  ;;  %v4519_v50 = vunpack.i.h.bf16 %v6347_v44  ;;  %v4514_v44 = vunpack.i.h.bf16 %v6359_v47 }
  0xc9   :  { %v6856_v34 = vsel %vm2712_vm1, %v2666_v13, %v4648_v4  ;;  %v6859_v54 = vsel %vm2712_vm1, %v2667_v28, %v4649_v20  ;;  %4931 = vrot.lane.b32.xlu0 %v6760_v61, %s5741_s8  ;;  %v2672_v20 = vsel %vm2647_vm0, %v6352_v45, %v4503_v31  ;;  %v2673_v45 = vsel %vm2647_vm0, %v6357_v46, %v4504_v49 }
  0xca   :  { %v6867_v7 = vsel %vm2712_vm1, %v2664_v9, %v4643_v51  ;;  %v6870_v37 = vsel %vm2712_vm1, %v2665_v35, %v4644_v29  ;;  %v4657_v38 = vpop.permute.xlu1 %4656  ;;  %v5742_v31 = vmov 65535   ;;  %v4513_v46 = vunpack.i.l.bf16 %v6359_v47 }
  0xcb   :  { %v4659_v13 = vunpack.i.h.bf16 %v4657_v38  ;;  %v4658_v14 = vunpack.i.l.bf16 %v4657_v38  ;;  %v4652_v57 = vpop.permute.xlu0 %4651  ;;  %v3320_v4 = vsel %vm3318_vm2, 4294967295, %v5742_v31 }
  0xcc   :  { %v4654_v28 = vunpack.i.h.bf16 %v4652_v57  ;;  %v4653_v58 = vunpack.i.l.bf16 %v4652_v57  ;;  %4946 = vrot.lane.b32.xlu1 %v6762_v33, %s5741_s8  ;;  %v3321_v51 = vsel %vm3319_vm3, %v3320_v4, 0 }
  0xcd   :  { %v6880_v15 = vsel %vm2712_vm1, %v2670_v63, %v4658_v14  ;;  %v6883_v9 = vsel %vm2712_vm1, %v2671_v41, %v4659_v13  ;;  %4941 = vrot.lane.b32.xlu0 %v6779_v43, %s5741_s8  ;;  %v3323_v38 = vand.u32 %v5720_v62, %v3321_v51  ;;  %v2678_v13 = vsel %vm2647_vm0, %v6420_v5, %v4518_v39  ;;  %v53_v62 = vld [vmem:[%s8937_s0 + $0x1b0] sm:$0xff] }
  0xce   :  { %v6890_v59 = vsel %vm2712_vm1, %v2668_v30, %v4653_v58  ;;  %v6893_v35 = vsel %vm2712_vm1, %v2669_v36, %v4654_v28  ;;  %v4667_v40 = vpop.permute.xlu1 %4666  ;;  %v9061_v36 = vpack.i.bf16 %v6710_v27, %v6705_v42  ;;  %v4529_v28 = vunpack.i.h.bf16 %v6377_v52 }
  0xcf   :  { %v4669_v63 = vunpack.i.h.bf16 %v4667_v40  ;;  %v4668_v41 = vunpack.i.l.bf16 %v4667_v40  ;;  %v4662_v29 = vpop.permute.xlu0 %4661  ;;  %v4528_v27 = vunpack.i.l.bf16 %v6377_v52  ;;  %4351 = vmatprep.subr.bf16.mxu0 %v3323_v38  ;;  %4425 = vmatprep.subr.bf16.mxu1 %v3323_v38  ;;  %v5721_v52 = vld [vmem:[%s8938_s1] sm:$0xff]   ;;  %s5745_s1 = smov 21  }
  0xd0   :  { %v4664_v30 = vunpack.i.h.bf16 %v4662_v29  ;;  %v4663_v49 = vunpack.i.l.bf16 %v4662_v29  ;;  %4956 = vrot.lane.b32.xlu1 %v9061_v36, %s5743_s12  ;;  %4352 = vmatpush3.bf16.msra.mxu0 %v3323_v38 }
  0xd1   :  { %v6908_v14 = vsel %vm2712_vm1, %v2674_v48, %v4668_v41  ;;  %v6911_v57 = vsel %vm2712_vm1, %v2675_v26, %v4669_v63  ;;  %4951 = vrot.lane.b32.xlu0 %v6783_v21, %s5741_s8  ;;  %v4524_v48 = vunpack.i.h.bf16 %v6389_v56  ;;  %v4523_v26 = vunpack.i.l.bf16 %v6389_v56  ;;  %4427 = vmatpush3.bf16.msra.mxu1 %v3323_v38  ;;  %v54_v56 = vld [vmem:[%s8937_s0 + $0x1b8] sm:$0xff] }
  0xd2   :  { %v6918_v42 = vsel %vm2712_vm1, %v2672_v20, %v4663_v49  ;;  %v6921_v5 = vsel %vm2712_vm1, %v2673_v45, %v4664_v30  ;;  %v4677_v47 = vpop.permute.xlu1 %4676  ;;  %v2679_v20 = vsel %vm2647_vm0, %v6425_v6, %v4519_v50  ;;  %v2676_v45 = vsel %vm2647_vm0, %v6382_v53, %v4513_v46  ;;  %4353 = vmatprep.subr.bf16.mxu0 %v5721_v52 }
  0xd3   :  { %v4679_v58 = vunpack.i.h.bf16 %v4677_v47  ;;  %v4678_v39 = vunpack.i.l.bf16 %v4677_v47  ;;  %v4672_v40 = vpop.permute.xlu0 %4671  ;;  %v2677_v6 = vsel %vm2647_vm0, %v6387_v55, %v4514_v44  ;;  %v2682_v63 = vsel %vm2647_vm0, %v6448_v17, %v4528_v27  ;;  %4426 = vmatprep.subr.bf16.mxu1 %v5721_v52  ;;  %v9062_v44 = vld [vmem:[#allocation11_spill] sm:$0xff] }
  0xd4   :  { %v4674_v31 = vunpack.i.h.bf16 %v4672_v40  ;;  %v4673_v4 = vunpack.i.l.bf16 %v4672_v40  ;;  %4966 = vrot.lane.b32.xlu1 %v6250_v10, %s5744_s19  ;;  %v2683_v41 = vsel %vm2647_vm0, %v6453_v18, %v4529_v28  ;;  %v2680_v51 = vsel %vm2647_vm0, %v53_v62, %v4523_v26  ;;  %4354 = vmatpush3.bf16.msra.mxu0 %v5721_v52  ;;  %v9063_v26 = vld [vmem:[#allocation10_spill] sm:$0xff] }
  0xd5   :  { %v6943_v50 = vsel %vm2712_vm1, %v2678_v13, %v4678_v39  ;;  %v6946_v53 = vsel %vm2712_vm1, %v2679_v20, %v4679_v58  ;;  %4961 = vrot.lane.b32.xlu0 %v6803_v22, %s5743_s12  ;;  %v2681_v46 = vsel %vm2647_vm0, %v54_v56, %v4524_v48  ;;  %4428 = vmatpush3.bf16.msra.mxu1 %v5721_v52  ;;  %v4539_v17 = vunpack.i.h.bf16 %v6413_v2  ;;  %v9065_v20 = vld [vmem:[#allocation15_spill] sm:$0xff] }
  0xd6   :  { %v6955_v10 = vsel %vm2712_vm1, %v2676_v45, %v4673_v4  ;;  %v6958_v55 = vsel %vm2712_vm1, %v2677_v6, %v4674_v31  ;;  %v4687_v29 = vpop.permute.xlu1 %4686  ;;  %v4538_v18 = vunpack.i.l.bf16 %v6413_v2  ;;  %v4534_v28 = vunpack.i.h.bf16 %v9062_v44  ;;  %v9064_v2 = vld [vmem:[#allocation12_spill] sm:$0xff] }
  0xd7   :  { %v4689_v30 = vunpack.i.h.bf16 %v4687_v29  ;;  %v4688_v49 = vunpack.i.l.bf16 %v4687_v29  ;;  %v4682_v36 = vpop.permute.xlu0 %4681  ;;  %v4533_v27 = vunpack.i.l.bf16 %v9062_v44  ;;  %v4549_v58 = vunpack.i.h.bf16 %v9064_v2  ;;  %v9066_v6 = vld [vmem:[#allocation20_spill] sm:$0xff] }
  0xd8   :  { %v4684_v38 = vunpack.i.h.bf16 %v4682_v36  ;;  %v4683_v13 = vunpack.i.l.bf16 %v4682_v36  ;;  %4976 = vrot.lane.b32.xlu1 %v6742_v60, %s5745_s1  ;;  %v4548_v39 = vunpack.i.l.bf16 %v9064_v2  ;;  %v4544_v45 = vunpack.i.h.bf16 %v9065_v20  ;;  %v9069_v36 = vld [vmem:[#allocation14_spill] sm:$0xff] }
  0xd9   :  { %v6969_v47 = vsel %vm2712_vm1, %v2682_v63, %v4688_v49  ;;  %v6972_v48 = vsel %vm2712_vm1, %v2683_v41, %v4689_v30  ;;  %4971 = vrot.lane.b32.xlu0 %v9063_v26, %s5744_s19  ;;  %v4543_v62 = vunpack.i.l.bf16 %v9065_v20  ;;  %v2686_v63 = vsel %vm2647_vm0, %v9066_v6, %v4538_v18  ;;  %v9067_v41 = vld [vmem:[#allocation21_spill] sm:$0xff]  ;;  %v9071_v26 = vld [vmem:[#allocation27_spill] sm:$0xff] }
  0xda   :  { %v6979_v40 = vsel %vm2712_vm1, %v2680_v51, %v4683_v13  ;;  %v6982_v60 = vsel %vm2712_vm1, %v2681_v46, %v4684_v38  ;;  %v4697_v52 = vpop.permute.xlu1 %4696  ;;  %v2687_v29 = vsel %vm2647_vm0, %v9067_v41, %v4539_v17  ;;  %v9068_v46 = vld [vmem:[#allocation13_spill] sm:$0xff]  ;;  %v2685_v38 = vsel %vm2647_vm0, %v9069_v36, %v4534_v28  ;;  %v9070_v17 = vld [vmem:[#allocation26_spill] sm:$0xff] }
  0xdb   :  { %v4699_v56 = vunpack.i.h.bf16 %v4697_v52  ;;  %v4698_v31 = vunpack.i.l.bf16 %v4697_v52  ;;  %v4692_v4 = vpop.permute.xlu0 %4691  ;;  %v2684_v49 = vsel %vm2647_vm0, %v9068_v46, %v4533_v27  ;;  %v2690_v44 = vsel %vm2647_vm0, %v9070_v17, %v4548_v39  ;;  %v9072_v52 = vld [vmem:[#allocation17_spill] sm:$0xff]  ;;  %v9074_v39 = vld [vmem:[#allocation16_spill] sm:$0xff] }
  0xdc   :  { %v4694_v30 = vunpack.i.h.bf16 %v4692_v4  ;;  %v4693_v51 = vunpack.i.l.bf16 %v4692_v4  ;;  %4986 = vrot.lane.b32.xlu1 %v6803_v22, %s5746_s20  ;;  %v2691_v22 = vsel %vm2647_vm0, %v9071_v26, %v4549_v58  ;;  %v2688_v20 = vsel %vm2647_vm0, %v9072_v52, %v4543_v62  ;;  %v9077_v52 = vld [vmem:[#allocation25_spill] sm:$0xff] }
  0xdd   :  { %v6997_v13 = vsel %vm2712_vm1, %v2686_v63, %v4698_v31  ;;  %v7000_v18 = vsel %vm2712_vm1, %v2687_v29, %v4699_v56  ;;  %4981 = vrot.lane.b32.xlu0 %v6760_v61, %s5745_s1  ;;  %v9073_v56 = vld [vmem:[#allocation18_spill] sm:$0xff]  ;;  %v4559_v63 = vunpack.i.h.bf16 %v9074_v39  ;;  %v4558_v58 = vunpack.i.l.bf16 %v9074_v39  ;;  %v9079_v39 = vld [vmem:[#allocation33_spill] sm:$0xff] }
  0xde   :  { %v7009_v27 = vsel %vm2712_vm1, %v2684_v49, %v4693_v51  ;;  %v7012_v28 = vsel %vm2712_vm1, %v2685_v38, %v4694_v30  ;;  %v4707_v2 = vpop.permute.xlu1 %4706  ;;  %v2689_v31 = vsel %vm2647_vm0, %v9073_v56, %v4544_v45  ;;  %v9075_v30 = vld [vmem:[#allocation19_spill] sm:$0xff]  ;;  %v9076_v49 = vld [vmem:[#allocation22_spill] sm:$0xff]  ;;  %v4563_v56 = vunpack.i.l.bf16 %v9077_v52 }
  0xdf   :  { %v4709_v61 = vunpack.i.h.bf16 %v4707_v2  ;;  %v4708_v4 = vunpack.i.l.bf16 %v4707_v2  ;;  %v4702_v6 = vpop.permute.xlu0 %4701  ;;  %v4554_v51 = vunpack.i.h.bf16 %v9075_v30  ;;  %v4553_v46 = vunpack.i.l.bf16 %v9075_v30 }
  0xe0   :  { %v4704_v41 = vunpack.i.h.bf16 %v4702_v6  ;;  %v4703_v29 = vunpack.i.l.bf16 %v4702_v6  ;;  %4996 = vrot.lane.b32.xlu1 %v6813_v19, %s5743_s12  ;;  %v4569_v36 = vunpack.i.h.bf16 %v9076_v49  ;;  %v4568_v38 = vunpack.i.l.bf16 %v9076_v49  ;;  %v9078_v6 = vld [vmem:[#allocation32_spill] sm:$0xff] }
  0xe1   :  { %v7025_v62 = vsel %vm2712_vm1, %v2690_v44, %v4708_v4  ;;  %v7028_v45 = vsel %vm2712_vm1, %v2691_v22, %v4709_v61  ;;  %4991 = vrot.lane.b32.xlu0 %v6813_v19, %s5746_s20  ;;  %v4564_v44 = vunpack.i.h.bf16 %v9077_v52  ;;  %v2694_v19 = vsel %vm2647_vm0, %v9078_v6, %v4558_v58  ;;  %v9082_v52 = vld [vmem:[#allocation24_spill] sm:$0xff]  ;;  %v9085_v6 = vld [vmem:[#allocation29_spill] sm:$0xff] }
  0xe2   :  { %v7035_v17 = vsel %vm2712_vm1, %v2688_v20, %v4703_v29  ;;  %v7038_v26 = vsel %vm2712_vm1, %v2689_v31, %v4704_v41  ;;  %v4717_v2 = vpop.permute.xlu1 %4716  ;;  %v2695_v30 = vsel %vm2647_vm0, %v9079_v39, %v4559_v63  ;;  %v9080_v31 = vpack.i.bf16 %v6747_v25, %v6738_v1  ;;  %v9081_v41 = vld [vmem:[#allocation23_spill] sm:$0xff]  ;;  %v9083_v63 = vld [vmem:[#allocation38_spill] sm:$0xff] }
  0xe3   :  { %v4719_v22 = vunpack.i.h.bf16 %v4717_v2  ;;  %v4718_v61 = vunpack.i.l.bf16 %v4717_v2  ;;  %v4712_v4 = vpop.permute.xlu0 %4711  ;;  %v2692_v29 = vsel %vm2647_vm0, %v9081_v41, %v4553_v46  ;;  %v2693_v2 = vsel %vm2647_vm0, %v9082_v52, %v4554_v51  ;;  %v9084_v25 = vld [vmem:[#allocation39_spill] sm:$0xff] }
  0xe4   :  { %v4714_v49 = vunpack.i.h.bf16 %v4712_v4  ;;  %v4713_v20 = vunpack.i.l.bf16 %v4712_v4  ;;  %5006 = vrot.lane.b32.xlu1 %v9080_v31, %s5744_s19  ;;  %v2698_v4 = vsel %vm2647_vm0, %v9083_v63, %v4568_v38  ;;  %v2699_v1 = vsel %vm2647_vm0, %v9084_v25, %v4569_v36  ;;  %v9087_v38 = vld [vmem:[#allocation28_spill] sm:$0xff] }
  0xe5   :  { %v7055_v11 = vsel %vm2712_vm1, %v2694_v19, %v4718_v61  ;;  %v7058_v58 = vsel %vm2712_vm1, %v2695_v30, %v4719_v22  ;;  %5001 = vrot.lane.b32.xlu0 %v6817_v23, %s5743_s12  ;;  %v2696_v22 = vsel %vm2647_vm0, %v9085_v6, %v4563_v56  ;;  %v9086_v19 = vld [vmem:[#allocation30_spill] sm:$0xff]  ;;  %v4579_v52 = vunpack.i.h.bf16 %v9087_v38 }
  0xe6   :  { %v7067_v46 = vsel %vm2712_vm1, %v2692_v29, %v4713_v20  ;;  %v7070_v51 = vsel %vm2712_vm1, %v2693_v2, %v4714_v49  ;;  %v4727_v61 = vpop.permute.xlu1 %4726  ;;  %v2697_v39 = vsel %vm2647_vm0, %v9086_v19, %v4564_v44  ;;  %v4578_v36 = vunpack.i.l.bf16 %v9087_v38  ;;  %v9088_v49 = vld [vmem:[#allocation31_spill] sm:$0xff] }
  0xe7   :  { %v4729_v30 = vunpack.i.h.bf16 %v4727_v61  ;;  %v4728_v31 = vunpack.i.l.bf16 %v4727_v61  ;;  %v4722_v41 = vpop.permute.xlu0 %4721  ;;  %v4574_v29 = vunpack.i.h.bf16 %v9088_v49  ;;  %v4573_v2 = vunpack.i.l.bf16 %v9088_v49  ;;  %v9092_v61 = vld [vmem:[#allocation34_spill] sm:$0xff] }
  0xe8   :  { %v4724_v63 = vunpack.i.h.bf16 %v4722_v41  ;;  %v4723_v20 = vunpack.i.l.bf16 %v4722_v41  ;;  %5016 = vrot.lane.b32.xlu1 %v6758_v8, %s5745_s1  ;;  %v9091_v25 = vpack.i.bf16 %v6772_v16, %v6767_v32  ;;  %v4589_v6 = vunpack.i.h.bf16 %v9092_v61  ;;  %v9095_v16 = vld [vmem:[#allocation44_spill] sm:$0xff] }
  0xe9   :  { %v7083_v56 = vsel %vm2712_vm1, %v2698_v4, %v4728_v31  ;;  %v7086_v44 = vsel %vm2712_vm1, %v2699_v1, %v4729_v30  ;;  %v4588_v19 = vunpack.i.l.bf16 %v9092_v61  ;;  %v9094_v31 = vld [vmem:[#allocation37_spill] sm:$0xff]  ;;  %v2702_v32 = vsel %vm2647_vm0, %v9095_v16, %v4578_v36 }
  0xea   :  { %9089 = vst [vmem:[#allocation11_spill] sm:$0xff] %v7083_v56  ;;  %9090 = vst [vmem:[#allocation10_spill] sm:$0xff] %v7086_v44  ;;  %5011 = vrot.lane.b32.xlu0 %v9091_v25, %s5744_s19  ;;  %v7095_v8 = vsel %vm2712_vm1, %v2696_v22, %v4723_v20  ;;  %v7098_v41 = vsel %vm2712_vm1, %v2697_v39, %v4724_v63  ;;  %v4737_v4 = vpop.permute.xlu1 %4736  ;;  %v4584_v38 = vunpack.i.h.bf16 %v9094_v31  ;;  %v4583_v1 = vunpack.i.l.bf16 %v9094_v31  ;;  %v9096_v25 = vld [vmem:[#allocation45_spill] sm:$0xff]  ;;  %v9097_v39 = vld [vmem:[#allocation35_spill] sm:$0xff] }
  0xeb   :  { %9093 = vst [vmem:[#allocation12_spill] sm:$0xff] %v7098_v41  ;;  %v4739_v30 = vunpack.i.h.bf16 %v4737_v4  ;;  %v4738_v49 = vunpack.i.l.bf16 %v4737_v4  ;;  %v4732_v44 = vpop.permute.xlu0 %4731  ;;  %v2703_v61 = vsel %vm2647_vm0, %v9096_v25, %v4579_v52  ;;  %v2700_v63 = vsel %vm2647_vm0, %v9097_v39, %v4573_v2  ;;  %v9098_v20 = vld [vmem:[#allocation36_spill] sm:$0xff]  ;;  %v9100_v52 = vld [vmem:[#allocation50_spill] sm:$0xff]  ;;  %v9104_v16 = vld [vmem:[#allocation41_spill] sm:$0xff] }
  0xec   :  { %v4734_v56 = vunpack.i.h.bf16 %v4732_v44  ;;  %v4733_v22 = vunpack.i.l.bf16 %v4732_v44  ;;  %5026 = vrot.lane.b32.xlu1 %v6817_v23, %s5746_s20  ;;  %v2701_v31 = vsel %vm2647_vm0, %v9098_v20, %v4574_v29  ;;  %v2706_v36 = vsel %vm2647_vm0, %v9100_v52, %v4588_v19  ;;  %v9101_v44 = vld [vmem:[#allocation51_spill] sm:$0xff]  ;;  %v9106_v19 = vld [vmem:[#allocation40_spill] sm:$0xff] }
  0xed   :  { %v7113_v4 = vsel %vm2712_vm1, %v2702_v32, %v4738_v49  ;;  %v7116_v41 = vsel %vm2712_vm1, %v2703_v61, %v4739_v30  ;;  %v2707_v23 = vsel %vm2647_vm0, %v9101_v44, %v4589_v6  ;;  %v2704_v30 = vsel %vm2647_vm0, %v9104_v16, %v4583_v1  ;;  %v9105_v32 = vld [vmem:[#allocation42_spill] sm:$0xff]  ;;  %v9107_v1 = vld [vmem:[#allocation43_spill] sm:$0xff] }
  0xee   :  { %9099 = vst [vmem:[#allocation15_spill] sm:$0xff] %v7116_v41  ;;  %5021 = vrot.lane.b32.xlu0 %v6779_v43, %s5745_s1  ;;  %v7125_v2 = vsel %vm2712_vm1, %v2700_v63, %v4733_v22  ;;  %v7128_v29 = vsel %vm2712_vm1, %v2701_v31, %v4734_v56  ;;  %v4747_v49 = vpop.permute.xlu1 %4746  ;;  %v2705_v25 = vsel %vm2647_vm0, %v9105_v32, %v4584_v38  ;;  %v4599_v20 = vunpack.i.h.bf16 %v9106_v19  ;;  %v4095_v56 = vld [vmem:[%s8937_s0 + $0xa8] sm:$0xff]  ;;  %v4096_v38 = vld [vmem:[%s8937_s0 + $0xb0] sm:$0xff] }
  0xef   :  { %9102 = vst [vmem:[#allocation20_spill] sm:$0xff] %v7125_v2  ;;  %9103 = vst [vmem:[#allocation21_spill] sm:$0xff] %v7128_v29  ;;  %v4749_v43 = vunpack.i.h.bf16 %v4747_v49  ;;  %v4748_v61 = vunpack.i.l.bf16 %v4747_v49  ;;  %v4742_v39 = vpop.permute.xlu0 %4741  ;;  %v4598_v6 = vunpack.i.l.bf16 %v9106_v19  ;;  %v4594_v63 = vunpack.i.h.bf16 %v9107_v1  ;;  %v9109_v41 = vld [vmem:[#allocation52_spill] sm:$0xff] }
  0xf0   :  { %v4744_v52 = vunpack.i.h.bf16 %v4742_v39  ;;  %v4743_v22 = vunpack.i.l.bf16 %v4742_v39  ;;  %5036 = vrot.lane.b32.xlu1 %v6825_v3, %s5743_s12  ;;  %v4593_v31 = vunpack.i.l.bf16 %v9107_v1  ;;  %v5050_v1 = vpack.i.bf16 %v4096_v38, %v4095_v56 }
  0xf1   :  { %v7147_v44 = vsel %vm2712_vm1, %v2706_v36, %v4748_v61  ;;  %v7150_v49 = vsel %vm2712_vm1, %v2707_v23, %v4749_v43  ;;  %v2710_v36 = vsel %vm2647_vm0, %v9109_v41, %v4598_v6  ;;  %v9110_v61 = vld [vmem:[#allocation53_spill] sm:$0xff]  ;;  %v3972_v6 = vld [vmem:[%s8937_s0 + $0xc9] sm:$0xff] }
  0xf2   :  { %9108 = vst [vmem:[#allocation13_spill] sm:$0xff] %v7150_v49  ;;  %5031 = vrot.lane.b32.xlu0 %v6825_v3, %s5746_s20  ;;  %v7155_v16 = vsel %vm2712_vm1, %v2704_v30, %v4743_v22  ;;  %v7158_v32 = vsel %vm2712_vm1, %v2705_v25, %v4744_v52  ;;  %v4757_v39 = vpop.permute.xlu1 %4756  ;;  %v2711_v23 = vsel %vm2647_vm0, %v9110_v61, %v4599_v20  ;;  %v9112_v30 = vld [vmem:[#allocation47_spill] sm:$0xff]  ;;  %v9113_v52 = vld [vmem:[#allocation48_spill] sm:$0xff] }
  0xf3   :  { %v4759_v19 = vunpack.i.h.bf16 %v4757_v39  ;;  %v4758_v29 = vunpack.i.l.bf16 %v4757_v39  ;;  %v4752_v2 = vpop.permute.xlu0 %4751  ;;  %v9111_v3 = vpack.i.bf16 %v6796_v12, %v6791_v0  ;;  %v2708_v25 = vsel %vm2647_vm0, %v9112_v30, %v4593_v31  ;;  %v4098_v30 = vld [vmem:[%s8937_s0 + $0xc8] sm:$0xff] }
  0xf4   :  { %v4754_v43 = vunpack.i.h.bf16 %v4752_v2  ;;  %v4753_v49 = vunpack.i.l.bf16 %v4752_v2  ;;  %v2709_v22 = vsel %vm2647_vm0, %v9113_v52, %v4594_v63  ;;  %v4223_v63 = vld [vmem:[%s8937_s0 + $0xaa] sm:$0xff] }
  0xf5   :  { %5046 = vrot.lane.b32.xlu1 %v9111_v3, %s5744_s19  ;;  %v7173_v56 = vsel %vm2712_vm1, %v2710_v36, %v4758_v29  ;;  %v7176_v41 = vsel %vm2712_vm1, %v2711_v23, %v4759_v19  ;;  %v3971_v29 = vld [vmem:[%s8937_s0 + $0xc1] sm:$0xff] }
  0xf6   :  { %5041 = vrot.lane.b32.xlu0 %v6834_v24, %s5743_s12  ;;  %v7181_v2 = vsel %vm2712_vm1, %v2708_v25, %v4753_v49  ;;  %v7184_v0 = vsel %vm2712_vm1, %v2709_v22, %v4754_v43  ;;  %v7186_v12 = vpop.permute.xlu1 %4766  ;;  %v5075_v49 = vpack.i.bf16 %v3972_v6, %v3971_v29  ;;  %v4035_v19 = vld [vmem:[%s8937_s0 + $0xc2] sm:$0xff]  ;;  %v4163_v29 = vld [vmem:[%s8937_s0 + $0xd9] sm:$0xff] }
  0xf7   :  { %v7188_v20 = vpop.permute.xlu0 %4761  ;;  %v4100_v23 = vld [vmem:[%s8937_s0 + $0xe0] sm:$0xff] }
  0xf8   :  { %v4097_v3 = vld [vmem:[%s8937_s0 + $0xc0] sm:$0xff] }
  0xf9   :  { %5056 = vrot.lane.b32.xlu1 %v6762_v33, %s5745_s1  ;;  %v4224_v33 = vld [vmem:[%s8937_s0 + $0xb2] sm:$0xff]  ;;  %v5090_v22 = vpack.i.bf16 %v4098_v30, %v4097_v3  ;;  %v4164_v6 = vld [vmem:[%s8937_s0 + $0xe1] sm:$0xff] }
  0xfa   :  { %5051 = vrot.lane.b32.xlu0 %v5050_v1, %s5744_s19  ;;  %v7199_v38 = vpop.permute.xlu1 %4776  ;;  %v5070_v39 = vpack.i.bf16 %v4224_v33, %v4223_v63  ;;  %v4036_v1 = vld [vmem:[%s8937_s0 + $0xca] sm:$0xff]  ;;  %v4227_v3 = vld [vmem:[%s8937_s0 + $0xda] sm:$0xff]  ;;  %v4228_v30 = vld [vmem:[%s8937_s0 + $0xe2] sm:$0xff] }
  0xfb   :  { %v7207_v31 = vpop.permute.xlu0 %4771 }
  0xfd   :  { %5066 = vrot.lane.b32.xlu1 %v6834_v24, %s5746_s20  ;;  %v5085_v24 = vpack.i.bf16 %v4036_v1, %v4035_v19 }
  0xfe   :  { %5061 = vrot.lane.b32.xlu0 %v6783_v21, %s5745_s1  ;;  %v7219_v36 = vpop.permute.xlu1 %4786  ;;  %v4099_v21 = vld [vmem:[%s8937_s0 + $0xd8] sm:$0xff] }
  0xff   :  { %v7221_v61 = vpop.permute.xlu0 %4781  ;;  %v5095_v52 = vpack.i.bf16 %v4100_v23, %v4099_v21  ;;  %v5105_v21 = vpack.i.bf16 %v4164_v6, %v4163_v29 }
 0x101   :  { %5076 = vrot.lane.b32.xlu1 %v5075_v49, %s5741_s8 }
 0x102   :  { %5071 = vrot.lane.b32.xlu0 %v5070_v39, %s5746_s20  ;;  %v7231_v43 = vpop.permute.xlu1 %4796 }
 0x103   :  { %9114 = vst [vmem:[#allocation14_spill] sm:$0xff] %v7231_v43  ;;  %v7239_v25 = vpop.permute.xlu0 %4791 }
 0x104   :  { %9115 = vst [vmem:[#allocation26_spill] sm:$0xff] %v7239_v25 }
 0x105   :  { %5086 = vrot.lane.b32.xlu1 %v5085_v24, %s5743_s12 }
 0x106   :  { %5081 = vrot.lane.b32.xlu0 %v5070_v39, %s5743_s12  ;;  %v4807_v63 = vpop.permute.xlu1 %4806 }
 0x107   :  { %v4809_v33 = vunpack.i.h.bf16 %v4807_v63  ;;  %v4808_v19 = vunpack.i.l.bf16 %v4807_v63  ;;  %v4802_v1 = vpop.permute.xlu0 %4801 }
 0x108   :  { %v4804_v25 = vunpack.i.h.bf16 %v4802_v1  ;;  %v4803_v43 = vunpack.i.l.bf16 %v4802_v1 }
 0x109   :  { %5096 = vrot.lane.b32.xlu1 %v5095_v52, %s5744_s19  ;;  %v7252_v39 = vsel %vm2777_vm4, %v6856_v34, %v4808_v19  ;;  %v7256_v23 = vsel %vm2777_vm4, %v6859_v54, %v4809_v33  ;;  %v5115_v19 = vpack.i.bf16 %v4228_v30, %v4227_v3 }
 0x10a   :  { %5091 = vrot.lane.b32.xlu0 %v5090_v22, %s5744_s19  ;;  %v7267_v52 = vsel %vm2777_vm4, %v6867_v7, %v4803_v43  ;;  %v7271_v34 = vsel %vm2777_vm4, %v6870_v37, %v4804_v25  ;;  %v4817_v54 = vpop.permute.xlu1 %4816  ;;  %v3975_v37 = vld [vmem:[%s8937_s0 + $0xf1] sm:$0xff]  ;;  %v3976_v43 = vld [vmem:[%s8937_s0 + $0xf9] sm:$0xff] }
 0x10b   :  { %v4819_v29 = vunpack.i.h.bf16 %v4817_v54  ;;  %v4818_v6 = vunpack.i.l.bf16 %v4817_v54  ;;  %v4812_v22 = vpop.permute.xlu0 %4811 }
 0x10c   :  { %v4814_v63 = vunpack.i.h.bf16 %v4812_v22  ;;  %v4813_v33 = vunpack.i.l.bf16 %v4812_v22 }
 0x10d   :  { %5106 = vrot.lane.b32.xlu1 %v5105_v21, %s5745_s1  ;;  %v7276_v1 = vsel %vm2777_vm4, %v6880_v15, %v4818_v6  ;;  %v7280_v7 = vsel %vm2777_vm4, %v6883_v9, %v4819_v29  ;;  %v7298_v6 = vpack.i.bf16 %v3976_v43, %v3975_v37 }
 0x10e   :  { %5101 = vrot.lane.b32.xlu0 %v5075_v49, %s5745_s1  ;;  %v7291_v25 = vsel %vm2777_vm4, %v6890_v59, %v4813_v33  ;;  %v7295_v15 = vsel %vm2777_vm4, %v6893_v35, %v4814_v63  ;;  %v4827_v9 = vpop.permute.xlu1 %4826  ;;  %v4039_v35 = vld [vmem:[%s8937_s0 + $0xf2] sm:$0xff]  ;;  %v4040_v63 = vld [vmem:[%s8937_s0 + $0xfa] sm:$0xff] }
 0x10f   :  { %v4829_v3 = vunpack.i.h.bf16 %v4827_v9  ;;  %v4828_v30 = vunpack.i.l.bf16 %v4827_v9  ;;  %v4822_v49 = vpop.permute.xlu0 %4821 }
 0x110   :  { %v4824_v54 = vunpack.i.h.bf16 %v4822_v49  ;;  %v4823_v29 = vunpack.i.l.bf16 %v4822_v49 }
 0x111   :  { %5116 = vrot.lane.b32.xlu1 %v5115_v19, %s5746_s20  ;;  %v7302_v22 = vsel %vm2777_vm4, %v6908_v14, %v4828_v30  ;;  %v7306_v59 = vsel %vm2777_vm4, %v6911_v57, %v4829_v3  ;;  %v7325_v30 = vpack.i.bf16 %v4040_v63, %v4039_v35  ;;  %v4102_v35 = vld [vmem:[%s8937_s0 + $0xf8] sm:$0xff] }
 0x112   :  { %5111 = vrot.lane.b32.xlu0 %v5085_v24, %s5746_s20  ;;  %v7317_v33 = vsel %vm2777_vm4, %v6918_v42, %v4823_v29  ;;  %v7321_v14 = vsel %vm2777_vm4, %v6921_v5, %v4824_v54  ;;  %v4837_v57 = vpop.permute.xlu1 %4836  ;;  %v4103_v5 = vld [vmem:[%s8937_s0 + $0x108] sm:$0xff]  ;;  %v4104_v54 = vld [vmem:[%s8937_s0 + $0x110] sm:$0xff] }
 0x113   :  { %v4839_v37 = vunpack.i.h.bf16 %v4837_v57  ;;  %v4838_v43 = vunpack.i.l.bf16 %v4837_v57  ;;  %v4832_v24 = vpop.permute.xlu0 %4831 }
 0x114   :  { %v4834_v9 = vunpack.i.h.bf16 %v4832_v24  ;;  %v4833_v3 = vunpack.i.l.bf16 %v4832_v24 }
 0x115   :  { %5126 = vrot.lane.b32.xlu1 %v7298_v6, %s5741_s8  ;;  %v7329_v49 = vsel %vm2777_vm4, %v6943_v50, %v4838_v43  ;;  %v7333_v42 = vsel %vm2777_vm4, %v6946_v53, %v4839_v37 }
 0x116   :  { %9116 = vst [vmem:[#allocation27_spill] sm:$0xff] %v7333_v42  ;;  %5121 = vrot.lane.b32.xlu0 %v5105_v21, %s5741_s8  ;;  %v7344_v29 = vsel %vm2777_vm4, %v6955_v10, %v4833_v3  ;;  %v7348_v50 = vsel %vm2777_vm4, %v6958_v55, %v4834_v9  ;;  %v4847_v53 = vpop.permute.xlu1 %4846  ;;  %v4101_v21 = vld [vmem:[%s8937_s0 + $0xf0] sm:$0xff]  ;;  %v5145_v10 = vpack.i.bf16 %v4104_v54, %v4103_v5 }
 0x117   :  { %9117 = vst [vmem:[#allocation17_spill] sm:$0xff] %v7344_v29  ;;  %9118 = vst [vmem:[#allocation18_spill] sm:$0xff] %v7348_v50  ;;  %v4849_v63 = vunpack.i.h.bf16 %v4847_v53  ;;  %v4848_v57 = vunpack.i.l.bf16 %v4847_v53  ;;  %v4842_v37 = vpop.permute.xlu0 %4841  ;;  %v5140_v3 = vpack.i.bf16 %v4102_v35, %v4101_v21  ;;  %v4167_v53 = vld [vmem:[%s8937_s0 + $0x109] sm:$0xff] }
 0x118   :  { %v4844_v43 = vunpack.i.h.bf16 %v4842_v37  ;;  %v4843_v24 = vunpack.i.l.bf16 %v4842_v37  ;;  %v4168_v37 = vld [vmem:[%s8937_s0 + $0x111] sm:$0xff] }
 0x119   :  { %5136 = vrot.lane.b32.xlu1 %v7325_v30, %s5743_s12  ;;  %v7360_v55 = vsel %vm2777_vm4, %v6969_v47, %v4848_v57  ;;  %v7364_v9 = vsel %vm2777_vm4, %v6972_v48, %v4849_v63  ;;  %v5155_v57 = vpack.i.bf16 %v4168_v37, %v4167_v53 }
 0x11a   :  { %9119 = vst [vmem:[#allocation16_spill] sm:$0xff] %v7360_v55  ;;  %9120 = vst [vmem:[#allocation19_spill] sm:$0xff] %v7364_v9  ;;  %5131 = vrot.lane.b32.xlu0 %v5115_v19, %s5743_s12  ;;  %v7375_v5 = vsel %vm2777_vm4, %v6979_v40, %v4843_v24  ;;  %v7379_v47 = vsel %vm2777_vm4, %v6982_v60, %v4844_v43  ;;  %v4857_v48 = vpop.permute.xlu1 %4856  ;;  %v4231_v60 = vld [vmem:[%s8937_s0 + $0x10a] sm:$0xff]  ;;  %v4232_v43 = vld [vmem:[%s8937_s0 + $0x112] sm:$0xff] }
 0x11b   :  { %9121 = vst [vmem:[#allocation22_spill] sm:$0xff] %v7375_v5  ;;  %9122 = vst [vmem:[#allocation25_spill] sm:$0xff] %v7379_v47  ;;  %v4859_v54 = vunpack.i.h.bf16 %v4857_v48  ;;  %v4858_v19 = vunpack.i.l.bf16 %v4857_v48  ;;  %v4852_v21 = vpop.permute.xlu0 %4851 }
 0x11c   :  { %v4854_v35 = vunpack.i.h.bf16 %v4852_v21  ;;  %v4853_v63 = vunpack.i.l.bf16 %v4852_v21  ;;  %v3980_v21 = vld [vmem:[%s8937_s0 + $0x129] sm:$0xff] }
 0x11d   :  { %5146 = vrot.lane.b32.xlu1 %v5145_v10, %s5744_s19  ;;  %v7384_v9 = vsel %vm2777_vm4, %v6997_v13, %v4858_v19  ;;  %v7388_v40 = vsel %vm2777_vm4, %v7000_v18, %v4859_v54  ;;  %v5165_v54 = vpack.i.bf16 %v4232_v43, %v4231_v60 }
 0x11e   :  { %9123 = vst [vmem:[#allocation32_spill] sm:$0xff] %v7384_v9  ;;  %9124 = vst [vmem:[#allocation33_spill] sm:$0xff] %v7388_v40  ;;  %5141 = vrot.lane.b32.xlu0 %v5140_v3, %s5744_s19  ;;  %v7399_v24 = vsel %vm2777_vm4, %v7009_v27, %v4853_v63  ;;  %v7403_v13 = vsel %vm2777_vm4, %v7012_v28, %v4854_v35  ;;  %v4867_v18 = vpop.permute.xlu1 %4866  ;;  %v3979_v28 = vld [vmem:[%s8937_s0 + $0x121] sm:$0xff] }
 0x11f   :  { %9125 = vst [vmem:[#allocation23_spill] sm:$0xff] %v7399_v24  ;;  %9126 = vst [vmem:[#allocation24_spill] sm:$0xff] %v7403_v13  ;;  %v4869_v10 = vunpack.i.h.bf16 %v4867_v18  ;;  %v4868_v53 = vunpack.i.l.bf16 %v4867_v18  ;;  %v4862_v3 = vpop.permute.xlu0 %4861 }
 0x120   :  { %v4864_v37 = vunpack.i.h.bf16 %v4862_v3  ;;  %v4863_v48 = vunpack.i.l.bf16 %v4862_v3  ;;  %v4044_v3 = vld [vmem:[%s8937_s0 + $0x12a] sm:$0xff] }
 0x121   :  { %5156 = vrot.lane.b32.xlu1 %v5155_v57, %s5745_s1  ;;  %v7408_v19 = vsel %vm2777_vm4, %v7025_v62, %v4868_v53  ;;  %v7412_v27 = vsel %vm2777_vm4, %v7028_v45, %v4869_v10  ;;  %v7431_v10 = vpack.i.bf16 %v3980_v21, %v3979_v28 }
 0x122   :  { %9127 = vst [vmem:[#allocation38_spill] sm:$0xff] %v7408_v19  ;;  %9128 = vst [vmem:[#allocation39_spill] sm:$0xff] %v7412_v27  ;;  %5151 = vrot.lane.b32.xlu0 %v7298_v6, %s5745_s1  ;;  %v7424_v35 = vsel %vm2777_vm4, %v7035_v17, %v4863_v48  ;;  %v7428_v62 = vsel %vm2777_vm4, %v7038_v26, %v4864_v37  ;;  %v4877_v45 = vpop.permute.xlu1 %4876  ;;  %v4043_v26 = vld [vmem:[%s8937_s0 + $0x122] sm:$0xff] }
 0x123   :  { %9129 = vst [vmem:[#allocation29_spill] sm:$0xff] %v7424_v35  ;;  %9130 = vst [vmem:[#allocation30_spill] sm:$0xff] %v7428_v62  ;;  %v4879_v63 = vunpack.i.h.bf16 %v4877_v45  ;;  %v4878_v60 = vunpack.i.l.bf16 %v4877_v45  ;;  %v4872_v6 = vpop.permute.xlu0 %4871  ;;  %v9164_v35 = vld [vmem:[#allocation46_spill] sm:$0xff]  ;;  %v4175_v19 = vld [vmem:[%s8937_s0 + $0x169] sm:$0xff] }
 0x124   :  { %v4874_v43 = vunpack.i.h.bf16 %v4872_v6  ;;  %v4873_v18 = vunpack.i.l.bf16 %v4872_v6  ;;  %v4608_v27 = vunpack.i.l.bf16 %v9164_v35 }
 0x125   :  { %5166 = vrot.lane.b32.xlu1 %v5165_v54, %s5746_s20  ;;  %v7435_v53 = vsel %vm2777_vm4, %v7055_v11, %v4878_v60  ;;  %v7439_v17 = vsel %vm2777_vm4, %v7058_v58, %v4879_v63  ;;  %v5185_v63 = vpack.i.bf16 %v4044_v3, %v4043_v26  ;;  %v9135_v60 = vld [vmem:[#allocation11_spill] sm:$0xff]  ;;  %v9140_v3 = vld [vmem:[#allocation12_spill] sm:$0xff] }
 0x126   :  { %9131 = vst [vmem:[#allocation28_spill] sm:$0xff] %v7435_v53  ;;  %9132 = vst [vmem:[#allocation31_spill] sm:$0xff] %v7439_v17  ;;  %5161 = vrot.lane.b32.xlu0 %v7325_v30, %s5746_s20  ;;  %v7451_v37 = vsel %vm2777_vm4, %v7067_v46, %v4873_v18  ;;  %v7455_v11 = vsel %vm2777_vm4, %v7070_v51, %v4874_v43  ;;  %v4887_v58 = vpop.permute.xlu1 %4886  ;;  %v9137_v46 = vld [vmem:[#allocation10_spill] sm:$0xff]  ;;  %v4107_v51 = vld [vmem:[%s8937_s0 + $0x138] sm:$0xff] }
 0x127   :  { %9133 = vst [vmem:[#allocation34_spill] sm:$0xff] %v7451_v37  ;;  %9134 = vst [vmem:[#allocation37_spill] sm:$0xff] %v7455_v11  ;;  %v4889_v48 = vunpack.i.h.bf16 %v4887_v58  ;;  %v4888_v28 = vunpack.i.l.bf16 %v4887_v58  ;;  %v4882_v30 = vpop.permute.xlu0 %4881  ;;  %v4108_v43 = vld [vmem:[%s8937_s0 + $0x140] sm:$0xff]  ;;  %v9150_v11 = vld [vmem:[#allocation13_spill] sm:$0xff] }
 0x128   :  { %v4884_v21 = vunpack.i.h.bf16 %v4882_v30  ;;  %v4883_v45 = vunpack.i.l.bf16 %v4882_v30  ;;  %v9163_v37 = vld [vmem:[#allocation7_spill] sm:$0xff] }
 0x129   :  { %5176 = vrot.lane.b32.xlu1 %v7431_v10, %s5741_s8  ;;  %v7461_v6 = vsel %vm2777_vm4, %v9135_v60, %v4888_v28  ;;  %v7465_v18 = vsel %vm2777_vm4, %v9137_v46, %v4889_v48  ;;  %v4106_v28 = vld [vmem:[%s8937_s0 + $0x128] sm:$0xff]  ;;  %v4463_v17 = vunpack.i.l.bf16 %v9163_v37  ;;  %v4464_v62 = vunpack.i.h.bf16 %v9163_v37  ;;  %v9165_v37 = vld [vmem:[#allocation49_spill] sm:$0xff] }
 0x12a   :  { %9136 = vst [vmem:[#allocation44_spill] sm:$0xff] %v7461_v6  ;;  %9138 = vst [vmem:[#allocation45_spill] sm:$0xff] %v7465_v18  ;;  %5171 = vrot.lane.b32.xlu0 %v5155_v57, %s5741_s8  ;;  %v7476_v26 = vsel %vm2777_vm4, %v7095_v8, %v4883_v45  ;;  %v7480_v58 = vsel %vm2777_vm4, %v9140_v3, %v4884_v21  ;;  %v4897_v48 = vpop.permute.xlu1 %4896  ;;  %v4105_v57 = vld [vmem:[%s8937_s0 + $0x120] sm:$0xff]  ;;  %v5195_v8 = vpack.i.bf16 %v4108_v43, %v4107_v51  ;;  %v9143_v45 = vld [vmem:[#allocation15_spill] sm:$0xff] }
 0x12b   :  { %9139 = vst [vmem:[#allocation35_spill] sm:$0xff] %v7476_v26  ;;  %9141 = vst [vmem:[#allocation36_spill] sm:$0xff] %v7480_v58  ;;  %v4899_v30 = vunpack.i.h.bf16 %v4897_v48  ;;  %v4898_v60 = vunpack.i.l.bf16 %v4897_v48  ;;  %v4892_v46 = vpop.permute.xlu0 %4891  ;;  %v5190_v58 = vpack.i.bf16 %v4106_v28, %v4105_v57  ;;  %v4171_v48 = vld [vmem:[%s8937_s0 + $0x139] sm:$0xff]  ;;  %v9145_v51 = vld [vmem:[#allocation20_spill] sm:$0xff]  ;;  %v4603_v24 = vunpack.i.l.bf16 %v9165_v37 }
 0x12c   :  { %v4894_v18 = vunpack.i.h.bf16 %v4892_v46  ;;  %v4893_v6 = vunpack.i.l.bf16 %v4892_v46  ;;  %v4172_v46 = vld [vmem:[%s8937_s0 + $0x141] sm:$0xff] }
 0x12d   :  { %5186 = vrot.lane.b32.xlu1 %v5185_v63, %s5743_s12  ;;  %v7491_v21 = vsel %vm2777_vm4, %v7113_v4, %v4898_v60  ;;  %v7495_v3 = vsel %vm2777_vm4, %v9143_v45, %v4899_v30  ;;  %v9147_v4 = vld [vmem:[#allocation21_spill] sm:$0xff] }
 0x12e   :  { %9142 = vst [vmem:[#allocation50_spill] sm:$0xff] %v7491_v21  ;;  %9144 = vst [vmem:[#allocation51_spill] sm:$0xff] %v7495_v3  ;;  %5181 = vrot.lane.b32.xlu0 %v5165_v54, %s5743_s12  ;;  %v7506_v43 = vsel %vm2777_vm4, %v9145_v51, %v4893_v6  ;;  %v7510_v60 = vsel %vm2777_vm4, %v9147_v4, %v4894_v18  ;;  %v4907_v30 = vpop.permute.xlu1 %4906  ;;  %v5205_v21 = vpack.i.bf16 %v4172_v46, %v4171_v48  ;;  %v4235_v18 = vld [vmem:[%s8937_s0 + $0x13a] sm:$0xff]  ;;  %v4236_v51 = vld [vmem:[%s8937_s0 + $0x142] sm:$0xff] }
 0x12f   :  { %9146 = vst [vmem:[#allocation41_spill] sm:$0xff] %v7506_v43  ;;  %9148 = vst [vmem:[#allocation42_spill] sm:$0xff] %v7510_v60  ;;  %v4909_v45 = vunpack.i.h.bf16 %v4907_v30  ;;  %v4908_v54 = vunpack.i.l.bf16 %v4907_v30  ;;  %v4902_v57 = vpop.permute.xlu0 %4901 }
 0x130   :  { %v4904_v28 = vunpack.i.h.bf16 %v4902_v57  ;;  %v4903_v3 = vunpack.i.l.bf16 %v4902_v57 }
 0x131   :  { %5196 = vrot.lane.b32.xlu1 %v5195_v8, %s5744_s19  ;;  %v7515_v26 = vsel %vm2777_vm4, %v7147_v44, %v4908_v54  ;;  %v7519_v6 = vsel %vm2777_vm4, %v9150_v11, %v4909_v45  ;;  %v5215_v45 = vpack.i.bf16 %v4236_v51, %v4235_v18  ;;  %v4047_v18 = vld [vmem:[%s8937_s0 + $0x152] sm:$0xff] }
 0x132   :  { %9149 = vst [vmem:[#allocation40_spill] sm:$0xff] %v7515_v26  ;;  %9151 = vst [vmem:[#allocation43_spill] sm:$0xff] %v7519_v6  ;;  %5191 = vrot.lane.b32.xlu0 %v5190_v58, %s5744_s19  ;;  %v7530_v8 = vsel %vm2777_vm4, %v7155_v16, %v4903_v3  ;;  %v7534_v44 = vsel %vm2777_vm4, %v7158_v32, %v4904_v28  ;;  %v4917_v11 = vpop.permute.xlu1 %4916  ;;  %v3983_v32 = vld [vmem:[%s8937_s0 + $0x151] sm:$0xff]  ;;  %v3984_v3 = vld [vmem:[%s8937_s0 + $0x159] sm:$0xff] }
 0x133   :  { %9152 = vst [vmem:[#allocation52_spill] sm:$0xff] %v7530_v8  ;;  %9153 = vst [vmem:[#allocation53_spill] sm:$0xff] %v7534_v44  ;;  %v4919_v48 = vunpack.i.h.bf16 %v4917_v11  ;;  %v4918_v46 = vunpack.i.l.bf16 %v4917_v11  ;;  %v4912_v58 = vpop.permute.xlu0 %4911  ;;  %v9162_v26 = vld [vmem:[#allocation6_spill] sm:$0xff] }
 0x134   :  { %v4914_v4 = vunpack.i.h.bf16 %v4912_v58  ;;  %v4913_v30 = vunpack.i.l.bf16 %v4912_v58  ;;  %v4111_v58 = vld [vmem:[%s8937_s0 + $0x168] sm:$0xff]  ;;  %v4469_v60 = vunpack.i.h.bf16 %v9162_v26  ;;  %v4468_v43 = vunpack.i.l.bf16 %v9162_v26  ;;  %v4176_v26 = vld [vmem:[%s8937_s0 + $0x171] sm:$0xff] }
 0x135   :  { %5206 = vrot.lane.b32.xlu1 %v5205_v21, %s5745_s1  ;;  %v7539_v54 = vsel %vm2777_vm4, %v7173_v56, %v4918_v46  ;;  %v7543_v16 = vsel %vm2777_vm4, %v7176_v41, %v4919_v48 }
 0x136   :  { %9154 = vst [vmem:[#allocation47_spill] sm:$0xff] %v7539_v54  ;;  %9155 = vst [vmem:[#allocation48_spill] sm:$0xff] %v7543_v16  ;;  %5201 = vrot.lane.b32.xlu0 %v7431_v10, %s5745_s1  ;;  %v7555_v57 = vsel %vm2777_vm4, %v7181_v2, %v4913_v30  ;;  %v7559_v56 = vsel %vm2777_vm4, %v7184_v0, %v4914_v4  ;;  %v7561_v41 = vpop.permute.xlu1 %4926  ;;  %v7566_v10 = vpack.i.bf16 %v3984_v3, %v3983_v32  ;;  %v4048_v2 = vld [vmem:[%s8937_s0 + $0x15a] sm:$0xff]  ;;  %v4112_v4 = vld [vmem:[%s8937_s0 + $0x170] sm:$0xff] }
 0x137   :  { %9156 = vst [vmem:[#allocation11_spill] sm:$0xff] %v7555_v57  ;;  %9157 = vst [vmem:[#allocation10_spill] sm:$0xff] %v7559_v56  ;;  %v7563_v28 = vpop.permute.xlu0 %4921  ;;  %v9158_v0 = vld [vmem:[#allocation2_spill] sm:$0xff]  ;;  %v5723_v30 = vld [vmem:[%s8937_s0 + $0x30] sm:$0xff]  ;;  %v5245_v53 = vpack.i.bf16 %v4112_v4, %v4111_v58  ;;  %v4604_v4 = vunpack.i.h.bf16 %v9165_v37 }
 0x138   :  { %v4454_v51 = vunpack.i.h.bf16 %v9158_v0  ;;  %v4453_v11 = vunpack.i.l.bf16 %v9158_v0  ;;  %v5724_v3 = vld [vmem:[%s8937_s0 + $0x38] sm:$0xff]  ;;  %v4109_v57 = vld [vmem:[%s8937_s0 + $0x150] sm:$0xff]  ;;  %v4923_v40 = vunpack.i.l.bf16 %v7563_v28 }
 0x139   :  { %5216 = vrot.lane.b32.xlu1 %v5215_v45, %s5746_s20  ;;  %v9161_v54 = vld [vmem:[#allocation5_spill] sm:$0xff] }
 0x13a   :  { %5211 = vrot.lane.b32.xlu0 %v5185_v63, %s5746_s20  ;;  %v7577_v48 = vpop.permute.xlu1 %4936  ;;  %v7583_v63 = vpack.i.bf16 %v4048_v2, %v4047_v18  ;;  %v7596_v32 = vsel %vm2647_vm0, %v5723_v30, %v4453_v11  ;;  %v9159_v18 = vld [vmem:[#allocation3_spill] sm:$0xff]  ;;  %v4110_v11 = vld [vmem:[%s8937_s0 + $0x158] sm:$0xff]  ;;  %v21_v30 = vld [vmem:[%s8937_s0] sm:$0xff]  ;;  %v4449_v44 = vunpack.i.h.bf16 %v9161_v54  ;;  %v4448_v8 = vunpack.i.l.bf16 %v9161_v54 }
 0x13b   :  { %v7579_v46 = vpop.permute.xlu0 %4931  ;;  %v4444_v2 = vunpack.i.h.bf16 %v9159_v18  ;;  %v4443_v0 = vunpack.i.l.bf16 %v9159_v18  ;;  %v5240_v54 = vpack.i.bf16 %v4110_v11, %v4109_v57  ;;  %v5726_v11 = vld [vmem:[%s8937_s0 + $0x50] sm:$0xff] }
 0x13d   :  { %5226 = vrot.lane.b32.xlu1 %v7566_v10, %s5741_s8  ;;  %v2648_v13 = vsel %vm2647_vm0, %v21_v30, %v4443_v0 }
 0x13e   :  { %5221 = vrot.lane.b32.xlu0 %v5205_v21, %s5741_s8  ;;  %v7602_v21 = vsel %vm2647_vm0, %v5724_v3, %v4454_v51  ;;  %v7606_v56 = vpop.permute.xlu1 %4946  ;;  %v22_v51 = vld [vmem:[%s8937_s0 + $0x8] sm:$0xff]  ;;  %v9160_v3 = vld [vmem:[#allocation4_spill] sm:$0xff] }
 0x13f   :  { %v4459_v18 = vunpack.i.h.bf16 %v9160_v3  ;;  %v4458_v16 = vunpack.i.l.bf16 %v9160_v3  ;;  %v7624_v6 = vpop.permute.xlu0 %4941  ;;  %v4609_v3 = vunpack.i.h.bf16 %v9164_v35  ;;  %v2649_v58 = vsel %vm2647_vm0, %v22_v51, %v4444_v2  ;;  %v5727_v2 = vld [vmem:[%s8937_s0 + $0x18] sm:$0xff]  ;;  %v5728_v51 = vld [vmem:[%s8937_s0 + $0x20] sm:$0xff] }
 0x140   :  { %v2650_v30 = vsel %vm2647_vm0, %v5727_v2, %v4448_v8 }
 0x141   :  { %5236 = vrot.lane.b32.xlu1 %v7583_v63, %s5743_s12  ;;  %v7657_v0 = vsel %vm2647_vm0, %v5726_v11, %v4459_v18  ;;  %v5730_v11 = vld [vmem:[%s8937_s0 + $0x80] sm:$0xff] }
 0x142   :  { %5231 = vrot.lane.b32.xlu0 %v5215_v45, %s5743_s12  ;;  %v7645_v35 = vpop.permute.xlu1 %4956  ;;  %v5725_v45 = vld [vmem:[%s8937_s0 + $0x48] sm:$0xff]  ;;  %v7679_v8 = vsel %vm2647_vm0, %v5730_v11, %v4469_v60  ;;  %v2715_v60 = vsel %vm2712_vm1, %v2650_v30, %v4608_v27  ;;  %v4924_v27 = vunpack.i.h.bf16 %v7563_v28 }
 0x143   :  { %v7651_v57 = vsel %vm2647_vm0, %v5725_v45, %v4458_v16  ;;  %v2651_v16 = vsel %vm2647_vm0, %v5728_v51, %v4449_v44  ;;  %v7667_v37 = vpop.permute.xlu0 %4951  ;;  %v5729_v45 = vld [vmem:[%s8937_s0 + $0x78] sm:$0xff]  ;;  %v5731_v44 = vld [vmem:[%s8937_s0 + $0x60] sm:$0xff]  ;;  %v7688_v51 = vpack.i.bf16 %v4176_v26, %v4175_v19  ;;  %v3988_v30 = vld [vmem:[%s8937_s0 + $0x189] sm:$0xff]  ;;  %v4959_v47 = vunpack.i.h.bf16 %v7645_v35 }
 0x144   :  { %v7673_v18 = vsel %vm2647_vm0, %v5729_v45, %v4468_v43  ;;  %v7685_v2 = vsel %vm2647_vm0, %v5731_v44, %v4463_v17  ;;  %v5732_v43 = vld [vmem:[%s8937_s0 + $0x68] sm:$0xff]  ;;  %v2716_v11 = vsel %vm2712_vm1, %v2651_v16, %v4609_v3  ;;  %v4240_v19 = vld [vmem:[%s8937_s0 + $0x172] sm:$0xff]  ;;  %v2713_v17 = vsel %vm2712_vm1, %v2648_v13, %v4603_v24  ;;  %v9166_v26 = vld [vmem:[#allocation54_spill] sm:$0xff] }
 0x145   :  { %5246 = vrot.lane.b32.xlu1 %v5245_v53, %s5744_s19  ;;  %v7694_v45 = vsel %vm2647_vm0, %v5732_v43, %v4464_v62  ;;  %v4239_v53 = vld [vmem:[%s8937_s0 + $0x16a] sm:$0xff]  ;;  %v2714_v62 = vsel %vm2712_vm1, %v2649_v58, %v4604_v4  ;;  %v4769_v16 = vunpack.i.h.bf16 %v7186_v12  ;;  %v4768_v43 = vunpack.i.l.bf16 %v7186_v12  ;;  %v4051_v13 = vld [vmem:[%s8937_s0 + $0x182] sm:$0xff] }
 0x146   :  { %5241 = vrot.lane.b32.xlu0 %v5240_v54, %s5744_s19  ;;  %v4967_v3 = vpop.permute.xlu1 %4966  ;;  %v3987_v54 = vld [vmem:[%s8937_s0 + $0x181] sm:$0xff]  ;;  %v4052_v58 = vld [vmem:[%s8937_s0 + $0x18a] sm:$0xff]  ;;  %v4764_v4 = vunpack.i.h.bf16 %v7188_v20  ;;  %v4763_v44 = vunpack.i.l.bf16 %v7188_v20  ;;  %v7729_v12 = vpack.i.bf16 %v4240_v19, %v4239_v53  ;;  %v4958_v20 = vunpack.i.l.bf16 %v7645_v35 }
 0x147   :  { %v7717_v24 = vpop.permute.xlu0 %4961  ;;  %v7735_v9 = vpack.i.bf16 %v3988_v30, %v3987_v54  ;;  %v7739_v55 = vpack.i.bf16 %v4052_v58, %v4051_v13  ;;  %v2780_v53 = vsel %vm2777_vm4, %v2715_v60, %v4768_v43  ;;  %v2781_v19 = vsel %vm2777_vm4, %v2716_v11, %v4769_v16 }
 0x148   :  { %v4969_v50 = vunpack.i.h.bf16 %v4967_v3  ;;  %v4968_v28 = vunpack.i.l.bf16 %v4967_v3  ;;  %v2779_v54 = vsel %vm2777_vm4, %v2714_v62, %v4764_v4  ;;  %v4929_v35 = vunpack.i.h.bf16 %v7561_v41 }
 0x149   :  { %5256 = vrot.lane.b32.xlu1 %v7688_v51, %s5745_s1  ;;  %v4928_v13 = vunpack.i.l.bf16 %v7561_v41  ;;  %v2844_v11 = vsel %vm2842_vm5, %v2779_v54, %v4924_v27 }
 0x14a   :  { %5251 = vrot.lane.b32.xlu0 %v7566_v10, %s5745_s1  ;;  %v4977_v5 = vpop.permute.xlu1 %4976  ;;  %v2778_v10 = vsel %vm2777_vm4, %v2713_v17, %v4763_v44  ;;  %v2909_v62 = vsel %vm2907_vm6, %v2844_v11, %v4959_v47  ;;  %v4963_v44 = vunpack.i.l.bf16 %v7717_v24 }
 0x14b   :  { %v4972_v29 = vpop.permute.xlu0 %4971  ;;  %v4979_v30 = vunpack.i.h.bf16 %v4977_v5  ;;  %v4978_v42 = vunpack.i.l.bf16 %v4977_v5  ;;  %v2843_v60 = vsel %vm2842_vm5, %v2778_v10, %v4923_v40  ;;  %v4964_v5 = vunpack.i.h.bf16 %v7717_v24  ;;  %v4115_v24 = vld [vmem:[%s8937_s0 + $0x198] sm:$0xff] }
 0x14c   :  { %v2908_v17 = vsel %vm2907_vm6, %v2843_v60, %v4958_v20  ;;  %v2974_v40 = vsel %vm2972_vm7, %v2909_v62, %v4969_v50  ;;  %v4974_v27 = vunpack.i.h.bf16 %v4972_v29  ;;  %v4973_v4 = vunpack.i.l.bf16 %v4972_v29  ;;  %v4116_v20 = vld [vmem:[%s8937_s0 + $0x1a0] sm:$0xff] }
 0x14d   :  { %5266 = vrot.lane.b32.xlu1 %v7729_v12, %s5746_s20  ;;  %v2973_v41 = vsel %vm2972_vm7, %v2908_v17, %v4968_v28  ;;  %v3039_v47 = vsel %vm3037_vm8, %v2974_v40, %v4979_v30  ;;  %v2845_v30 = vsel %vm2842_vm5, %v2780_v53, %v4928_v13  ;;  %v2846_v60 = vsel %vm2842_vm5, %v2781_v19, %v4929_v35  ;;  %v4113_v62 = vld [vmem:[%s8937_s0 + $0x180] sm:$0xff]  ;;  %v9168_v40 = vld [vmem:[#allocation8_spill] sm:$0xff] }
 0x14e   :  { %5261 = vrot.lane.b32.xlu0 %v7583_v63, %s5746_s20  ;;  %v4987_v3 = vpop.permute.xlu1 %4986  ;;  %v3038_v63 = vsel %vm3037_vm8, %v2973_v41, %v4978_v42  ;;  %v9167_v42 = vld [vmem:[#allocation55_spill] sm:$0xff]  ;;  %v5295_v13 = vpack.i.bf16 %v4116_v20, %v4115_v24  ;;  %v9169_v24 = vunpack.i.l.bf16 %v9166_v26 }
 0x14f   :  { %v4989_v16 = vunpack.i.h.bf16 %v4987_v3  ;;  %v4988_v43 = vunpack.i.l.bf16 %v4987_v3  ;;  %v4982_v58 = vpop.permute.xlu0 %4981  ;;  %v4614_v54 = vunpack.i.h.bf16 %v9167_v42  ;;  %v4613_v3 = vunpack.i.l.bf16 %v9167_v42  ;;  %v4243_v42 = vld [vmem:[%s8937_s0 + $0x19a] sm:$0xff] }
 0x150   :  { %v4984_v28 = vunpack.i.h.bf16 %v4982_v58  ;;  %v4983_v10 = vunpack.i.l.bf16 %v4982_v58  ;;  %v2719_v20 = vsel %vm2712_vm1, %v7651_v57, %v9169_v24  ;;  %v3991_v57 = vld [vmem:[%s8937_s0 + $0x1e1] sm:$0xff] }
 0x151   :  { %5276 = vrot.lane.b32.xlu1 %v7735_v9, %s5741_s8  ;;  %v3103_v29 = vsel %vm3102_vm9, %v3038_v63, %v4988_v43  ;;  %v3104_v50 = vsel %vm3102_vm9, %v3039_v47, %v4989_v16  ;;  %v2910_v16 = vsel %vm2907_vm6, %v2845_v30, %v4963_v44  ;;  %v2911_v43 = vsel %vm2907_vm6, %v2846_v60, %v4964_v5  ;;  %v4244_v30 = vld [vmem:[%s8937_s0 + $0x1a2] sm:$0xff] }
 0x152   :  { %5271 = vrot.lane.b32.xlu0 %v7688_v51, %s5741_s8  ;;  %v7776_v11 = vpop.permute.xlu1 %4996  ;;  %v3167_v17 = vpack.c.bf16 %v3104_v50, %v3103_v29  ;;  %v4114_v51 = vld [vmem:[%s8937_s0 + $0x188] sm:$0xff]  ;;  %v2975_v19 = vsel %vm2972_vm7, %v2910_v16, %v4973_v4  ;;  %v2976_v35 = vsel %vm2972_vm7, %v2911_v43, %v4974_v27  ;;  %v4479_v63 = vunpack.i.h.bf16 %v9168_v40  ;;  %v4179_v27 = vld [vmem:[%s8937_s0 + $0x199] sm:$0xff] }
 0x153   :  { %v4992_v53 = vpop.permute.xlu0 %4991  ;;  %v3040_v47 = vsel %vm3037_vm8, %v2975_v19, %v4983_v10  ;;  %v3041_v44 = vsel %vm3037_vm8, %v2976_v35, %v4984_v28  ;;  %v5290_v5 = vpack.i.bf16 %v4114_v51, %v4113_v62  ;;  %v4180_v4 = vld [vmem:[%s8937_s0 + $0x1a1] sm:$0xff]  ;;  %v9170_v10 = vunpack.i.h.bf16 %v9166_v26  ;;  %v3992_v51 = vld [vmem:[%s8937_s0 + $0x1e9] sm:$0xff] }
 0x154   :  { %v4994_v58 = vunpack.i.h.bf16 %v4992_v53  ;;  %v4993_v41 = vunpack.i.l.bf16 %v4992_v53  ;;  %4355 = vmatprep.mubr.msk.bf16.mxu0 %vm3221_vm10, %v3167_v17  ;;  %v4779_v26 = vunpack.i.h.bf16 %v7199_v38  ;;  %v4778_v60 = vunpack.i.l.bf16 %v7199_v38  ;;  %v7834_v16 = vld [vmem:[%s8937_s0 + $0x1c9] sm:$0xff] }
 0x155   :  { %5286 = vrot.lane.b32.xlu1 %v7739_v55, %s5743_s12  ;;  %v2720_v28 = vsel %vm2712_vm1, %v7657_v0, %v9170_v10  ;;  %v2717_v0 = vsel %vm2712_vm1, %v7596_v32, %v4613_v3  ;;  %v7839_v32 = vld [vmem:[%s8937_s0 + $0x1d1] sm:$0xff]  ;;  %v2718_v38 = vsel %vm2712_vm1, %v7602_v21, %v4614_v54  ;;  %v4774_v3 = vunpack.i.h.bf16 %v7207_v31 }
 0x156   :  { %5281 = vrot.lane.b32.xlu0 %v7729_v12, %s5743_s12  ;;  %v3105_v12 = vsel %vm3102_vm9, %v3040_v47, %v4993_v41  ;;  %v3106_v29 = vsel %vm3102_vm9, %v3041_v44, %v4994_v58  ;;  %v5007_v50 = vpop.permute.xlu1 %5006  ;;  %v4773_v43 = vunpack.i.l.bf16 %v7207_v31  ;;  %v5305_v53 = vpack.i.bf16 %v4180_v4, %v4179_v27  ;;  %v9171_v19 = vld [vmem:[#allocation56_spill] sm:$0xff] }
 0x157   :  { %v7826_v17 = vpop.permute.xlu0 %5001  ;;  %v3168_v62 = vpack.c.bf16 %v3106_v29, %v3105_v12  ;;  %v4629_v35 = vunpack.i.h.bf16 %v9171_v19  ;;  %v4934_v58 = vunpack.i.h.bf16 %v7579_v46  ;;  %v4933_v41 = vunpack.i.l.bf16 %v7579_v46 }
 0x158   :  { %v5315_v47 = vpack.i.bf16 %v4244_v30, %v4243_v42  ;;  %v4999_v21 = vunpack.i.h.bf16 %v7776_v11  ;;  %v4998_v54 = vunpack.i.l.bf16 %v7776_v11  ;;  %v7853_v31 = vpack.i.bf16 %v3992_v51, %v3991_v57 }
 0x159   :  { %5296 = vrot.lane.b32.xlu1 %v5295_v13, %s5744_s19  ;;  %4356 = vmatmul.mubr.msk.bf16.vlgmr.msra.gmra.mxu0 %vm3221_vm10, %v3168_v62  ;;  %v5320_v13 = vpack.i.bf16 %v7839_v32, %v7834_v16  ;;  %v2784_v27 = vsel %vm2777_vm4, %v2719_v20, %v4778_v60  ;;  %v2785_v4 = vsel %vm2777_vm4, %v2720_v28, %v4779_v26  ;;  %v5009_v46 = vunpack.i.h.bf16 %v5007_v50 }
 0x15a   :  { %5291 = vrot.lane.b32.xlu0 %v5290_v5, %s5744_s19  ;;  %v5017_v44 = vpop.permute.xlu1 %5016  ;;  %v5008_v24 = vunpack.i.l.bf16 %v5007_v50  ;;  %v2782_v10 = vsel %vm2777_vm4, %v2717_v0, %v4773_v43  ;;  %v2783_v12 = vsel %vm2777_vm4, %v2718_v38, %v4774_v3  ;;  %v4939_v11 = vunpack.i.h.bf16 %v7577_v48 }
 0x15b   :  { %v5019_v29 = vunpack.i.h.bf16 %v5017_v44  ;;  %v5018_v42 = vunpack.i.l.bf16 %v5017_v44  ;;  %v4938_v30 = vunpack.i.l.bf16 %v7577_v48  ;;  %v2847_v57 = vsel %vm2842_vm5, %v2782_v10, %v4933_v41  ;;  %v4053_v10 = vld [vmem:[%s8937_s0 + $0x1ca] sm:$0xff] }
 0x15c   :  { %v5012_v5 = vpop.permute.xlu0 %5011  ;;  %v2848_v20 = vsel %vm2842_vm5, %v2783_v12, %v4934_v58  ;;  %v2912_v28 = vsel %vm2907_vm6, %v2847_v57, %v4998_v54  ;;  %v5004_v0 = vunpack.i.h.bf16 %v7826_v17  ;;  %v5003_v26 = vunpack.i.l.bf16 %v7826_v17  ;;  %v4055_v17 = vld [vmem:[%s8937_s0 + $0x1e2] sm:$0xff]  ;;  %v4054_v12 = vld [vmem:[%s8937_s0 + $0x1d2] sm:$0xff] }
 0x15d   :  { %5306 = vrot.lane.b32.xlu1 %v5305_v53, %s5745_s1  ;;  %v2913_v50 = vsel %vm2907_vm6, %v2848_v20, %v4999_v21  ;;  %v2977_v62 = vsel %vm2972_vm7, %v2912_v28, %v5008_v24  ;;  %v5014_v3 = vunpack.i.h.bf16 %v5012_v5  ;;  %v5013_v43 = vunpack.i.l.bf16 %v5012_v5  ;;  %v4056_v53 = vld [vmem:[%s8937_s0 + $0x1ea] sm:$0xff] }
 0x15e   :  { %5301 = vrot.lane.b32.xlu0 %v7735_v9, %s5745_s1  ;;  %v5027_v60 = vpop.permute.xlu1 %5026  ;;  %v2978_v48 = vsel %vm2972_vm7, %v2913_v50, %v5009_v46  ;;  %v3042_v38 = vsel %vm3037_vm8, %v2977_v62, %v5018_v42  ;;  %v4628_v44 = vunpack.i.l.bf16 %v9171_v19  ;;  %v2850_v46 = vsel %vm2842_vm5, %v2785_v4, %v4939_v11  ;;  %v4119_v62 = vld [vmem:[%s8937_s0 + $0x1f8] sm:$0xff]  ;;  %v4248_v19 = vld [vmem:[%s8937_s0 + $0x202] sm:$0xff] }
 0x15f   :  { %v5029_v51 = vunpack.i.h.bf16 %v5027_v60  ;;  %v5028_v16 = vunpack.i.l.bf16 %v5027_v60  ;;  %v3043_v9 = vsel %vm3037_vm8, %v2978_v48, %v5019_v29  ;;  %v9172_v29 = vld [vmem:[#allocation57_spill] sm:$0xff]  ;;  %v2915_v57 = vsel %vm2907_vm6, %v2850_v46, %v5004_v0  ;;  %v4120_v48 = vld [vmem:[%s8937_s0 + $0x200] sm:$0xff] }
 0x160   :  { %v5022_v32 = vpop.permute.xlu0 %5021  ;;  %v4623_v42 = vunpack.i.l.bf16 %v9172_v29  ;;  %v2980_v11 = vsel %vm2972_vm7, %v2915_v57, %v5014_v3  ;;  %v4624_v50 = vunpack.i.h.bf16 %v9172_v29  ;;  %v5330_v60 = vpack.i.bf16 %v4054_v12, %v4053_v10  ;;  %v4118_v3 = vld [vmem:[%s8937_s0 + $0x1e8] sm:$0xff] }
 0x161   :  { %5316 = vrot.lane.b32.xlu1 %v5315_v47, %s5746_s20  ;;  %v3107_v58 = vsel %vm3102_vm9, %v3042_v38, %v5028_v16  ;;  %v3108_v41 = vsel %vm3102_vm9, %v3043_v9, %v5029_v51  ;;  %v5024_v21 = vunpack.i.h.bf16 %v5022_v32  ;;  %v5023_v54 = vunpack.i.l.bf16 %v5022_v32 }
 0x162   :  { %5311 = vrot.lane.b32.xlu0 %v7739_v55, %s5746_s20  ;;  %v2849_v47 = vsel %vm2842_vm5, %v2784_v27, %v4938_v30  ;;  %v7890_v24 = vpop.permute.xlu1 %5036  ;;  %v3169_v5 = vpack.c.bf16 %v3108_v41, %v3107_v58  ;;  %v7901_v30 = vpack.i.bf16 %v4056_v53, %v4055_v17  ;;  %v4478_v51 = vunpack.i.l.bf16 %v9168_v40  ;;  %v5735_v40 = vld [vmem:[%s8937_s0 + $0x90] sm:$0xff] }
 0x163   :  { %v2914_v55 = vsel %vm2907_vm6, %v2849_v47, %v5003_v26  ;;  %v3045_v0 = vsel %vm3037_vm8, %v2980_v11, %v5024_v21  ;;  %v2723_v16 = vsel %vm2712_vm1, %v7673_v18, %v4628_v44  ;;  %v2724_v18 = vsel %vm2712_vm1, %v7679_v8, %v4629_v35  ;;  %v4184_v21 = vld [vmem:[%s8937_s0 + $0x201] sm:$0xff] }
 0x164   :  { %v5032_v27 = vpop.permute.xlu0 %5031  ;;  %v2979_v4 = vsel %vm2972_vm7, %v2914_v55, %v5013_v43  ;;  %4359 = vmatprep.mubr.msk.bf16.mxu0 %vm3221_vm10, %v3169_v5  ;;  %v4183_v43 = vld [vmem:[%s8937_s0 + $0x1f9] sm:$0xff]  ;;  %v4789_v17 = vunpack.i.h.bf16 %v7219_v36  ;;  %v4788_v53 = vunpack.i.l.bf16 %v7219_v36  ;;  %v2721_v8 = vsel %vm2712_vm1, %v7685_v2, %v4623_v42 }
 0x165   :  { %v5034_v20 = vunpack.i.h.bf16 %v5032_v27  ;;  %v5033_v28 = vunpack.i.l.bf16 %v5032_v27  ;;  %5326 = vrot.lane.b32.xlu1 %v7853_v31, %s5741_s8  ;;  %v3044_v26 = vsel %vm3037_vm8, %v2979_v4, %v5023_v54  ;;  %v4247_v54 = vld [vmem:[%s8937_s0 + $0x1fa] sm:$0xff]  ;;  %v4784_v36 = vunpack.i.h.bf16 %v7221_v61 }
 0x166   :  { %5321 = vrot.lane.b32.xlu0 %v5320_v13, %s5741_s8  ;;  %v4117_v13 = vld [vmem:[%s8937_s0 + $0x1e0] sm:$0xff]  ;;  %v4783_v35 = vunpack.i.l.bf16 %v7221_v61  ;;  %v5345_v44 = vpack.i.bf16 %v4120_v48, %v4119_v62  ;;  %v2722_v47 = vsel %vm2712_vm1, %v7694_v45, %v4624_v50  ;;  %v4944_v46 = vunpack.i.h.bf16 %v7624_v6 }
 0x167   :  { %v3109_v32 = vsel %vm3102_vm9, %v3044_v26, %v5033_v28  ;;  %v3110_v38 = vsel %vm3102_vm9, %v3045_v0, %v5034_v20  ;;  %v5047_v9 = vpop.permute.xlu1 %5046  ;;  %v4943_v5 = vunpack.i.l.bf16 %v7624_v6  ;;  %v5340_v2 = vpack.i.bf16 %v4118_v3, %v4117_v13 }
 0x168   :  { %v7938_v58 = vpop.permute.xlu0 %5041  ;;  %v3170_v41 = vpack.c.bf16 %v3110_v38, %v3109_v32  ;;  %v5039_v10 = vunpack.i.h.bf16 %v7890_v24  ;;  %v5038_v61 = vunpack.i.l.bf16 %v7890_v24  ;;  %v7963_v29 = vpack.i.bf16 %v4184_v21, %v4183_v43 }
 0x169   :  { %5336 = vrot.lane.b32.xlu1 %v7901_v30, %s5743_s12  ;;  %v7965_v42 = vpack.i.bf16 %v4248_v19, %v4247_v54  ;;  %v2788_v45 = vsel %vm2777_vm4, %v2723_v16, %v4788_v53  ;;  %v2789_v55 = vsel %vm2777_vm4, %v2724_v18, %v4789_v17  ;;  %v5049_v57 = vunpack.i.h.bf16 %v5047_v9 }
 0x16a   :  { %5331 = vrot.lane.b32.xlu0 %v5330_v60, %s5743_s12  ;;  %4360 = vmatmul.mubr.msk.bf16.gmra.mxu0 %vm3221_vm10, %v3170_v41  ;;  %v5048_v6 = vunpack.i.l.bf16 %v5047_v9  ;;  %v2786_v4 = vsel %vm2777_vm4, %v2721_v8, %v4783_v35  ;;  %v2787_v11 = vsel %vm2777_vm4, %v2722_v47, %v4784_v36  ;;  %v4949_v24 = vunpack.i.h.bf16 %v7606_v56  ;;  %v3996_v41 = vld [vmem:[%s8937_s0 + $0x219] sm:$0xff] }
 0x16b   :  { %v5057_v12 = vpop.permute.xlu1 %5056  ;;  %v4948_v50 = vunpack.i.l.bf16 %v7606_v56  ;;  %v2851_v26 = vsel %vm2842_vm5, %v2786_v4, %v4943_v5  ;;  %v2852_v0 = vsel %vm2842_vm5, %v2787_v11, %v4944_v46  ;;  %v5044_v48 = vunpack.i.h.bf16 %v7938_v58  ;;  %v9173_v36 = vld [vmem:[#allocation9_spill] sm:$0xff] }
 0x16c   :  { %v5052_v27 = vpop.permute.xlu0 %5051  ;;  %v5059_v20 = vunpack.i.h.bf16 %v5057_v12  ;;  %v5058_v28 = vunpack.i.l.bf16 %v5057_v12  ;;  %v2916_v60 = vsel %vm2907_vm6, %v2851_v26, %v5038_v61  ;;  %v2917_v62 = vsel %vm2907_vm6, %v2852_v0, %v5039_v10  ;;  %v9175_v26 = vld [vmem:[#allocation59_spill] sm:$0xff] }
 0x16d   :  { %5346 = vrot.lane.b32.xlu1 %v5345_v44, %s5744_s19  ;;  %v5043_v16 = vunpack.i.l.bf16 %v7938_v58  ;;  %v2981_v38 = vsel %vm2972_vm7, %v2916_v60, %v5048_v6  ;;  %v2982_v9 = vsel %vm2972_vm7, %v2917_v62, %v5049_v57  ;;  %v5054_v17 = vunpack.i.h.bf16 %v5052_v27  ;;  %v3995_v58 = vld [vmem:[%s8937_s0 + $0x211] sm:$0xff] }
 0x16e   :  { %5341 = vrot.lane.b32.xlu0 %v5340_v2, %s5744_s19  ;;  %v3046_v43 = vsel %vm3037_vm8, %v2981_v38, %v5058_v28  ;;  %v3047_v18 = vsel %vm3037_vm8, %v2982_v9, %v5059_v20  ;;  %v5053_v53 = vunpack.i.l.bf16 %v5052_v27  ;;  %v4474_v35 = vunpack.i.h.bf16 %v9173_v36  ;;  %v5734_v9 = vld [vmem:[%s8937_s0 + $0xb0] sm:$0xff] }
 0x16f   :  { %v5067_v32 = vpop.permute.xlu1 %5066  ;;  %v2853_v44 = vsel %vm2842_vm5, %v2788_v45, %v4948_v50  ;;  %v2854_v47 = vsel %vm2842_vm5, %v2789_v55, %v4949_v24  ;;  %v4473_v2 = vunpack.i.l.bf16 %v9173_v36  ;;  %v8005_v57 = vpack.i.bf16 %v3996_v41, %v3995_v58  ;;  %v9174_v55 = vld [vmem:[#allocation58_spill] sm:$0xff]  ;;  %v4059_v24 = vld [vmem:[%s8937_s0 + $0x212] sm:$0xff] }
 0x170   :  { %v5069_v56 = vunpack.i.h.bf16 %v5067_v32  ;;  %v5068_v13 = vunpack.i.l.bf16 %v5067_v32  ;;  %v5062_v3 = vpop.permute.xlu0 %5061  ;;  %v2918_v10 = vsel %vm2907_vm6, %v2853_v44, %v5043_v16  ;;  %v2919_v61 = vsel %vm2907_vm6, %v2854_v47, %v5044_v48  ;;  %v4060_v50 = vld [vmem:[%s8937_s0 + $0x21a] sm:$0xff]  ;;  %v5733_v32 = vld [vmem:[%s8937_s0 + $0xa8] sm:$0xff] }
 0x171   :  { %5356 = vrot.lane.b32.xlu1 %v7963_v29, %s5745_s1  ;;  %v5064_v19 = vunpack.i.h.bf16 %v5062_v3  ;;  %v5063_v8 = vunpack.i.l.bf16 %v5062_v3  ;;  %v2984_v6 = vsel %vm2972_vm7, %v2919_v61, %v5054_v17  ;;  %v4639_v4 = vunpack.i.h.bf16 %v9174_v55  ;;  %v4124_v17 = vld [vmem:[%s8937_s0 + $0x230] sm:$0xff]  ;;  %v9177_v41 = vld [vmem:[#allocation26_spill] sm:$0xff]  ;;  %v5736_v36 = vld [vmem:[%s8937_s0 + $0x98] sm:$0xff] }
 0x172   :  { %v3111_v21 = vsel %vm3102_vm9, %v3046_v43, %v5068_v13  ;;  %v3112_v54 = vsel %vm3102_vm9, %v3047_v18, %v5069_v56  ;;  %5351 = vrot.lane.b32.xlu0 %v7853_v31, %s5745_s1  ;;  %v2983_v31 = vsel %vm2972_vm7, %v2918_v10, %v5053_v53  ;;  %v4638_v11 = vunpack.i.l.bf16 %v9174_v55  ;;  %v9176_v13 = vld [vmem:[#allocation14_spill] sm:$0xff]  ;;  %v4122_v53 = vld [vmem:[%s8937_s0 + $0x218] sm:$0xff] }
 0x173   :  { %v8000_v46 = vpop.permute.xlu1 %5076  ;;  %v3171_v5 = vpack.c.bf16 %v3112_v54, %v3111_v21  ;;  %v3048_v20 = vsel %vm3037_vm8, %v2983_v31, %v5063_v8  ;;  %v3049_v28 = vsel %vm3037_vm8, %v2984_v6, %v5064_v19  ;;  %v4634_v0 = vunpack.i.h.bf16 %v9175_v26  ;;  %v4187_v19 = vld [vmem:[%s8937_s0 + $0x229] sm:$0xff]  ;;  %v4188_v8 = vld [vmem:[%s8937_s0 + $0x231] sm:$0xff] }
 0x174   :  { %v5072_v12 = vpop.permute.xlu0 %5071  ;;  %v4633_v60 = vunpack.i.l.bf16 %v9175_v26  ;;  %v2662_v38 = vsel %vm2647_vm0, %v5733_v32, %v4478_v51  ;;  %v2663_v56 = vsel %vm2647_vm0, %v5734_v9, %v4479_v63  ;;  %v4798_v3 = vunpack.i.l.bf16 %v9176_v13  ;;  %v4121_v51 = vld [vmem:[%s8937_s0 + $0x210] sm:$0xff] }
 0x175   :  { %v5074_v27 = vunpack.i.h.bf16 %v5072_v12  ;;  %v5073_v45 = vunpack.i.l.bf16 %v5072_v12  ;;  %5366 = vrot.lane.b32.xlu1 %v7965_v42, %s5746_s20  ;;  %4363 = vmatprep.mubr.msk.bf16.mxu0 %vm3221_vm10, %v3171_v5  ;;  %v2660_v63 = vsel %vm2647_vm0, %v5735_v40, %v4473_v2  ;;  %v4799_v58 = vunpack.i.h.bf16 %v9176_v13 }
 0x176   :  { %5361 = vrot.lane.b32.xlu0 %v7901_v30, %s5746_s20  ;;  %v4123_v30 = vld [vmem:[%s8937_s0 + $0x228] sm:$0xff]  ;;  %v4793_v21 = vunpack.i.l.bf16 %v9177_v41  ;;  %v8065_v54 = vpack.i.bf16 %v4060_v50, %v4059_v24  ;;  %v2661_v44 = vsel %vm2647_vm0, %v5736_v36, %v4474_v35  ;;  %v2727_v47 = vsel %vm2712_vm1, %v2662_v38, %v4638_v11 }
 0x177   :  { %v3113_v62 = vsel %vm3102_vm9, %v3048_v20, %v5073_v45  ;;  %v3114_v48 = vsel %vm3102_vm9, %v3049_v28, %v5074_v27  ;;  %v8028_v16 = vpop.permute.xlu1 %5086  ;;  %v2728_v5 = vsel %vm2712_vm1, %v2663_v56, %v4639_v4  ;;  %v4794_v2 = vunpack.i.h.bf16 %v9177_v41  ;;  %v4251_v35 = vld [vmem:[%s8937_s0 + $0x22a] sm:$0xff]  ;;  %v4252_v27 = vld [vmem:[%s8937_s0 + $0x232] sm:$0xff] }
 0x178   :  { %v8046_v43 = vpop.permute.xlu0 %5081  ;;  %v3172_v18 = vpack.c.bf16 %v3114_v48, %v3113_v62  ;;  %v2725_v10 = vsel %vm2712_vm1, %v2660_v63, %v4633_v60  ;;  %v2726_v61 = vsel %vm2712_vm1, %v2661_v44, %v4634_v0  ;;  %v5395_v31 = vpack.i.bf16 %v4124_v17, %v4123_v30 }
 0x179   :  { %5376 = vrot.lane.b32.xlu1 %v8005_v57, %s5741_s8  ;;  %v5390_v6 = vpack.i.bf16 %v4122_v53, %v4121_v51  ;;  %v2792_v45 = vsel %vm2777_vm4, %v2727_v47, %v4798_v3  ;;  %v4953_v55 = vunpack.i.l.bf16 %v7667_v37  ;;  %v8094_v11 = vpack.i.bf16 %v4188_v8, %v4187_v19 }
 0x17a   :  { %5371 = vrot.lane.b32.xlu0 %v7963_v29, %s5741_s8  ;;  %4364 = vmatmul.mubr.msk.bf16.gmra.mxu0 %vm3221_vm10, %v3172_v18  ;;  %v4954_v29 = vunpack.i.h.bf16 %v7667_v37  ;;  %v2793_v20 = vsel %vm2777_vm4, %v2728_v5, %v4799_v58  ;;  %v2790_v28 = vsel %vm2777_vm4, %v2725_v10, %v4793_v21  ;;  %v5079_v24 = vunpack.i.h.bf16 %v8000_v46 }
 0x17b   :  { %v5097_v12 = vpop.permute.xlu1 %5096  ;;  %v5078_v50 = vunpack.i.l.bf16 %v8000_v46  ;;  %v2791_v26 = vsel %vm2777_vm4, %v2726_v61, %v4794_v2  ;;  %v5089_v0 = vunpack.i.h.bf16 %v8028_v16  ;;  %v5088_v37 = vunpack.i.l.bf16 %v8028_v16 }
 0x17c   :  { %v5092_v4 = vpop.permute.xlu0 %5091  ;;  %v8107_v60 = vpack.i.bf16 %v4252_v27, %v4251_v35  ;;  %v5084_v62 = vunpack.i.h.bf16 %v8046_v43  ;;  %v5083_v48 = vunpack.i.l.bf16 %v8046_v43  ;;  %v5099_v30 = vunpack.i.h.bf16 %v5097_v12 }
 0x17d   :  { %5386 = vrot.lane.b32.xlu1 %v8065_v54, %s5743_s12  ;;  %v5098_v46 = vunpack.i.l.bf16 %v5097_v12  ;;  %v2855_v38 = vsel %vm2842_vm5, %v2790_v28, %v4953_v55  ;;  %v2856_v9 = vsel %vm2842_vm5, %v2791_v26, %v4954_v29  ;;  %v5094_v56 = vunpack.i.h.bf16 %v5092_v4  ;;  %v4000_v29 = vld [vmem:[%s8937_s0 + $0x249] sm:$0xff] }
 0x17e   :  { %5381 = vrot.lane.b32.xlu0 %v7965_v42, %s5743_s12  ;;  %v5093_v13 = vunpack.i.l.bf16 %v5092_v4  ;;  %v2857_v16 = vsel %vm2842_vm5, %v2792_v45, %v5078_v50  ;;  %v2858_v42 = vsel %vm2842_vm5, %v2793_v20, %v5079_v24  ;;  %v2920_v63 = vsel %vm2907_vm6, %v2855_v38, %v5083_v48  ;;  %v3999_v45 = vld [vmem:[%s8937_s0 + $0x241] sm:$0xff]  ;;  %v4191_v38 = vld [vmem:[%s8937_s0 + $0x259] sm:$0xff] }
 0x17f   :  { %v5107_v32 = vpop.permute.xlu1 %5106  ;;  %v2922_v43 = vsel %vm2907_vm6, %v2857_v16, %v5088_v37  ;;  %v2923_v51 = vsel %vm2907_vm6, %v2858_v42, %v5089_v0  ;;  %v2921_v58 = vsel %vm2907_vm6, %v2856_v9, %v5084_v62  ;;  %v4063_v26 = vld [vmem:[%s8937_s0 + $0x242] sm:$0xff]  ;;  %v4064_v0 = vld [vmem:[%s8937_s0 + $0x24a] sm:$0xff] }
 0x180   :  { %v5102_v3 = vpop.permute.xlu0 %5101  ;;  %v5109_v18 = vunpack.i.h.bf16 %v5107_v32  ;;  %v5108_v17 = vunpack.i.l.bf16 %v5107_v32  ;;  %v2987_v41 = vsel %vm2972_vm7, %v2922_v43, %v5098_v46  ;;  %v2988_v21 = vsel %vm2972_vm7, %v2923_v51, %v5099_v30  ;;  %v4128_v30 = vld [vmem:[%s8937_s0 + $0x260] sm:$0xff]  ;;  %v4126_v32 = vld [vmem:[%s8937_s0 + $0x248] sm:$0xff] }
 0x181   :  { %5396 = vrot.lane.b32.xlu1 %v5395_v31, %s5744_s19  ;;  %v5104_v53 = vunpack.i.h.bf16 %v5102_v3  ;;  %v5103_v40 = vunpack.i.l.bf16 %v5102_v3  ;;  %v2985_v8 = vsel %vm2972_vm7, %v2920_v63, %v5093_v13  ;;  %v2986_v36 = vsel %vm2972_vm7, %v2921_v58, %v5094_v56  ;;  %v4125_v46 = vld [vmem:[%s8937_s0 + $0x240] sm:$0xff] }
 0x182   :  { %5391 = vrot.lane.b32.xlu0 %v5390_v6, %s5744_s19  ;;  %v3052_v2 = vsel %vm3037_vm8, %v2987_v41, %v5108_v17  ;;  %v3053_v10 = vsel %vm3037_vm8, %v2988_v21, %v5109_v18  ;;  %v8159_v48 = vpack.i.bf16 %v4064_v0, %v4063_v26  ;;  %v4192_v56 = vld [vmem:[%s8937_s0 + $0x261] sm:$0xff]  ;;  %v5440_v51 = vpack.i.bf16 %v4126_v32, %v4125_v46  ;;  %v4003_v32 = vld [vmem:[%s8937_s0 + $0x271] sm:$0xff] }
 0x183   :  { %v5117_v19 = vpop.permute.xlu1 %5116  ;;  %v3050_v31 = vsel %vm3037_vm8, %v2985_v8, %v5103_v40  ;;  %v3051_v6 = vsel %vm3037_vm8, %v2986_v36, %v5104_v53  ;;  %v4256_v13 = vld [vmem:[%s8937_s0 + $0x262] sm:$0xff]  ;;  %v5455_v63 = vpack.i.bf16 %v4192_v56, %v4191_v38  ;;  %v4004_v38 = vld [vmem:[%s8937_s0 + $0x279] sm:$0xff] }
 0x184   :  { %v5119_v44 = vunpack.i.h.bf16 %v5117_v19  ;;  %v5118_v47 = vunpack.i.l.bf16 %v5117_v19  ;;  %v5112_v5 = vpop.permute.xlu0 %5111 }
 0x185   :  { %v5114_v61 = vunpack.i.h.bf16 %v5112_v5  ;;  %v5113_v12 = vunpack.i.l.bf16 %v5112_v5  ;;  %5406 = vrot.lane.b32.xlu1 %v8094_v11, %s5745_s1 }
 0x186   :  { %v3117_v35 = vsel %vm3102_vm9, %v3052_v2, %v5118_v47  ;;  %v3118_v27 = vsel %vm3102_vm9, %v3053_v10, %v5119_v44  ;;  %5401 = vrot.lane.b32.xlu0 %v8005_v57, %s5745_s1  ;;  %v8145_v57 = vpack.i.bf16 %v4000_v29, %v3999_v45 }
 0x187   :  { %v3115_v55 = vsel %vm3102_vm9, %v3050_v31, %v5113_v12  ;;  %v3116_v4 = vsel %vm3102_vm9, %v3051_v6, %v5114_v61  ;;  %v5127_v20 = vpop.permute.xlu1 %5126  ;;  %v3174_v28 = vpack.c.bf16 %v3118_v27, %v3117_v35 }
 0x188   :  { %v5122_v24 = vpop.permute.xlu0 %5121  ;;  %v3173_v50 = vpack.c.bf16 %v3116_v4, %v3115_v55  ;;  %v5129_v3 = vunpack.i.h.bf16 %v5127_v20  ;;  %v5128_v16 = vunpack.i.l.bf16 %v5127_v20 }
 0x189   :  { %5416 = vrot.lane.b32.xlu1 %v8107_v60, %s5746_s20  ;;  %v5124_v18 = vunpack.i.h.bf16 %v5122_v24  ;;  %v5123_v17 = vunpack.i.l.bf16 %v5122_v24 }
 0x18a   :  { %5411 = vrot.lane.b32.xlu0 %v8065_v54, %s5746_s20  ;;  %4367 = vmatprep.mubr.msk.bf16.mxu0 %vm3221_vm10, %v3173_v50  ;;  %v4127_v54 = vld [vmem:[%s8937_s0 + $0x258] sm:$0xff]  ;;  %v2861_v44 = vsel %vm2842_vm5, %v7252_v39, %v5128_v16  ;;  %v2862_v47 = vsel %vm2842_vm5, %v7256_v23, %v5129_v3 }
 0x18b   :  { %4368 = vmatmul.mubr.msk.bf16.gmra.mxu0 %vm3221_vm10, %v3174_v28  ;;  %v5137_v37 = vpop.permute.xlu1 %5136  ;;  %v5445_v43 = vpack.i.bf16 %v4128_v30, %v4127_v54  ;;  %v2860_v61 = vsel %vm2842_vm5, %v7271_v34, %v5124_v18  ;;  %v4068_v18 = vld [vmem:[%s8937_s0 + $0x27a] sm:$0xff] }
 0x18c   :  { %v5132_v62 = vpop.permute.xlu0 %5131  ;;  %v5139_v53 = vunpack.i.h.bf16 %v5137_v37  ;;  %v5138_v40 = vunpack.i.l.bf16 %v5137_v37 }
 0x18d   :  { %5426 = vrot.lane.b32.xlu1 %v8145_v57, %s5741_s8  ;;  %v5134_v41 = vunpack.i.h.bf16 %v5132_v62  ;;  %v5133_v21 = vunpack.i.l.bf16 %v5132_v62 }
 0x18e   :  { %5421 = vrot.lane.b32.xlu0 %v8094_v11, %s5741_s8  ;;  %v4255_v11 = vld [vmem:[%s8937_s0 + $0x25a] sm:$0xff]  ;;  %v2926_v6 = vsel %vm2907_vm6, %v2861_v44, %v5138_v40  ;;  %v2927_v39 = vsel %vm2907_vm6, %v2862_v47, %v5139_v53  ;;  %v4132_v53 = vld [vmem:[%s8937_s0 + $0x290] sm:$0xff] }
 0x18f   :  { %v5147_v9 = vpop.permute.xlu1 %5146  ;;  %v8191_v58 = vpack.i.bf16 %v4256_v13, %v4255_v11  ;;  %v2925_v45 = vsel %vm2907_vm6, %v2860_v61, %v5134_v41  ;;  %v4129_v40 = vld [vmem:[%s8937_s0 + $0x270] sm:$0xff]  ;;  %v4130_v41 = vld [vmem:[%s8937_s0 + $0x278] sm:$0xff] }
 0x190   :  { %v5142_v42 = vpop.permute.xlu0 %5141  ;;  %v5149_v19 = vunpack.i.h.bf16 %v5147_v9  ;;  %v5148_v8 = vunpack.i.l.bf16 %v5147_v9  ;;  %v5490_v61 = vpack.i.bf16 %v4130_v41, %v4129_v40 }
 0x191   :  { %5436 = vrot.lane.b32.xlu1 %v8159_v48, %s5743_s12  ;;  %v5144_v5 = vunpack.i.h.bf16 %v5142_v42  ;;  %v5143_v2 = vunpack.i.l.bf16 %v5142_v42  ;;  %v4067_v42 = vld [vmem:[%s8937_s0 + $0x272] sm:$0xff] }
 0x192   :  { %5431 = vrot.lane.b32.xlu0 %v8107_v60, %s5743_s12  ;;  %v2859_v60 = vsel %vm2842_vm5, %v7267_v52, %v5123_v17  ;;  %v2991_v52 = vsel %vm2972_vm7, %v2926_v6, %v5148_v8  ;;  %v2992_v34 = vsel %vm2972_vm7, %v2927_v39, %v5149_v19  ;;  %v4196_v8 = vld [vmem:[%s8937_s0 + $0x291] sm:$0xff] }
 0x193   :  { %v5157_v36 = vpop.permute.xlu1 %5156  ;;  %v2924_v23 = vsel %vm2907_vm6, %v2859_v60, %v5133_v21  ;;  %v2990_v4 = vsel %vm2972_vm7, %v2925_v45, %v5144_v5  ;;  %v4195_v21 = vld [vmem:[%s8937_s0 + $0x289] sm:$0xff] }
 0x194   :  { %v5152_v10 = vpop.permute.xlu0 %5151  ;;  %v5159_v12 = vunpack.i.h.bf16 %v5157_v36  ;;  %v5158_v31 = vunpack.i.l.bf16 %v5157_v36  ;;  %v2989_v55 = vsel %vm2972_vm7, %v2924_v23, %v5143_v2  ;;  %v4260_v36 = vld [vmem:[%s8937_s0 + $0x292] sm:$0xff]  ;;  %v5505_v6 = vpack.i.bf16 %v4196_v8, %v4195_v21 }
 0x195   :  { %5446 = vrot.lane.b32.xlu1 %v5445_v43, %s5744_s19  ;;  %v5154_v35 = vunpack.i.h.bf16 %v5152_v10  ;;  %v5153_v27 = vunpack.i.l.bf16 %v5152_v10 }
 0x196   :  { %5441 = vrot.lane.b32.xlu0 %v5440_v51, %s5744_s19  ;;  %v3056_v50 = vsel %vm3037_vm8, %v2991_v52, %v5158_v31  ;;  %v3057_v26 = vsel %vm3037_vm8, %v2992_v34, %v5159_v12  ;;  %v8244_v51 = vpack.i.bf16 %v4068_v18, %v4067_v42 }
 0x197   :  { %v5167_v29 = vpop.permute.xlu1 %5166  ;;  %v3054_v62 = vsel %vm3037_vm8, %v2989_v55, %v5153_v27  ;;  %v3055_v54 = vsel %vm3037_vm8, %v2990_v4, %v5154_v35 }
 0x198   :  { %v5169_v20 = vunpack.i.h.bf16 %v5167_v29  ;;  %v5168_v28 = vunpack.i.l.bf16 %v5167_v29  ;;  %v5162_v24 = vpop.permute.xlu0 %5161 }
 0x199   :  { %v5164_v0 = vunpack.i.h.bf16 %v5162_v24  ;;  %v5163_v37 = vunpack.i.l.bf16 %v5162_v24  ;;  %5456 = vrot.lane.b32.xlu1 %v5455_v63, %s5745_s1 }
 0x19a   :  { %v3121_v30 = vsel %vm3102_vm9, %v3056_v50, %v5168_v28  ;;  %v3122_v46 = vsel %vm3102_vm9, %v3057_v26, %v5169_v20  ;;  %5451 = vrot.lane.b32.xlu0 %v8145_v57, %s5745_s1  ;;  %v8230_v57 = vpack.i.bf16 %v4004_v38, %v4003_v32 }
 0x19b   :  { %v3119_v9 = vsel %vm3102_vm9, %v3054_v62, %v5163_v37  ;;  %v3120_v56 = vsel %vm3102_vm9, %v3055_v54, %v5164_v0  ;;  %v5177_v11 = vpop.permute.xlu1 %5176  ;;  %v3176_v13 = vpack.c.bf16 %v3122_v46, %v3121_v30 }
 0x19c   :  { %v5172_v3 = vpop.permute.xlu0 %5171  ;;  %v3175_v16 = vpack.c.bf16 %v3120_v56, %v3119_v9  ;;  %v5179_v44 = vunpack.i.h.bf16 %v5177_v11  ;;  %v5178_v47 = vunpack.i.l.bf16 %v5177_v11 }
 0x19d   :  { %5466 = vrot.lane.b32.xlu1 %v8191_v58, %s5746_s20  ;;  %v5174_v2 = vunpack.i.h.bf16 %v5172_v3  ;;  %v5173_v10 = vunpack.i.l.bf16 %v5172_v3 }
 0x19e   :  { %5461 = vrot.lane.b32.xlu0 %v8159_v48, %s5746_s20  ;;  %4371 = vmatprep.mubr.msk.bf16.mxu0 %vm3221_vm10, %v3175_v16  ;;  %v4131_v48 = vld [vmem:[%s8937_s0 + $0x288] sm:$0xff]  ;;  %v2865_v34 = vsel %vm2842_vm5, %v7276_v1, %v5178_v47  ;;  %v2866_v29 = vsel %vm2842_vm5, %v7280_v7, %v5179_v44 }
 0x19f   :  { %4372 = vmatmul.mubr.msk.bf16.gmra.mxu0 %vm3221_vm10, %v3176_v13  ;;  %v5187_v17 = vpop.permute.xlu1 %5186  ;;  %v5495_v60 = vpack.i.bf16 %v4132_v53, %v4131_v48  ;;  %v2864_v28 = vsel %vm2842_vm5, %v7295_v15, %v5174_v2  ;;  %v4008_v48 = vld [vmem:[%s8937_s0 + $0x2a9] sm:$0xff]  ;;  %v4136_v2 = vld [vmem:[%s8937_s0 + $0x2c0] sm:$0xff] }
 0x1a0   :  { %v5182_v43 = vpop.permute.xlu0 %5181  ;;  %v5189_v12 = vunpack.i.h.bf16 %v5187_v17  ;;  %v5188_v31 = vunpack.i.l.bf16 %v5187_v17 }
 0x1a1   :  { %5476 = vrot.lane.b32.xlu1 %v8230_v57, %s5741_s8  ;;  %v5184_v35 = vunpack.i.h.bf16 %v5182_v43  ;;  %v5183_v27 = vunpack.i.l.bf16 %v5182_v43  ;;  %v4007_v43 = vld [vmem:[%s8937_s0 + $0x2a1] sm:$0xff] }
 0x1a2   :  { %5471 = vrot.lane.b32.xlu0 %v5455_v63, %s5741_s8  ;;  %v4259_v63 = vld [vmem:[%s8937_s0 + $0x28a] sm:$0xff]  ;;  %v2930_v26 = vsel %vm2907_vm6, %v2865_v34, %v5188_v31  ;;  %v2931_v1 = vsel %vm2907_vm6, %v2866_v29, %v5189_v12  ;;  %v4200_v31 = vld [vmem:[%s8937_s0 + $0x2c1] sm:$0xff] }
 0x1a3   :  { %v5197_v19 = vpop.permute.xlu1 %5196  ;;  %v8275_v39 = vpack.i.bf16 %v4260_v36, %v4259_v63  ;;  %v2929_v62 = vsel %vm2907_vm6, %v2864_v28, %v5184_v35  ;;  %v4071_v63 = vld [vmem:[%s8937_s0 + $0x2a2] sm:$0xff]  ;;  %v4072_v36 = vld [vmem:[%s8937_s0 + $0x2aa] sm:$0xff] }
 0x1a4   :  { %v5192_v5 = vpop.permute.xlu0 %5191  ;;  %v5199_v23 = vunpack.i.h.bf16 %v5197_v19  ;;  %v5198_v45 = vunpack.i.l.bf16 %v5197_v19  ;;  %v4264_v35 = vld [vmem:[%s8937_s0 + $0x2c2] sm:$0xff] }
 0x1a5   :  { %5486 = vrot.lane.b32.xlu1 %v8244_v51, %s5743_s12  ;;  %v5194_v55 = vunpack.i.h.bf16 %v5192_v5  ;;  %v5193_v4 = vunpack.i.l.bf16 %v5192_v5  ;;  %v8328_v5 = vpack.i.bf16 %v4072_v36, %v4071_v63  ;;  %v4012_v63 = vld [vmem:[%s8937_s0 + $0x2d9] sm:$0xff] }
 0x1a6   :  { %5481 = vrot.lane.b32.xlu0 %v8191_v58, %s5743_s12  ;;  %v2863_v58 = vsel %vm2842_vm5, %v7291_v25, %v5173_v10  ;;  %v2995_v25 = vsel %vm2972_vm7, %v2930_v26, %v5198_v45  ;;  %v2996_v15 = vsel %vm2972_vm7, %v2931_v1, %v5199_v23  ;;  %v4133_v10 = vld [vmem:[%s8937_s0 + $0x2a0] sm:$0xff] }
 0x1a7   :  { %v5207_v52 = vpop.permute.xlu1 %5206  ;;  %v2928_v7 = vsel %vm2907_vm6, %v2863_v58, %v5183_v27  ;;  %v2994_v46 = vsel %vm2972_vm7, %v2929_v62, %v5194_v55 }
 0x1a8   :  { %v5202_v20 = vpop.permute.xlu0 %5201  ;;  %v5209_v24 = vunpack.i.h.bf16 %v5207_v52  ;;  %v5208_v50 = vunpack.i.l.bf16 %v5207_v52  ;;  %v2993_v30 = vsel %vm2972_vm7, %v2928_v7, %v5193_v4 }
 0x1a9   :  { %5496 = vrot.lane.b32.xlu1 %v5495_v60, %s5744_s19  ;;  %v5204_v0 = vunpack.i.h.bf16 %v5202_v20  ;;  %v5203_v37 = vunpack.i.l.bf16 %v5202_v20  ;;  %v4134_v60 = vld [vmem:[%s8937_s0 + $0x2a8] sm:$0xff] }
 0x1aa   :  { %5491 = vrot.lane.b32.xlu0 %v5490_v61, %s5744_s19  ;;  %v3060_v56 = vsel %vm3037_vm8, %v2995_v25, %v5208_v50  ;;  %v3061_v11 = vsel %vm3037_vm8, %v2996_v15, %v5209_v24  ;;  %v4199_v61 = vld [vmem:[%s8937_s0 + $0x2b9] sm:$0xff]  ;;  %v5540_v55 = vpack.i.bf16 %v4134_v60, %v4133_v10 }
 0x1ab   :  { %v5217_v54 = vpop.permute.xlu1 %5216  ;;  %v3058_v16 = vsel %vm3037_vm8, %v2993_v30, %v5203_v37  ;;  %v3059_v42 = vsel %vm3037_vm8, %v2994_v46, %v5204_v0  ;;  %v5555_v58 = vpack.i.bf16 %v4200_v31, %v4199_v61  ;;  %v4075_v60 = vld [vmem:[%s8937_s0 + $0x2d2] sm:$0xff]  ;;  %v4076_v61 = vld [vmem:[%s8937_s0 + $0x2da] sm:$0xff] }
 0x1ac   :  { %v5219_v32 = vunpack.i.h.bf16 %v5217_v54  ;;  %v5218_v38 = vunpack.i.l.bf16 %v5217_v54  ;;  %v5212_v9 = vpop.permute.xlu0 %5211 }
 0x1ad   :  { %v5214_v13 = vunpack.i.h.bf16 %v5212_v9  ;;  %v5213_v3 = vunpack.i.l.bf16 %v5212_v9  ;;  %5506 = vrot.lane.b32.xlu1 %v5505_v6, %s5745_s1 }
 0x1ae   :  { %v3125_v18 = vsel %vm3102_vm9, %v3060_v56, %v5218_v38  ;;  %v3126_v17 = vsel %vm3102_vm9, %v3061_v11, %v5219_v32  ;;  %5501 = vrot.lane.b32.xlu0 %v8230_v57, %s5745_s1  ;;  %v8314_v57 = vpack.i.bf16 %v4008_v48, %v4007_v43 }
 0x1af   :  { %v3123_v53 = vsel %vm3102_vm9, %v3058_v16, %v5213_v3  ;;  %v3124_v40 = vsel %vm3102_vm9, %v3059_v42, %v5214_v13  ;;  %v5227_v41 = vpop.permute.xlu1 %5226  ;;  %v3178_v21 = vpack.c.bf16 %v3126_v17, %v3125_v18 }
 0x1b0   :  { %v5222_v19 = vpop.permute.xlu0 %5221  ;;  %v3177_v8 = vpack.c.bf16 %v3124_v40, %v3123_v53  ;;  %v5229_v27 = vunpack.i.h.bf16 %v5227_v41  ;;  %v5228_v23 = vunpack.i.l.bf16 %v5227_v41 }
 0x1b1   :  { %5516 = vrot.lane.b32.xlu1 %v8275_v39, %s5746_s20  ;;  %v5224_v52 = vunpack.i.h.bf16 %v5222_v19  ;;  %v5223_v34 = vunpack.i.l.bf16 %v5222_v19 }
 0x1b2   :  { %5511 = vrot.lane.b32.xlu0 %v8244_v51, %s5746_s20  ;;  %4375 = vmatprep.mubr.msk.bf16.mxu0 %vm3221_vm10, %v3177_v8  ;;  %v4135_v51 = vld [vmem:[%s8937_s0 + $0x2b8] sm:$0xff]  ;;  %v2869_v37 = vsel %vm2842_vm5, %v7302_v22, %v5228_v23  ;;  %v2870_v7 = vsel %vm2842_vm5, %v7306_v59, %v5229_v27  ;;  %v4137_v27 = vld [vmem:[%s8937_s0 + $0x2d0] sm:$0xff] }
 0x1b3   :  { %4376 = vmatmul.mubr.msk.bf16.gmra.mxu0 %vm3221_vm10, %v3178_v21  ;;  %v5237_v44 = vpop.permute.xlu1 %5236  ;;  %v5545_v29 = vpack.i.bf16 %v4136_v2, %v4135_v51  ;;  %v2868_v54 = vsel %vm2842_vm5, %v7321_v14, %v5224_v52  ;;  %v4011_v8 = vld [vmem:[%s8937_s0 + $0x2d1] sm:$0xff] }
 0x1b4   :  { %v5232_v47 = vpop.permute.xlu0 %5231  ;;  %v5239_v4 = vunpack.i.h.bf16 %v5237_v44  ;;  %v5238_v20 = vunpack.i.l.bf16 %v5237_v44  ;;  %v4138_v23 = vld [vmem:[%s8937_s0 + $0x2d8] sm:$0xff] }
 0x1b5   :  { %5526 = vrot.lane.b32.xlu1 %v8314_v57, %s5741_s8  ;;  %v5234_v24 = vunpack.i.h.bf16 %v5232_v47  ;;  %v5233_v50 = vunpack.i.l.bf16 %v5232_v47 }
 0x1b6   :  { %5521 = vrot.lane.b32.xlu0 %v5505_v6, %s5741_s8  ;;  %v4263_v6 = vld [vmem:[%s8937_s0 + $0x2ba] sm:$0xff]  ;;  %v2934_v32 = vsel %vm2907_vm6, %v2869_v37, %v5238_v20  ;;  %v2935_v22 = vsel %vm2907_vm6, %v2870_v7, %v5239_v4 }
 0x1b7   :  { %v5247_v12 = vpop.permute.xlu1 %5246  ;;  %v8359_v28 = vpack.i.bf16 %v4264_v35, %v4263_v6  ;;  %v2933_v56 = vsel %vm2907_vm6, %v2868_v54, %v5234_v24  ;;  %v8412_v6 = vpack.i.bf16 %v4076_v61, %v4075_v60  ;;  %v4140_v35 = vld [vmem:[%s8937_s0 + $0x2f0] sm:$0xff]  ;;  %v4015_v61 = vld [vmem:[%s8937_s0 + $0x301] sm:$0xff] }
 0x1b8   :  { %v5242_v45 = vpop.permute.xlu0 %5241  ;;  %v5249_v26 = vunpack.i.h.bf16 %v5247_v12  ;;  %v5248_v1 = vunpack.i.l.bf16 %v5247_v12 }
 0x1b9   :  { %5536 = vrot.lane.b32.xlu1 %v8328_v5, %s5743_s12  ;;  %v5244_v62 = vunpack.i.h.bf16 %v5242_v45  ;;  %v5243_v25 = vunpack.i.l.bf16 %v5242_v45  ;;  %v4203_v45 = vld [vmem:[%s8937_s0 + $0x2e9] sm:$0xff] }
 0x1ba   :  { %5531 = vrot.lane.b32.xlu0 %v8275_v39, %s5743_s12  ;;  %v2867_v39 = vsel %vm2842_vm5, %v7317_v33, %v5223_v34  ;;  %v2999_v33 = vsel %vm2972_vm7, %v2934_v32, %v5248_v1  ;;  %v3000_v14 = vsel %vm2972_vm7, %v2935_v22, %v5249_v26  ;;  %v4204_v34 = vld [vmem:[%s8937_s0 + $0x2f1] sm:$0xff]  ;;  %v5590_v1 = vpack.i.bf16 %v4138_v23, %v4137_v27  ;;  %v9178_v32 = vld [vmem:[#allocation27_spill] sm:$0xff] }
 0x1bb   :  { %v5257_v0 = vpop.permute.xlu1 %5256  ;;  %v2932_v59 = vsel %vm2907_vm6, %v2867_v39, %v5233_v50  ;;  %v2998_v3 = vsel %vm2972_vm7, %v2933_v56, %v5244_v62  ;;  %v5605_v7 = vpack.i.bf16 %v4204_v34, %v4203_v45  ;;  %v9179_v56 = vld [vmem:[#allocation17_spill] sm:$0xff]  ;;  %v4080_v34 = vld [vmem:[%s8937_s0 + $0x30a] sm:$0xff] }
 0x1bc   :  { %v5252_v15 = vpop.permute.xlu0 %5251  ;;  %v5259_v30 = vunpack.i.h.bf16 %v5257_v0  ;;  %v5258_v46 = vunpack.i.l.bf16 %v5257_v0  ;;  %v2997_v13 = vsel %vm2972_vm7, %v2932_v59, %v5243_v25 }
 0x1bd   :  { %5546 = vrot.lane.b32.xlu1 %v5545_v29, %s5744_s19  ;;  %v5254_v38 = vunpack.i.h.bf16 %v5252_v15  ;;  %v5253_v9 = vunpack.i.l.bf16 %v5252_v15  ;;  %v4267_v29 = vld [vmem:[%s8937_s0 + $0x2ea] sm:$0xff] }
 0x1be   :  { %5541 = vrot.lane.b32.xlu0 %v5540_v55, %s5744_s19  ;;  %v3064_v17 = vsel %vm3037_vm8, %v2999_v33, %v5258_v46  ;;  %v3065_v43 = vsel %vm3037_vm8, %v3000_v14, %v5259_v30  ;;  %v4268_v55 = vld [vmem:[%s8937_s0 + $0x2f2] sm:$0xff]  ;;  %v9180_v33 = vld [vmem:[#allocation18_spill] sm:$0xff] }
 0x1bf   :  { %v5267_v11 = vpop.permute.xlu1 %5266  ;;  %v3062_v40 = vsel %vm3037_vm8, %v2997_v13, %v5253_v9  ;;  %v3063_v41 = vsel %vm3037_vm8, %v2998_v3, %v5254_v38  ;;  %v8443_v62 = vpack.i.bf16 %v4268_v55, %v4267_v29 }
 0x1c0   :  { %v5269_v16 = vunpack.i.h.bf16 %v5267_v11  ;;  %v5268_v42 = vunpack.i.l.bf16 %v5267_v11  ;;  %v5262_v18 = vpop.permute.xlu0 %5261 }
 0x1c1   :  { %v5264_v48 = vunpack.i.h.bf16 %v5262_v18  ;;  %v5263_v53 = vunpack.i.l.bf16 %v5262_v18  ;;  %5556 = vrot.lane.b32.xlu1 %v5555_v58, %s5745_s1 }
 0x1c2   :  { %v3129_v21 = vsel %vm3102_vm9, %v3064_v17, %v5268_v42  ;;  %v3130_v19 = vsel %vm3102_vm9, %v3065_v43, %v5269_v16  ;;  %5551 = vrot.lane.b32.xlu0 %v8314_v57, %s5745_s1  ;;  %v8398_v57 = vpack.i.bf16 %v4012_v63, %v4011_v8 }
 0x1c3   :  { %v3180_v36 = vpack.c.bf16 %v3130_v19, %v3129_v21  ;;  %v3127_v44 = vsel %vm3102_vm9, %v3062_v40, %v5263_v53  ;;  %v3128_v47 = vsel %vm3102_vm9, %v3063_v41, %v5264_v48  ;;  %v5277_v51 = vpop.permute.xlu1 %5276 }
 0x1c4   :  { %v3179_v2 = vpack.c.bf16 %v3128_v47, %v3127_v44  ;;  %v5272_v10 = vpop.permute.xlu0 %5271  ;;  %v5279_v4 = vunpack.i.h.bf16 %v5277_v51  ;;  %v5278_v20 = vunpack.i.l.bf16 %v5277_v51 }
 0x1c5   :  { %5566 = vrot.lane.b32.xlu1 %v8359_v28, %s5746_s20  ;;  %v5274_v24 = vunpack.i.h.bf16 %v5272_v10  ;;  %v5273_v50 = vunpack.i.l.bf16 %v5272_v10 }
 0x1c6   :  { %5561 = vrot.lane.b32.xlu0 %v8328_v5, %s5746_s20  ;;  %4379 = vmatprep.mubr.msk.bf16.mxu0 %vm3221_vm10, %v3179_v2  ;;  %v4139_v5 = vld [vmem:[%s8937_s0 + $0x2e8] sm:$0xff]  ;;  %v2873_v46 = vsel %vm2842_vm5, %v7329_v49, %v5278_v20  ;;  %v2874_v22 = vsel %vm2842_vm5, %v9178_v32, %v5279_v4  ;;  %v4144_v20 = vld [vmem:[%s8937_s0 + $0x320] sm:$0xff] }
 0x1c7   :  { %4380 = vmatmul.mubr.msk.bf16.gmra.mxu0 %vm3221_vm10, %v3180_v36  ;;  %v5287_v12 = vpop.permute.xlu1 %5286  ;;  %v5595_v26 = vpack.i.bf16 %v4140_v35, %v4139_v5  ;;  %v2872_v14 = vsel %vm2842_vm5, %v9180_v33, %v5274_v24  ;;  %v4142_v24 = vld [vmem:[%s8937_s0 + $0x308] sm:$0xff] }
 0x1c8   :  { %v5282_v31 = vpop.permute.xlu0 %5281  ;;  %v5289_v0 = vunpack.i.h.bf16 %v5287_v12  ;;  %v5288_v37 = vunpack.i.l.bf16 %v5287_v12  ;;  %v4016_v12 = vld [vmem:[%s8937_s0 + $0x309] sm:$0xff] }
 0x1c9   :  { %5576 = vrot.lane.b32.xlu1 %v8398_v57, %s5741_s8  ;;  %v5284_v25 = vunpack.i.h.bf16 %v5282_v31  ;;  %v5283_v15 = vunpack.i.l.bf16 %v5282_v31 }
 0x1ca   :  { %5571 = vrot.lane.b32.xlu0 %v5555_v58, %s5741_s8  ;;  %v2938_v3 = vsel %vm2907_vm6, %v2873_v46, %v5288_v37  ;;  %v2939_v49 = vsel %vm2907_vm6, %v2874_v22, %v5289_v0  ;;  %v4271_v0 = vld [vmem:[%s8937_s0 + $0x31a] sm:$0xff]  ;;  %v4272_v37 = vld [vmem:[%s8937_s0 + $0x322] sm:$0xff] }
 0x1cb   :  { %v5297_v52 = vpop.permute.xlu1 %5296  ;;  %v2937_v17 = vsel %vm2907_vm6, %v2872_v14, %v5284_v25 }
 0x1cc   :  { %v5292_v58 = vpop.permute.xlu0 %5291  ;;  %v5299_v39 = vunpack.i.h.bf16 %v5297_v52  ;;  %v5298_v54 = vunpack.i.l.bf16 %v5297_v52  ;;  %v4079_v52 = vld [vmem:[%s8937_s0 + $0x302] sm:$0xff] }
 0x1cd   :  { %5586 = vrot.lane.b32.xlu1 %v8412_v6, %s5743_s12  ;;  %v5294_v38 = vunpack.i.h.bf16 %v5292_v58  ;;  %v5293_v9 = vunpack.i.l.bf16 %v5292_v58  ;;  %v8496_v4 = vpack.i.bf16 %v4080_v34, %v4079_v52  ;;  %v4141_v58 = vld [vmem:[%s8937_s0 + $0x300] sm:$0xff] }
 0x1ce   :  { %5581 = vrot.lane.b32.xlu0 %v8359_v28, %s5743_s12  ;;  %v2871_v28 = vsel %vm2842_vm5, %v9179_v56, %v5273_v50  ;;  %v3003_v43 = vsel %vm2972_vm7, %v2938_v3, %v5298_v54  ;;  %v3004_v48 = vsel %vm2972_vm7, %v2939_v49, %v5299_v39  ;;  %v4207_v50 = vld [vmem:[%s8937_s0 + $0x319] sm:$0xff]  ;;  %v5640_v46 = vpack.i.bf16 %v4142_v24, %v4141_v58  ;;  %v9182_v3 = vld [vmem:[#allocation19_spill] sm:$0xff] }
 0x1cf   :  { %v5307_v30 = vpop.permute.xlu1 %5306  ;;  %v2936_v18 = vsel %vm2907_vm6, %v2871_v28, %v5283_v15  ;;  %v3002_v41 = vsel %vm2972_vm7, %v2937_v17, %v5294_v38  ;;  %v9183_v17 = vld [vmem:[#allocation22_spill] sm:$0xff] }
 0x1d0   :  { %v5302_v59 = vpop.permute.xlu0 %5301  ;;  %v5309_v11 = vunpack.i.h.bf16 %v5307_v30  ;;  %v5308_v13 = vunpack.i.l.bf16 %v5307_v30  ;;  %v3001_v40 = vsel %vm2972_vm7, %v2936_v18, %v5293_v9  ;;  %v8527_v9 = vpack.i.bf16 %v4272_v37, %v4271_v0  ;;  %v4084_v0 = vld [vmem:[%s8937_s0 + $0x33a] sm:$0xff] }
 0x1d1   :  { %5596 = vrot.lane.b32.xlu1 %v5595_v26, %s5744_s19  ;;  %v5304_v16 = vunpack.i.h.bf16 %v5302_v59  ;;  %v5303_v42 = vunpack.i.l.bf16 %v5302_v59 }
 0x1d2   :  { %5591 = vrot.lane.b32.xlu0 %v5590_v1, %s5744_s19  ;;  %v3068_v63 = vsel %vm3037_vm8, %v3003_v43, %v5308_v13  ;;  %v3069_v36 = vsel %vm3037_vm8, %v3004_v48, %v5309_v11  ;;  %v4208_v1 = vld [vmem:[%s8937_s0 + $0x321] sm:$0xff]  ;;  %v9181_v11 = vld [vmem:[#allocation16_spill] sm:$0xff]  ;;  %v9184_v43 = vld [vmem:[#allocation25_spill] sm:$0xff] }
 0x1d3   :  { %v5317_v53 = vpop.permute.xlu1 %5316  ;;  %v3066_v51 = vsel %vm3037_vm8, %v3001_v40, %v5303_v42  ;;  %v3067_v2 = vsel %vm3037_vm8, %v3002_v41, %v5304_v16  ;;  %v5655_v38 = vpack.i.bf16 %v4208_v1, %v4207_v50  ;;  %v4083_v1 = vld [vmem:[%s8937_s0 + $0x332] sm:$0xff] }
 0x1d4   :  { %v5319_v21 = vunpack.i.h.bf16 %v5317_v53  ;;  %v5318_v19 = vunpack.i.l.bf16 %v5317_v53  ;;  %v5312_v8 = vpop.permute.xlu0 %5311 }
 0x1d5   :  { %v5314_v44 = vunpack.i.h.bf16 %v5312_v8  ;;  %v5313_v47 = vunpack.i.l.bf16 %v5312_v8  ;;  %5606 = vrot.lane.b32.xlu1 %v5605_v7, %s5745_s1 }
 0x1d6   :  { %v3133_v10 = vsel %vm3102_vm9, %v3068_v63, %v5318_v19  ;;  %v3134_v60 = vsel %vm3102_vm9, %v3069_v36, %v5319_v21  ;;  %5601 = vrot.lane.b32.xlu0 %v8398_v57, %s5745_s1  ;;  %v8482_v57 = vpack.i.bf16 %v4016_v12, %v4015_v61 }
 0x1d7   :  { %v3182_v31 = vpack.c.bf16 %v3134_v60, %v3133_v10  ;;  %v3131_v5 = vsel %vm3102_vm9, %v3066_v51, %v5313_v47  ;;  %v3132_v35 = vsel %vm3102_vm9, %v3067_v2, %v5314_v44  ;;  %v5327_v27 = vpop.permute.xlu1 %5326 }
 0x1d8   :  { %v3181_v23 = vpack.c.bf16 %v3132_v35, %v3131_v5  ;;  %v5322_v45 = vpop.permute.xlu0 %5321  ;;  %v5328_v25 = vunpack.i.l.bf16 %v5327_v27 }
 0x1d9   :  { %5616 = vrot.lane.b32.xlu1 %v8443_v62, %s5746_s20  ;;  %v5324_v39 = vunpack.i.h.bf16 %v5322_v45  ;;  %v5323_v54 = vunpack.i.l.bf16 %v5322_v45 }
 0x1da   :  { %5611 = vrot.lane.b32.xlu0 %v8412_v6, %s5746_s20  ;;  %4383 = vmatprep.mubr.msk.bf16.mxu0 %vm3221_vm10, %v3181_v23  ;;  %v4143_v6 = vld [vmem:[%s8937_s0 + $0x318] sm:$0xff]  ;;  %v2877_v13 = vsel %vm2842_vm5, %v9181_v11, %v5328_v25  ;;  %v8580_v25 = vpack.i.bf16 %v4084_v0, %v4083_v1 }
 0x1db   :  { %4384 = vmatmul.mubr.msk.bf16.gmra.mxu0 %vm3221_vm10, %v3182_v31  ;;  %v5337_v29 = vpop.permute.xlu1 %5336  ;;  %v5645_v30 = vpack.i.bf16 %v4144_v20, %v4143_v6  ;;  %v2876_v48 = vsel %vm2842_vm5, %v9184_v43, %v5324_v39  ;;  %v4145_v39 = vld [vmem:[%s8937_s0 + $0x330] sm:$0xff] }
 0x1dc   :  { %v5332_v55 = vpop.permute.xlu0 %5331  ;;  %v5339_v32 = vunpack.i.h.bf16 %v5337_v29  ;;  %v5338_v22 = vunpack.i.l.bf16 %v5337_v29  ;;  %v4019_v29 = vld [vmem:[%s8937_s0 + $0x331] sm:$0xff] }
 0x1dd   :  { %5626 = vrot.lane.b32.xlu1 %v8482_v57, %s5741_s8  ;;  %v5334_v59 = vunpack.i.h.bf16 %v5332_v55  ;;  %v5333_v56 = vunpack.i.l.bf16 %v5332_v55  ;;  %v4020_v55 = vld [vmem:[%s8937_s0 + $0x339] sm:$0xff] }
 0x1de   :  { %5621 = vrot.lane.b32.xlu0 %v5605_v7, %s5741_s8  ;;  %v5329_v7 = vunpack.i.h.bf16 %v5327_v27  ;;  %v2942_v41 = vsel %vm2907_vm6, %v2877_v13, %v5338_v22  ;;  %v4275_v22 = vld [vmem:[%s8937_s0 + $0x34a] sm:$0xff] }
 0x1df   :  { %v5347_v26 = vpop.permute.xlu1 %5346  ;;  %v2941_v36 = vsel %vm2907_vm6, %v2876_v48, %v5334_v59 }
 0x1e0   :  { %v5342_v15 = vpop.permute.xlu0 %5341  ;;  %v5349_v28 = vunpack.i.h.bf16 %v5347_v26  ;;  %v5348_v33 = vunpack.i.l.bf16 %v5347_v26  ;;  %v2878_v49 = vsel %vm2842_vm5, %v9182_v3, %v5329_v7 }
 0x1e1   :  { %5636 = vrot.lane.b32.xlu1 %v8496_v4, %s5743_s12  ;;  %v5344_v16 = vunpack.i.h.bf16 %v5342_v15  ;;  %v5343_v42 = vunpack.i.l.bf16 %v5342_v15  ;;  %v2943_v21 = vsel %vm2907_vm6, %v2878_v49, %v5339_v32  ;;  %v4148_v15 = vld [vmem:[%s8937_s0 + $0x350] sm:$0xff] }
 0x1e2   :  { %5631 = vrot.lane.b32.xlu0 %v8443_v62, %s5743_s12  ;;  %v2875_v62 = vsel %vm2842_vm5, %v9183_v17, %v5323_v54  ;;  %v3007_v44 = vsel %vm2972_vm7, %v2942_v41, %v5348_v33  ;;  %v3008_v47 = vsel %vm2972_vm7, %v2943_v21, %v5349_v28  ;;  %v4146_v54 = vld [vmem:[%s8937_s0 + $0x338] sm:$0xff] }
 0x1e3   :  { %v5357_v14 = vpop.permute.xlu1 %5356  ;;  %v2940_v63 = vsel %vm2907_vm6, %v2875_v62, %v5333_v56  ;;  %v3006_v10 = vsel %vm2972_vm7, %v2941_v36, %v5344_v16  ;;  %v4212_v32 = vld [vmem:[%s8937_s0 + $0x351] sm:$0xff]  ;;  %v5690_v13 = vpack.i.bf16 %v4146_v54, %v4145_v39  ;;  %v9187_v36 = vld [vmem:[#allocation23_spill] sm:$0xff] }
 0x1e4   :  { %v5352_v18 = vpop.permute.xlu0 %5351  ;;  %v5359_v53 = vunpack.i.h.bf16 %v5357_v14  ;;  %v5358_v40 = vunpack.i.l.bf16 %v5357_v14  ;;  %v3005_v2 = vsel %vm2972_vm7, %v2940_v63, %v5343_v42  ;;  %v9186_v41 = vld [vmem:[#allocation33_spill] sm:$0xff] }
 0x1e5   :  { %5646 = vrot.lane.b32.xlu1 %v5645_v30, %s5744_s19  ;;  %v5354_v19 = vunpack.i.h.bf16 %v5352_v18  ;;  %v5353_v8 = vunpack.i.l.bf16 %v5352_v18  ;;  %v4211_v30 = vld [vmem:[%s8937_s0 + $0x349] sm:$0xff] }
 0x1e6   :  { %5641 = vrot.lane.b32.xlu0 %v5640_v46, %s5744_s19  ;;  %v3072_v31 = vsel %vm3037_vm8, %v3007_v44, %v5358_v40  ;;  %v3073_v5 = vsel %vm3037_vm8, %v3008_v47, %v5359_v53  ;;  %v5705_v16 = vpack.i.bf16 %v4212_v32, %v4211_v30  ;;  %v9185_v53 = vld [vmem:[#allocation32_spill] sm:$0xff] }
 0x1e7   :  { %v5367_v51 = vpop.permute.xlu1 %5366  ;;  %v3070_v23 = vsel %vm3037_vm8, %v3005_v2, %v5353_v8  ;;  %v3071_v45 = vsel %vm3037_vm8, %v3006_v10, %v5354_v19 }
 0x1e8   :  { %v5369_v60 = vunpack.i.h.bf16 %v5367_v51  ;;  %v5368_v61 = vunpack.i.l.bf16 %v5367_v51  ;;  %v5362_v12 = vpop.permute.xlu0 %5361 }
 0x1e9   :  { %v5364_v35 = vunpack.i.h.bf16 %v5362_v12  ;;  %v5363_v27 = vunpack.i.l.bf16 %v5362_v12  ;;  %5656 = vrot.lane.b32.xlu1 %v5655_v38, %s5745_s1 }
 0x1ea   :  { %v3137_v52 = vsel %vm3102_vm9, %v3072_v31, %v5368_v61  ;;  %v3138_v34 = vsel %vm3102_vm9, %v3073_v5, %v5369_v60  ;;  %5651 = vrot.lane.b32.xlu0 %v8482_v57, %s5745_s1  ;;  %v8566_v57 = vpack.i.bf16 %v4020_v55, %v4019_v29 }
 0x1eb   :  { %v3184_v6 = vpack.c.bf16 %v3138_v34, %v3137_v52  ;;  %v3135_v20 = vsel %vm3102_vm9, %v3070_v23, %v5363_v27  ;;  %v3136_v58 = vsel %vm3102_vm9, %v3071_v45, %v5364_v35  ;;  %v5377_v24 = vpop.permute.xlu1 %5376 }
 0x1ec   :  { %v3183_v50 = vpack.c.bf16 %v3136_v58, %v3135_v20  ;;  %v5372_v26 = vpop.permute.xlu0 %5371  ;;  %v5379_v59 = vunpack.i.h.bf16 %v5377_v24  ;;  %v5378_v56 = vunpack.i.l.bf16 %v5377_v24 }
 0x1ed   :  { %5666 = vrot.lane.b32.xlu1 %v8527_v9, %s5746_s20  ;;  %v5374_v33 = vunpack.i.h.bf16 %v5372_v26  ;;  %v5373_v14 = vunpack.i.l.bf16 %v5372_v26 }
 0x1ee   :  { %5661 = vrot.lane.b32.xlu0 %v8496_v4, %s5746_s20  ;;  %4387 = vmatprep.mubr.msk.bf16.mxu0 %vm3221_vm10, %v3183_v50  ;;  %v4147_v4 = vld [vmem:[%s8937_s0 + $0x348] sm:$0xff]  ;;  %v2881_v40 = vsel %vm2842_vm5, %v9185_v53, %v5378_v56  ;;  %v2882_v21 = vsel %vm2842_vm5, %v9186_v41, %v5379_v59 }
 0x1ef   :  { %4388 = vmatmul.mubr.msk.bf16.gmra.mxu0 %vm3221_vm10, %v3184_v6  ;;  %v5387_v37 = vpop.permute.xlu1 %5386  ;;  %v5695_v11 = vpack.i.bf16 %v4148_v15, %v4147_v4  ;;  %v2879_v44 = vsel %vm2842_vm5, %v9187_v36, %v5373_v14 }
 0x1f0   :  { %v5382_v7 = vpop.permute.xlu0 %5381  ;;  %v5389_v3 = vunpack.i.h.bf16 %v5387_v37  ;;  %v5388_v49 = vunpack.i.l.bf16 %v5387_v37 }
 0x1f1   :  { %5676 = vrot.lane.b32.xlu1 %v8566_v57, %s5741_s8  ;;  %v5384_v18 = vunpack.i.h.bf16 %v5382_v7  ;;  %v5383_v17 = vunpack.i.l.bf16 %v5382_v7 }
 0x1f2   :  { %5671 = vrot.lane.b32.xlu0 %v5655_v38, %s5741_s8  ;;  %v4276_v38 = vld [vmem:[%s8937_s0 + $0x352] sm:$0xff]  ;;  %v2946_v10 = vsel %vm2907_vm6, %v2881_v40, %v5388_v49  ;;  %v2947_v60 = vsel %vm2907_vm6, %v2882_v21, %v5389_v3  ;;  %v9192_v40 = vld [vmem:[#allocation30_spill] sm:$0xff] }
 0x1f3   :  { %v5397_v46 = vpop.permute.xlu1 %5396  ;;  %v5715_v42 = vpack.i.bf16 %v4276_v38, %v4275_v22  ;;  %v2944_v31 = vsel %vm2907_vm6, %v2879_v44, %v5383_v17 }
 0x1f4   :  { %v5392_v28 = vpop.permute.xlu0 %5391  ;;  %v5399_v62 = vunpack.i.h.bf16 %v5397_v46  ;;  %v5398_v43 = vunpack.i.l.bf16 %v5397_v46 }
 0x1f5   :  { %5686 = vrot.lane.b32.xlu1 %v8580_v25, %s5743_s12  ;;  %v5394_v19 = vunpack.i.h.bf16 %v5392_v28  ;;  %v5393_v8 = vunpack.i.l.bf16 %v5392_v28 }
 0x1f6   :  { %5681 = vrot.lane.b32.xlu0 %v8527_v9, %s5743_s12  ;;  %v9188_v9 = vld [vmem:[#allocation24_spill] sm:$0xff]  ;;  %v3011_v35 = vsel %vm2972_vm7, %v2946_v10, %v5398_v43  ;;  %v3012_v27 = vsel %vm2972_vm7, %v2947_v60, %v5399_v62 }
 0x1f7   :  { %v5407_v48 = vpop.permute.xlu1 %5406  ;;  %v2880_v47 = vsel %vm2842_vm5, %v9188_v9, %v5374_v33  ;;  %v3009_v45 = vsel %vm2972_vm7, %v2944_v31, %v5393_v8 }
 0x1f8   :  { %v5402_v63 = vpop.permute.xlu0 %5401  ;;  %v5409_v51 = vunpack.i.h.bf16 %v5407_v48  ;;  %v5408_v2 = vunpack.i.l.bf16 %v5407_v48  ;;  %v2945_v5 = vsel %vm2907_vm6, %v2880_v47, %v5384_v18  ;;  %v9191_v48 = vld [vmem:[#allocation29_spill] sm:$0xff] }
 0x1f9   :  { %5696 = vrot.lane.b32.xlu1 %v5695_v11, %s5744_s19  ;;  %v5404_v61 = vunpack.i.h.bf16 %v5402_v63  ;;  %v5403_v12 = vunpack.i.l.bf16 %v5402_v63  ;;  %v3010_v52 = vsel %vm2972_vm7, %v2945_v5, %v5394_v19 }
 0x1fa   :  { %5691 = vrot.lane.b32.xlu0 %v5690_v13, %s5744_s19  ;;  %v3076_v6 = vsel %vm3037_vm8, %v3011_v35, %v5408_v2  ;;  %v3077_v20 = vsel %vm3037_vm8, %v3012_v27, %v5409_v51 }
 0x1fb   :  { %v5417_v23 = vpop.permute.xlu1 %5416  ;;  %v3074_v1 = vsel %vm3037_vm8, %v3009_v45, %v5403_v12  ;;  %v3075_v0 = vsel %vm3037_vm8, %v3010_v52, %v5404_v61 }
 0x1fc   :  { %v5419_v34 = vunpack.i.h.bf16 %v5417_v23  ;;  %v5418_v29 = vunpack.i.l.bf16 %v5417_v23  ;;  %v5412_v55 = vpop.permute.xlu0 %5411 }
 0x1fd   :  { %v5414_v58 = vunpack.i.h.bf16 %v5412_v55  ;;  %v5413_v24 = vunpack.i.l.bf16 %v5412_v55  ;;  %5706 = vrot.lane.b32.xlu1 %v5705_v16, %s5745_s1 }
 0x1fe   :  { %v3141_v50 = vsel %vm3102_vm9, %v3076_v6, %v5418_v29  ;;  %v3142_v26 = vsel %vm3102_vm9, %v3077_v20, %v5419_v34  ;;  %5701 = vrot.lane.b32.xlu0 %v8566_v57, %s5745_s1 }
 0x1ff   :  { %v3186_v37 = vpack.c.bf16 %v3142_v26, %v3141_v50  ;;  %v5427_v7 = vpop.permute.xlu1 %5426  ;;  %v3139_v4 = vsel %vm3102_vm9, %v3074_v1, %v5413_v24  ;;  %v3140_v15 = vsel %vm3102_vm9, %v3075_v0, %v5414_v58 }
 0x200   :  { %v5422_v39 = vpop.permute.xlu0 %5421  ;;  %v3185_v54 = vpack.c.bf16 %v3140_v15, %v3139_v4  ;;  %v5429_v32 = vunpack.i.h.bf16 %v5427_v7  ;;  %v5428_v22 = vunpack.i.l.bf16 %v5427_v7 }
 0x201   :  { %5716 = vrot.lane.b32.xlu1 %v5715_v42, %s5746_s20  ;;  %v5424_v59 = vunpack.i.h.bf16 %v5422_v39  ;;  %v5423_v56 = vunpack.i.l.bf16 %v5422_v39  ;;  %v9190_v42 = vld [vmem:[#allocation39_spill] sm:$0xff] }
 0x202   :  { %5711 = vrot.lane.b32.xlu0 %v8580_v25, %s5746_s20  ;;  %4391 = vmatprep.mubr.msk.bf16.mxu1 %vm3221_vm10, %v3185_v54  ;;  %v9189_v25 = vld [vmem:[#allocation38_spill] sm:$0xff]  ;;  %v2886_v18 = vsel %vm2842_vm5, %v9190_v42, %v5429_v32  ;;  %v9193_v32 = vld [vmem:[#allocation28_spill] sm:$0xff] }
 0x203   :  { %4392 = vmatmul.mubr.msk.bf16.vlgmr.msra.gmra.mxu1 %vm3221_vm10, %v3186_v37  ;;  %v5437_v57 = vpop.permute.xlu1 %5436  ;;  %v2885_v16 = vsel %vm2842_vm5, %v9189_v25, %v5428_v22  ;;  %v2883_v53 = vsel %vm2842_vm5, %v9191_v48, %v5423_v56  ;;  %v2884_v41 = vsel %vm2842_vm5, %v9192_v40, %v5424_v59  ;;  %v8674_v54 = vld [vmem:[%s8939_s2] ss:$0 sm:$0xff]  ;;  %v9196_v25 = vld [vmem:[#allocation37_spill] sm:$0xff] }
 0x204   :  { %v5432_v30 = vpop.permute.xlu0 %5431  ;;  %v5439_v28 = vunpack.i.h.bf16 %v5437_v57  ;;  %v5438_v33 = vunpack.i.l.bf16 %v5437_v57 }
 0x205   :  { %v5434_v14 = vunpack.i.h.bf16 %v5432_v30  ;;  %v5433_v11 = vunpack.i.l.bf16 %v5432_v30 }
 0x206   :  { %v2950_v8 = vsel %vm2907_vm6, %v2885_v16, %v5438_v33  ;;  %v2951_v63 = vsel %vm2907_vm6, %v2886_v18, %v5439_v28 }
 0x207   :  { %v5447_v46 = vpop.permute.xlu1 %5446  ;;  %v2948_v9 = vsel %vm2907_vm6, %v2883_v53, %v5433_v11  ;;  %v2949_v47 = vsel %vm2907_vm6, %v2884_v41, %v5434_v14  ;;  %v9195_v14 = vld [vmem:[#allocation34_spill] sm:$0xff] }
 0x208   :  { %v5442_v38 = vpop.permute.xlu0 %5441  ;;  %v5449_v13 = vunpack.i.h.bf16 %v5447_v46  ;;  %v5448_v3 = vunpack.i.l.bf16 %v5447_v46 }
 0x209   :  { %v5444_v17 = vunpack.i.h.bf16 %v5442_v38  ;;  %v5443_v62 = vunpack.i.l.bf16 %v5442_v38  ;;  %v9194_v38 = vld [vmem:[#allocation31_spill] sm:$0xff] }
 0x20a   :  { %v3015_v51 = vsel %vm2972_vm7, %v2950_v8, %v5448_v3  ;;  %v3016_v2 = vsel %vm2972_vm7, %v2951_v63, %v5449_v13 }
 0x20b   :  { %v5457_v49 = vpop.permute.xlu1 %5456  ;;  %v3013_v60 = vsel %vm2972_vm7, %v2948_v9, %v5443_v62  ;;  %v3014_v61 = vsel %vm2972_vm7, %v2949_v47, %v5444_v17 }
 0x20c   :  { %v5452_v43 = vpop.permute.xlu0 %5451  ;;  %v5459_v21 = vunpack.i.h.bf16 %v5457_v49  ;;  %v5458_v19 = vunpack.i.l.bf16 %v5457_v49 }
 0x20d   :  { %v5454_v36 = vunpack.i.h.bf16 %v5452_v43  ;;  %v5453_v44 = vunpack.i.l.bf16 %v5452_v43 }
 0x20e   :  { %v3080_v35 = vsel %vm3037_vm8, %v3015_v51, %v5458_v19  ;;  %v3081_v27 = vsel %vm3037_vm8, %v3016_v2, %v5459_v21 }
 0x20f   :  { %v5467_v10 = vpop.permute.xlu1 %5466  ;;  %v3078_v52 = vsel %vm3037_vm8, %v3013_v60, %v5453_v44  ;;  %v3079_v34 = vsel %vm3037_vm8, %v3014_v61, %v5454_v36 }
 0x210   :  { %v5469_v12 = vunpack.i.h.bf16 %v5467_v10  ;;  %v5468_v31 = vunpack.i.l.bf16 %v5467_v10  ;;  %v5462_v5 = vpop.permute.xlu0 %5461 }
 0x211   :  { %v5464_v23 = vunpack.i.h.bf16 %v5462_v5  ;;  %v5463_v45 = vunpack.i.l.bf16 %v5462_v5 }
 0x212   :  { %v3145_v29 = vsel %vm3102_vm9, %v3080_v35, %v5468_v31  ;;  %v3146_v55 = vsel %vm3102_vm9, %v3081_v27, %v5469_v12 }
 0x213   :  { %v3188_v6 = vpack.c.bf16 %v3146_v55, %v3145_v29  ;;  %v3143_v20 = vsel %vm3102_vm9, %v3078_v52, %v5463_v45  ;;  %v3144_v58 = vsel %vm3102_vm9, %v3079_v34, %v5464_v23  ;;  %v5477_v24 = vpop.permute.xlu1 %5476 }
 0x214   :  { %v3187_v50 = vpack.c.bf16 %v3144_v58, %v3143_v20  ;;  %v5472_v26 = vpop.permute.xlu0 %5471  ;;  %v5479_v0 = vunpack.i.h.bf16 %v5477_v24  ;;  %v5478_v37 = vunpack.i.l.bf16 %v5477_v24 }
 0x215   :  { %v5473_v4 = vunpack.i.l.bf16 %v5472_v26  ;;  %v5474_v15 = vunpack.i.h.bf16 %v5472_v26 }
 0x216   :  { %4395 = vmatprep.mubr.msk.bf16.mxu1 %vm3221_vm10, %v3187_v50  ;;  %v2889_v22 = vsel %vm2842_vm5, %v9193_v32, %v5478_v37  ;;  %v2890_v59 = vsel %vm2842_vm5, %v9194_v38, %v5479_v0 }
 0x217   :  { %4396 = vmatmul.mubr.msk.bf16.gmra.mxu1 %vm3221_vm10, %v3188_v6  ;;  %v5487_v1 = vpop.permute.xlu1 %5486  ;;  %v2887_v11 = vsel %vm2842_vm5, %v9195_v14, %v5473_v4  ;;  %v2888_v16 = vsel %vm2842_vm5, %v9196_v25, %v5474_v15 }
 0x218   :  { %v5482_v7 = vpop.permute.xlu0 %5481  ;;  %v5489_v57 = vunpack.i.h.bf16 %v5487_v1  ;;  %v5488_v30 = vunpack.i.l.bf16 %v5487_v1 }
 0x219   :  { %v4357_v39 = vpop.f32.mrf.mxu0  ;;  %v5483_v56 = vunpack.i.l.bf16 %v5482_v7  ;;  %v5484_v13 = vunpack.i.h.bf16 %v5482_v7 }
 0x21a   :  { %v3368_v3 = vadd.f32 %v4357_v39, %v8674_v54  ;;  %v2954_v43 = vsel %vm2907_vm6, %v2889_v22, %v5488_v30  ;;  %v2955_v48 = vsel %vm2907_vm6, %v2890_v59, %v5489_v57 }
 0x21b   :  { %v5497_v46 = vpop.permute.xlu1 %5496  ;;  %v3359_v33 = vpop.f32.mrf.mxu0  ;;  %v2952_v21 = vsel %vm2907_vm6, %v2887_v11, %v5483_v56  ;;  %v2953_v9 = vsel %vm2907_vm6, %v2888_v16, %v5484_v13  ;;  %v9197_v16 = vld [vmem:[#allocation44_spill] sm:$0xff] }
 0x21c   :  { %v5492_v28 = vpop.permute.xlu0 %5491  ;;  %v3360_v49 = vadd.f32 %v8674_v54, %v3359_v33  ;;  %v5499_v42 = vunpack.i.h.bf16 %v5497_v46  ;;  %v5498_v18 = vunpack.i.l.bf16 %v5497_v46  ;;  %v3616_v47 = vmax.f32 %v3368_v3, 0.0 }
 0x21d   :  { %v5493_v17 = vunpack.i.l.bf16 %v5492_v28  ;;  %v4358_v62 = vpop.f32.mrf.mxu0  ;;  %v5494_v53 = vunpack.i.h.bf16 %v5492_v28 }
 0x21e   :  { %v3614_v40 = vmax.f32 %v3360_v49, 0.0  ;;  %v3371_v19 = vadd.f32 %v4358_v62, %v8674_v54  ;;  %v3019_v10 = vsel %vm2972_vm7, %v2954_v43, %v5498_v18  ;;  %v3020_v60 = vsel %vm2972_vm7, %v2955_v48, %v5499_v42  ;;  %v9198_v18 = vld [vmem:[#allocation45_spill] sm:$0xff]  ;;  %v9199_v62 = vld [vmem:[#allocation35_spill] sm:$0xff] }
 0x21f   :  { %v5507_v41 = vpop.permute.xlu1 %5506  ;;  %v3362_v44 = vpop.f32.mrf.mxu0  ;;  %v3017_v61 = vsel %vm2972_vm7, %v2952_v21, %v5493_v17  ;;  %v3018_v31 = vsel %vm2972_vm7, %v2953_v9, %v5494_v53  ;;  %v3682_v37 = vsel %vm3678_vm11, %v3616_v47, 0.0 }
 0x220   :  { %v5509_v8 = vunpack.i.h.bf16 %v5507_v41  ;;  %v5508_v63 = vunpack.i.l.bf16 %v5507_v41  ;;  %v5502_v36 = vpop.permute.xlu0 %5501  ;;  %v3363_v2 = vadd.f32 %v8674_v54, %v3362_v44  ;;  %v3679_v5 = vsel %vm3678_vm11, %v3614_v40, 0.0 }
 0x221   :  { %v5503_v51 = vunpack.i.l.bf16 %v5502_v36  ;;  %v5504_v12 = vunpack.i.h.bf16 %v5502_v36  ;;  %v3617_v35 = vmax.f32 %v3371_v19, 0.0  ;;  %v9200_v36 = vld [vmem:[#allocation36_spill] sm:$0xff] }
 0x222   :  { %v3615_v27 = vmax.f32 %v3363_v2, 0.0  ;;  %v3084_v45 = vsel %vm3037_vm8, %v3019_v10, %v5508_v63  ;;  %v3085_v52 = vsel %vm3037_vm8, %v3020_v60, %v5509_v8 }
 0x223   :  { %v5517_v23 = vpop.permute.xlu1 %5516  ;;  %v3082_v6 = vsel %vm3037_vm8, %v3017_v61, %v5503_v51  ;;  %v3083_v50 = vsel %vm3037_vm8, %v3018_v31, %v5504_v12  ;;  %v3684_v32 = vsel %vm3678_vm11, %v3617_v35, 0.0 }
 0x224   :  { %v5519_v34 = vunpack.i.h.bf16 %v5517_v23  ;;  %v5518_v29 = vunpack.i.l.bf16 %v5517_v23  ;;  %v5512_v55 = vpop.permute.xlu0 %5511  ;;  %v3680_v20 = vsel %vm3678_vm11, %v3615_v27, 0.0 }
 0x225   :  { %v5514_v58 = vunpack.i.h.bf16 %v5512_v55  ;;  %v5513_v24 = vunpack.i.l.bf16 %v5512_v55  ;;  %v3681_v26 = vadd.f32 %v3680_v20, %v3679_v5 }
 0x226   :  { %v3149_v1 = vsel %vm3102_vm9, %v3084_v45, %v5518_v29  ;;  %v3150_v0 = vsel %vm3102_vm9, %v3085_v52, %v5519_v34 }
 0x227   :  { %v3190_v7 = vpack.c.bf16 %v3150_v0, %v3149_v1  ;;  %v3147_v4 = vsel %vm3102_vm9, %v3082_v6, %v5513_v24  ;;  %v3148_v15 = vsel %vm3102_vm9, %v3083_v50, %v5514_v58  ;;  %v5527_v39 = vpop.permute.xlu1 %5526  ;;  %v3683_v57 = vadd.f32 %v3682_v37, %v3681_v26 }
 0x228   :  { %v3189_v30 = vpack.c.bf16 %v3148_v15, %v3147_v4  ;;  %v5522_v46 = vpop.permute.xlu0 %5521  ;;  %v5529_v59 = vunpack.i.h.bf16 %v5527_v39  ;;  %v5528_v56 = vunpack.i.l.bf16 %v5527_v39 }
 0x229   :  { %v3685_v38 = vadd.f32 %v3684_v32, %v3683_v57  ;;  %v5523_v28 = vunpack.i.l.bf16 %v5522_v46  ;;  %v5524_v3 = vunpack.i.h.bf16 %v5522_v46 }
 0x22a   :  { %v4361_v22 = vpop.f32.mrf.mxu0  ;;  %4399 = vmatprep.mubr.msk.bf16.mxu1 %vm3221_vm10, %v3189_v30  ;;  %v2893_v42 = vsel %vm2842_vm5, %v9197_v16, %v5528_v56  ;;  %v2894_v17 = vsel %vm2842_vm5, %v9198_v18, %v5529_v59 }
 0x22b   :  { %4400 = vmatmul.mubr.msk.bf16.gmra.mxu1 %vm3221_vm10, %v3190_v7  ;;  %v5537_v33 = vpop.permute.xlu1 %5536  ;;  %v3384_v14 = vadd.f32 %v4361_v22, %v8674_v54  ;;  %v2891_v43 = vsel %vm2842_vm5, %v9199_v62, %v5523_v28  ;;  %v2892_v44 = vsel %vm2842_vm5, %v9200_v36, %v5524_v3 }
 0x22c   :  { %v5532_v11 = vpop.permute.xlu0 %5531  ;;  %v3375_v13 = vpop.f32.mrf.mxu0  ;;  %v5539_v41 = vunpack.i.h.bf16 %v5537_v33  ;;  %v5538_v21 = vunpack.i.l.bf16 %v5537_v33 }
 0x22d   :  { %v3376_v49 = vadd.f32 %v8674_v54, %v3375_v13  ;;  %v3620_v40 = vmax.f32 %v3384_v14, 0.0  ;;  %v5533_v9 = vunpack.i.l.bf16 %v5532_v11  ;;  %v5534_v2 = vunpack.i.h.bf16 %v5532_v11 }
 0x22e   :  { %v4362_v25 = vpop.f32.mrf.mxu0  ;;  %v2958_v45 = vsel %vm2907_vm6, %v2893_v42, %v5538_v21  ;;  %v2959_v52 = vsel %vm2907_vm6, %v2894_v17, %v5539_v41 }
 0x22f   :  { %v3618_v48 = vmax.f32 %v3376_v49, 0.0  ;;  %v5547_v53 = vpop.permute.xlu1 %5546  ;;  %v3387_v19 = vadd.f32 %v4362_v25, %v8674_v54  ;;  %v3690_v23 = vsel %vm3678_vm11, %v3620_v40, 0.0  ;;  %v2956_v55 = vsel %vm2907_vm6, %v2891_v43, %v5533_v9 }
 0x230   :  { %v5542_v8 = vpop.permute.xlu0 %5541  ;;  %v3378_v63 = vpop.f32.mrf.mxu0  ;;  %v5549_v60 = vunpack.i.h.bf16 %v5547_v53  ;;  %v5548_v61 = vunpack.i.l.bf16 %v5547_v53  ;;  %v2957_v24 = vsel %vm2907_vm6, %v2892_v44, %v5534_v2 }
 0x231   :  { %v3686_v47 = vsel %vm3678_vm11, %v3618_v48, 0.0  ;;  %v3379_v51 = vadd.f32 %v8674_v54, %v3378_v63  ;;  %v3621_v12 = vmax.f32 %v3387_v19, 0.0  ;;  %v5544_v31 = vunpack.i.h.bf16 %v5542_v8 }
 0x232   :  { %v3687_v10 = vadd.f32 %v3686_v47, %v3685_v38  ;;  %v5543_v5 = vunpack.i.l.bf16 %v5542_v8  ;;  %v3023_v50 = vsel %vm2972_vm7, %v2958_v45, %v5548_v61  ;;  %v3024_v37 = vsel %vm2972_vm7, %v2959_v52, %v5549_v60  ;;  %v9201_v60 = vld [vmem:[#allocation50_spill] sm:$0xff] }
 0x233   :  { %v3619_v35 = vmax.f32 %v3379_v51, 0.0  ;;  %v5557_v27 = vpop.permute.xlu1 %5556  ;;  %v3692_v0 = vsel %vm3678_vm11, %v3621_v12, 0.0  ;;  %v3022_v4 = vsel %vm2972_vm7, %v2957_v24, %v5544_v31  ;;  %v9202_v12 = vld [vmem:[#allocation51_spill] sm:$0xff] }
 0x234   :  { %v5558_v34 = vunpack.i.l.bf16 %v5557_v27  ;;  %v5552_v29 = vpop.permute.xlu0 %5551  ;;  %v5559_v20 = vunpack.i.h.bf16 %v5557_v27  ;;  %v3021_v7 = vsel %vm2972_vm7, %v2956_v55, %v5543_v5 }
 0x235   :  { %v3688_v6 = vsel %vm3678_vm11, %v3619_v35, 0.0  ;;  %v5553_v58 = vunpack.i.l.bf16 %v5552_v29  ;;  %v5554_v1 = vunpack.i.h.bf16 %v5552_v29 }
 0x236   :  { %v3689_v26 = vadd.f32 %v3688_v6, %v3687_v10  ;;  %v3088_v57 = vsel %vm3037_vm8, %v3023_v50, %v5558_v34  ;;  %v3089_v22 = vsel %vm3037_vm8, %v3024_v37, %v5559_v20  ;;  %v9203_v34 = vld [vmem:[#allocation41_spill] sm:$0xff] }
 0x237   :  { %v5567_v15 = vpop.permute.xlu1 %5566  ;;  %v3086_v38 = vsel %vm3037_vm8, %v3021_v7, %v5553_v58  ;;  %v3087_v28 = vsel %vm3037_vm8, %v3022_v4, %v5554_v1 }
 0x238   :  { %v3691_v39 = vadd.f32 %v3690_v23, %v3689_v26  ;;  %v5569_v30 = vunpack.i.h.bf16 %v5567_v15  ;;  %v5568_v46 = vunpack.i.l.bf16 %v5567_v15  ;;  %v5562_v32 = vpop.permute.xlu0 %5561 }
 0x239   :  { %v5564_v59 = vunpack.i.h.bf16 %v5562_v32  ;;  %v5563_v56 = vunpack.i.l.bf16 %v5562_v32 }
 0x23a   :  { %v3153_v33 = vsel %vm3102_vm9, %v3088_v57, %v5568_v46  ;;  %v3154_v14 = vsel %vm3102_vm9, %v3089_v22, %v5569_v30  ;;  %v4365_v11 = vpop.f32.mrf.mxu0  ;;  %v3693_v13 = vadd.f32 %v3692_v0, %v3691_v39  ;;  %v9204_v0 = vld [vmem:[#allocation42_spill] sm:$0xff] }
 0x23b   :  { %v3192_v3 = vpack.c.bf16 %v3154_v14, %v3153_v33  ;;  %v3151_v49 = vsel %vm3102_vm9, %v3086_v38, %v5563_v56  ;;  %v3152_v25 = vsel %vm3102_vm9, %v3087_v28, %v5564_v59  ;;  %v5577_v16 = vpop.permute.xlu1 %5576  ;;  %v3400_v62 = vadd.f32 %v4365_v11, %v8674_v54 }
 0x23c   :  { %v3191_v42 = vpack.c.bf16 %v3152_v25, %v3151_v49  ;;  %v5572_v18 = vpop.permute.xlu0 %5571  ;;  %v3391_v17 = vpop.f32.mrf.mxu0  ;;  %v5579_v41 = vunpack.i.h.bf16 %v5577_v16  ;;  %v5578_v21 = vunpack.i.l.bf16 %v5577_v16 }
 0x23d   :  { %v3392_v43 = vadd.f32 %v8674_v54, %v3391_v17  ;;  %v3624_v63 = vmax.f32 %v3400_v62, 0.0  ;;  %v5573_v47 = vunpack.i.l.bf16 %v5572_v18  ;;  %v5574_v5 = vunpack.i.h.bf16 %v5572_v18 }
 0x23e   :  { %v4366_v48 = vpop.f32.mrf.mxu0  ;;  %4403 = vmatprep.mubr.msk.bf16.mxu1 %vm3221_vm10, %v3191_v42  ;;  %v2897_v61 = vsel %vm2842_vm5, %v9201_v60, %v5578_v21  ;;  %v2898_v31 = vsel %vm2842_vm5, %v9202_v12, %v5579_v41 }
 0x23f   :  { %v3622_v53 = vmax.f32 %v3392_v43, 0.0  ;;  %4404 = vmatmul.mubr.msk.bf16.gmra.mxu1 %vm3221_vm10, %v3192_v3  ;;  %v5587_v40 = vpop.permute.xlu1 %5586  ;;  %v3403_v44 = vadd.f32 %v4366_v48, %v8674_v54  ;;  %v3698_v27 = vsel %vm3678_vm11, %v3624_v63, 0.0  ;;  %v2895_v29 = vsel %vm2842_vm5, %v9203_v34, %v5573_v47 }
 0x240   :  { %v5582_v19 = vpop.permute.xlu0 %5581  ;;  %v3394_v8 = vpop.f32.mrf.mxu0  ;;  %v5588_v45 = vunpack.i.l.bf16 %v5587_v40  ;;  %v5589_v55 = vunpack.i.h.bf16 %v5587_v40  ;;  %v2896_v37 = vsel %vm2842_vm5, %v9204_v0, %v5574_v5 }
 0x241   :  { %v3694_v36 = vsel %vm3678_vm11, %v3622_v53, 0.0  ;;  %v3395_v9 = vadd.f32 %v8674_v54, %v3394_v8  ;;  %v3625_v23 = vmax.f32 %v3403_v44, 0.0  ;;  %v5583_v6 = vunpack.i.l.bf16 %v5582_v19 }
 0x242   :  { %v3695_v51 = vadd.f32 %v3694_v36, %v3693_v13  ;;  %v5584_v58 = vunpack.i.h.bf16 %v5582_v19  ;;  %v2962_v30 = vsel %vm2907_vm6, %v2897_v61, %v5588_v45  ;;  %v2963_v22 = vsel %vm2907_vm6, %v2898_v31, %v5589_v55 }
 0x243   :  { %v3623_v2 = vmax.f32 %v3395_v9, 0.0  ;;  %v5597_v10 = vpop.permute.xlu1 %5596  ;;  %v3700_v57 = vsel %vm3678_vm11, %v3625_v23, 0.0  ;;  %v2960_v38 = vsel %vm2907_vm6, %v2895_v29, %v5583_v6 }
 0x244   :  { %v5592_v35 = vpop.permute.xlu0 %5591  ;;  %v5599_v24 = vunpack.i.h.bf16 %v5597_v10  ;;  %v5598_v50 = vunpack.i.l.bf16 %v5597_v10  ;;  %v2961_v28 = vsel %vm2907_vm6, %v2896_v37, %v5584_v58 }
 0x245   :  { %v3696_v52 = vsel %vm3678_vm11, %v3623_v2, 0.0  ;;  %v5593_v26 = vunpack.i.l.bf16 %v5592_v35  ;;  %v5594_v4 = vunpack.i.h.bf16 %v5592_v35 }
 0x246   :  { %v3697_v20 = vadd.f32 %v3696_v52, %v3695_v51  ;;  %v3027_v33 = vsel %vm2972_vm7, %v2962_v30, %v5598_v50  ;;  %v3028_v14 = vsel %vm2972_vm7, %v2963_v22, %v5599_v24  ;;  %v9205_v22 = vld [vmem:[#allocation40_spill] sm:$0xff] }
 0x247   :  { %v5607_v1 = vpop.permute.xlu1 %5606  ;;  %v3025_v11 = vsel %vm2972_vm7, %v2960_v38, %v5593_v26  ;;  %v3026_v49 = vsel %vm2972_vm7, %v2961_v28, %v5594_v4 }
 0x248   :  { %v3699_v7 = vadd.f32 %v3698_v27, %v3697_v20  ;;  %v5608_v15 = vunpack.i.l.bf16 %v5607_v1  ;;  %v5602_v39 = vpop.permute.xlu0 %5601  ;;  %v5609_v46 = vunpack.i.h.bf16 %v5607_v1 }
 0x249   :  { %v5603_v32 = vunpack.i.l.bf16 %v5602_v39  ;;  %v5604_v59 = vunpack.i.h.bf16 %v5602_v39 }
 0x24a   :  { %v3701_v56 = vadd.f32 %v3700_v57, %v3699_v7  ;;  %v3092_v25 = vsel %vm3037_vm8, %v3027_v33, %v5608_v15  ;;  %v3093_v17 = vsel %vm3037_vm8, %v3028_v14, %v5609_v46 }
 0x24b   :  { %v4369_v13 = vpop.f32.mrf.mxu0  ;;  %v5617_v3 = vpop.permute.xlu1 %5616  ;;  %v3090_v62 = vsel %vm3037_vm8, %v3025_v11, %v5603_v32  ;;  %v3091_v40 = vsel %vm3037_vm8, %v3026_v49, %v5604_v59  ;;  %v9206_v59 = vld [vmem:[#allocation43_spill] sm:$0xff]  ;;  %v9207_v11 = vld [vmem:[#allocation52_spill] sm:$0xff] }
 0x24c   :  { %v5619_v16 = vunpack.i.h.bf16 %v5617_v3  ;;  %v5618_v42 = vunpack.i.l.bf16 %v5617_v3  ;;  %v5612_v18 = vpop.permute.xlu0 %5611  ;;  %v3416_v47 = vadd.f32 %v4369_v13, %v8674_v54  ;;  %v9208_v3 = vld [vmem:[#allocation53_spill] sm:$0xff] }
 0x24d   :  { %v5614_v43 = vunpack.i.h.bf16 %v5612_v18  ;;  %v5613_v48 = vunpack.i.l.bf16 %v5612_v18  ;;  %v3407_v53 = vpop.f32.mrf.mxu0 }
 0x24e   :  { %v3157_v41 = vsel %vm3102_vm9, %v3092_v25, %v5618_v42  ;;  %v3158_v21 = vsel %vm3102_vm9, %v3093_v17, %v5619_v16  ;;  %v3408_v19 = vadd.f32 %v8674_v54, %v3407_v53  ;;  %v3628_v27 = vmax.f32 %v3416_v47, 0.0 }
 0x24f   :  { %v3194_v8 = vpack.c.bf16 %v3158_v21, %v3157_v41  ;;  %v3155_v63 = vsel %vm3102_vm9, %v3090_v62, %v5613_v48  ;;  %v3156_v36 = vsel %vm3102_vm9, %v3091_v40, %v5614_v43  ;;  %v4370_v44 = vpop.f32.mrf.mxu0  ;;  %v5627_v9 = vpop.permute.xlu1 %5626 }
 0x250   :  { %v3193_v51 = vpack.c.bf16 %v3156_v36, %v3155_v63  ;;  %v3626_v2 = vmax.f32 %v3408_v19, 0.0  ;;  %v5622_v10 = vpop.permute.xlu0 %5621  ;;  %v3419_v60 = vadd.f32 %v4370_v44, %v8674_v54  ;;  %v3706_v6 = vsel %vm3678_vm11, %v3628_v27, 0.0 }
 0x251   :  { %v3410_v61 = vpop.f32.mrf.mxu0  ;;  %v5629_v20 = vunpack.i.h.bf16 %v5627_v9  ;;  %v5628_v58 = vunpack.i.l.bf16 %v5627_v9  ;;  %v5624_v26 = vunpack.i.h.bf16 %v5622_v10  ;;  %v5623_v1 = vunpack.i.l.bf16 %v5622_v10 }
 0x252   :  { %v3702_v12 = vsel %vm3678_vm11, %v3626_v2, 0.0  ;;  %v3411_v31 = vadd.f32 %v8674_v54, %v3410_v61  ;;  %4407 = vmatprep.mubr.msk.bf16.mxu1 %vm3221_vm10, %v3193_v51  ;;  %v3629_v52 = vmax.f32 %v3419_v60, 0.0 }
 0x253   :  { %v3703_v5 = vadd.f32 %v3702_v12, %v3701_v56  ;;  %4408 = vmatmul.mubr.msk.bf16.gmra.mxu1 %vm3221_vm10, %v3194_v8  ;;  %v5637_v35 = vpop.permute.xlu1 %5636  ;;  %v2901_v38 = vsel %vm2842_vm5, %v9205_v22, %v5628_v58  ;;  %v2902_v56 = vsel %vm2842_vm5, %v9206_v59, %v5629_v20  ;;  %v2899_v13 = vsel %vm2842_vm5, %v9207_v11, %v5623_v1 }
 0x254   :  { %v3627_v23 = vmax.f32 %v3411_v31, 0.0  ;;  %v5632_v45 = vpop.permute.xlu0 %5631  ;;  %v3708_v50 = vsel %vm3678_vm11, %v3629_v52, 0.0  ;;  %v5639_v37 = vunpack.i.h.bf16 %v5637_v35  ;;  %v5638_v7 = vunpack.i.l.bf16 %v5637_v35 }
 0x255   :  { %v5634_v4 = vunpack.i.h.bf16 %v5632_v45  ;;  %v5633_v15 = vunpack.i.l.bf16 %v5632_v45  ;;  %v2900_v49 = vsel %vm2842_vm5, %v9208_v3, %v5624_v26 }
 0x256   :  { %v3704_v34 = vsel %vm3678_vm11, %v3627_v23, 0.0  ;;  %v2966_v42 = vsel %vm2907_vm6, %v2901_v38, %v5638_v7  ;;  %v2967_v18 = vsel %vm2907_vm6, %v2902_v56, %v5639_v37 }
 0x257   :  { %v3705_v29 = vadd.f32 %v3704_v34, %v3703_v5  ;;  %v5647_v55 = vpop.permute.xlu1 %5646  ;;  %v2964_v17 = vsel %vm2907_vm6, %v2899_v13, %v5633_v15  ;;  %v2965_v43 = vsel %vm2907_vm6, %v2900_v49, %v5634_v4 }
 0x258   :  { %v5642_v24 = vpop.permute.xlu0 %5641  ;;  %v5649_v39 = vunpack.i.h.bf16 %v5647_v55  ;;  %v5648_v57 = vunpack.i.l.bf16 %v5647_v55 }
 0x259   :  { %v3707_v0 = vadd.f32 %v3706_v6, %v3705_v29  ;;  %v5643_v30 = vunpack.i.l.bf16 %v5642_v24  ;;  %v5644_v28 = vunpack.i.h.bf16 %v5642_v24 }
 0x25a   :  { %v3031_v48 = vsel %vm2972_vm7, %v2966_v42, %v5648_v57  ;;  %v3032_v53 = vsel %vm2972_vm7, %v2967_v18, %v5649_v39  ;;  %v9209_v42 = vld [vmem:[#allocation47_spill] sm:$0xff] }
 0x25b   :  { %v5657_v46 = vpop.permute.xlu1 %5656  ;;  %v3709_v32 = vadd.f32 %v3708_v50, %v3707_v0  ;;  %v3029_v40 = vsel %vm2972_vm7, %v2964_v17, %v5643_v30  ;;  %v3030_v19 = vsel %vm2972_vm7, %v2965_v43, %v5644_v28  ;;  %v9210_v17 = vld [vmem:[#allocation48_spill] sm:$0xff] }
 0x25c   :  { %v5658_v33 = vunpack.i.l.bf16 %v5657_v46  ;;  %v5652_v14 = vpop.permute.xlu0 %5651  ;;  %v5659_v25 = vunpack.i.h.bf16 %v5657_v46 }
 0x25d   :  { %v5653_v16 = vunpack.i.l.bf16 %v5652_v14  ;;  %v5654_v62 = vunpack.i.h.bf16 %v5652_v14 }
 0x25e   :  { %v3096_v8 = vsel %vm3037_vm8, %v3031_v48, %v5658_v33  ;;  %v3097_v9 = vsel %vm3037_vm8, %v3032_v53, %v5659_v25 }
 0x25f   :  { %v4373_v41 = vpop.f32.mrf.mxu0  ;;  %v5667_v21 = vpop.permute.xlu1 %5666  ;;  %v3094_v47 = vsel %vm3037_vm8, %v3029_v40, %v5653_v16  ;;  %v3095_v60 = vsel %vm3037_vm8, %v3030_v19, %v5654_v62  ;;  %v9211_v40 = vld [vmem:[#allocation11_spill] sm:$0xff] }
 0x260   :  { %v5669_v63 = vunpack.i.h.bf16 %v5667_v21  ;;  %v5668_v36 = vunpack.i.l.bf16 %v5667_v21  ;;  %v5662_v44 = vpop.permute.xlu0 %5661  ;;  %v3432_v52 = vadd.f32 %v4373_v41, %v8674_v54  ;;  %v9212_v21 = vld [vmem:[#allocation10_spill] sm:$0xff] }
 0x261   :  { %v5664_v51 = vunpack.i.h.bf16 %v5662_v44  ;;  %v5663_v2 = vunpack.i.l.bf16 %v5662_v44  ;;  %v3423_v10 = vpop.f32.mrf.mxu0 }
 0x262   :  { %v3161_v61 = vsel %vm3102_vm9, %v3096_v8, %v5668_v36  ;;  %v3162_v12 = vsel %vm3102_vm9, %v3097_v9, %v5669_v63  ;;  %v3424_v31 = vadd.f32 %v8674_v54, %v3423_v10  ;;  %v3632_v1 = vmax.f32 %v3432_v52, 0.0 }
 0x263   :  { %v3196_v5 = vpack.c.bf16 %v3162_v12, %v3161_v61  ;;  %v3159_v35 = vsel %vm3102_vm9, %v3094_v47, %v5663_v2  ;;  %v3160_v27 = vsel %vm3102_vm9, %v3095_v60, %v5664_v51  ;;  %v4374_v23 = vpop.f32.mrf.mxu0  ;;  %v5677_v45 = vpop.permute.xlu1 %5676 }
 0x264   :  { %v3195_v34 = vpack.c.bf16 %v3160_v27, %v3159_v35  ;;  %v3630_v29 = vmax.f32 %v3424_v31, 0.0  ;;  %v5672_v55 = vpop.permute.xlu0 %5671  ;;  %v3435_v6 = vadd.f32 %v4374_v23, %v8674_v54  ;;  %v3714_v57 = vsel %vm3678_vm11, %v3632_v1, 0.0 }
 0x265   :  { %v3426_v20 = vpop.f32.mrf.mxu0  ;;  %v5679_v30 = vunpack.i.h.bf16 %v5677_v45  ;;  %v5678_v46 = vunpack.i.l.bf16 %v5677_v45  ;;  %v5674_v59 = vunpack.i.h.bf16 %v5672_v55 }
 0x266   :  { %v3710_v58 = vsel %vm3678_vm11, %v3630_v29, 0.0  ;;  %v3427_v24 = vadd.f32 %v8674_v54, %v3426_v20  ;;  %4411 = vmatprep.mubr.msk.bf16.mxu1 %vm3221_vm10, %v3195_v34  ;;  %v3633_v7 = vmax.f32 %v3435_v6, 0.0 }
 0x267   :  { %v3711_v50 = vadd.f32 %v3710_v58, %v3709_v32  ;;  %4412 = vmatmul.mubr.msk.bf16.gmra.mxu1 %vm3221_vm10, %v3196_v5  ;;  %v5687_v26 = vpop.permute.xlu1 %5686  ;;  %v5673_v32 = vunpack.i.l.bf16 %v5672_v55  ;;  %v2905_v18 = vsel %vm2842_vm5, %v9209_v42, %v5678_v46  ;;  %v2906_v62 = vsel %vm2842_vm5, %v9210_v17, %v5679_v30 }
 0x268   :  { %v3631_v0 = vmax.f32 %v3427_v24, 0.0  ;;  %v5682_v37 = vpop.permute.xlu0 %5681  ;;  %v3716_v38 = vsel %vm3678_vm11, %v3633_v7, 0.0  ;;  %v5689_v28 = vunpack.i.h.bf16 %v5687_v26  ;;  %v5688_v33 = vunpack.i.l.bf16 %v5687_v26 }
 0x269   :  { %v5684_v14 = vunpack.i.h.bf16 %v5682_v37  ;;  %v5683_v11 = vunpack.i.l.bf16 %v5682_v37  ;;  %v2903_v41 = vsel %vm2842_vm5, %v9211_v40, %v5673_v32  ;;  %v2904_v19 = vsel %vm2842_vm5, %v9212_v21, %v5674_v59 }
 0x26a   :  { %v3712_v4 = vsel %vm3678_vm11, %v3631_v0, 0.0  ;;  %v2970_v36 = vsel %vm2907_vm6, %v2905_v18, %v5688_v33  ;;  %v2971_v44 = vsel %vm2907_vm6, %v2906_v62, %v5689_v28 }
 0x26b   :  { %v3713_v15 = vadd.f32 %v3712_v4, %v3711_v50  ;;  %v5697_v39 = vpop.permute.xlu1 %5696  ;;  %v2968_v9 = vsel %vm2907_vm6, %v2903_v41, %v5683_v11  ;;  %v2969_v51 = vsel %vm2907_vm6, %v2904_v19, %v5684_v14 }
 0x26c   :  { %v5692_v22 = vpop.permute.xlu0 %5691  ;;  %v5699_v13 = vunpack.i.h.bf16 %v5697_v39  ;;  %v5698_v3 = vunpack.i.l.bf16 %v5697_v39 }
 0x26d   :  { %v3715_v56 = vadd.f32 %v3714_v57, %v3713_v15  ;;  %v5693_v49 = vunpack.i.l.bf16 %v5692_v22  ;;  %v5694_v43 = vunpack.i.h.bf16 %v5692_v22 }
 0x26e   :  { %v3035_v2 = vsel %vm2972_vm7, %v2970_v36, %v5698_v3  ;;  %v3036_v10 = vsel %vm2972_vm7, %v2971_v44, %v5699_v13 }
 0x26f   :  { %v5707_v25 = vpop.permute.xlu1 %5706  ;;  %v3717_v16 = vadd.f32 %v3716_v38, %v3715_v56  ;;  %v3033_v60 = vsel %vm2972_vm7, %v2968_v9, %v5693_v49  ;;  %v3034_v31 = vsel %vm2972_vm7, %v2969_v51, %v5694_v43 }
 0x270   :  { %v5708_v48 = vunpack.i.l.bf16 %v5707_v25  ;;  %v5702_v53 = vpop.permute.xlu0 %5701  ;;  %v5709_v8 = vunpack.i.h.bf16 %v5707_v25 }
 0x271   :  { %v5703_v63 = vunpack.i.l.bf16 %v5702_v53  ;;  %v5704_v47 = vunpack.i.h.bf16 %v5702_v53 }
 0x272   :  { %v3100_v5 = vsel %vm3037_vm8, %v3035_v2, %v5708_v48  ;;  %v3101_v45 = vsel %vm3037_vm8, %v3036_v10, %v5709_v8 }
 0x273   :  { %v4377_v61 = vpop.f32.mrf.mxu0  ;;  %v5717_v12 = vpop.permute.xlu1 %5716  ;;  %v3098_v52 = vsel %vm3037_vm8, %v3033_v60, %v5703_v63  ;;  %v3099_v6 = vsel %vm3037_vm8, %v3034_v31, %v5704_v47 }
 0x274   :  { %v5719_v35 = vunpack.i.h.bf16 %v5717_v12  ;;  %v5718_v27 = vunpack.i.l.bf16 %v5717_v12  ;;  %v5712_v23 = vpop.permute.xlu0 %5711  ;;  %v3448_v37 = vadd.f32 %v4377_v61, %v8674_v54 }
 0x275   :  { %v5714_v34 = vunpack.i.h.bf16 %v5712_v23  ;;  %v5713_v29 = vunpack.i.l.bf16 %v5712_v23  ;;  %v3439_v55 = vpop.f32.mrf.mxu0 }
 0x276   :  { %v3165_v20 = vsel %vm3102_vm9, %v3100_v5, %v5718_v27  ;;  %v3166_v58 = vsel %vm3102_vm9, %v3101_v45, %v5719_v35  ;;  %v3440_v24 = vadd.f32 %v8674_v54, %v3439_v55  ;;  %v3636_v22 = vmax.f32 %v3448_v37, 0.0 }
 0x277   :  { %v3198_v50 = vpack.c.bf16 %v3166_v58, %v3165_v20  ;;  %v3163_v26 = vsel %vm3102_vm9, %v3098_v52, %v5713_v29  ;;  %v3164_v1 = vsel %vm3102_vm9, %v3099_v6, %v5714_v34  ;;  %v4378_v0 = vpop.f32.mrf.mxu0  ;;  %v5747_v58 = vmov 0.0  }
 0x278   :  { %v3197_v7 = vpack.c.bf16 %v3164_v1, %v3163_v26  ;;  %v3634_v4 = vmax.f32 %v3440_v24, 0.0  ;;  %v3451_v57 = vadd.f32 %v4378_v0, %v8674_v54  ;;  %v3722_v28 = vsel %vm3678_vm11, %v3636_v22, 0.0  ;;  %4419 = vmatprep.subr.bf16.mxu1 %v5747_v58  ;;  %v5722_v24 = vld [vmem:[%s8940_s3] sm:$0xff]  }
 0x279   :  { %v3442_v15 = vpop.f32.mrf.mxu0  ;;  %4420 = vmatpush3.bf16.msra.mxu1 %v5722_v24 }
 0x27a   :  { %v3718_v39 = vsel %vm3678_vm11, %v3634_v4, 0.0  ;;  %v3443_v30 = vadd.f32 %v8674_v54, %v3442_v15  ;;  %4415 = vmatprep.mubr.msk.bf16.mxu1 %vm3221_vm10, %v3197_v7  ;;  %v3637_v59 = vmax.f32 %v3451_v57, 0.0 }
 0x27b   :  { %v3719_v46 = vadd.f32 %v3718_v39, %v3717_v16  ;;  %4416 = vmatmul.mubr.msk.bf16.gmra.mxu1 %vm3221_vm10, %v3198_v50 }
 0x27c   :  { %v3635_v38 = vmax.f32 %v3443_v30, 0.0  ;;  %v3724_v14 = vsel %vm3678_vm11, %v3637_v59, 0.0  ;;  %4421 = vmatprep.mubr.msk.bf16.mxu1 %vm5748_vm12, %v5747_v58 }
 0x27e   :  { %v3720_v32 = vsel %vm3678_vm11, %v3635_v38, 0.0 }
 0x27f   :  { %v3721_v56 = vadd.f32 %v3720_v32, %v3719_v46 }
 0x281   :  { %v3723_v33 = vadd.f32 %v3722_v28, %v3721_v56 }
 0x283   :  { %v3725_v11 = vadd.f32 %v3724_v14, %v3723_v33 }
 0x287   :  { %v4381_v13 = vpop.f32.mrf.mxu0 }
 0x288   :  { %v3464_v16 = vadd.f32 %v4381_v13, %v8674_v54 }
 0x289   :  { %v3455_v3 = vpop.f32.mrf.mxu0 }
 0x28a   :  { %v3456_v49 = vadd.f32 %v8674_v54, %v3455_v3  ;;  %v3640_v53 = vmax.f32 %v3464_v16, 0.0 }
 0x28b   :  { %v4382_v25 = vpop.f32.mrf.mxu0 }
 0x28c   :  { %v3638_v42 = vmax.f32 %v3456_v49, 0.0  ;;  %v3467_v62 = vadd.f32 %v4382_v25, %v8674_v54  ;;  %v3730_v8 = vsel %vm3678_vm11, %v3640_v53, 0.0 }
 0x28d   :  { %v3458_v18 = vpop.f32.mrf.mxu0 }
 0x28e   :  { %v3726_v17 = vsel %vm3678_vm11, %v3638_v42, 0.0  ;;  %v3459_v43 = vadd.f32 %v8674_v54, %v3458_v18  ;;  %v3641_v41 = vmax.f32 %v3467_v62, 0.0 }
 0x28f   :  { %v3727_v48 = vadd.f32 %v3726_v17, %v3725_v11 }
 0x290   :  { %v3639_v40 = vmax.f32 %v3459_v43, 0.0  ;;  %v3732_v36 = vsel %vm3678_vm11, %v3641_v41, 0.0 }
 0x292   :  { %v3728_v21 = vsel %vm3678_vm11, %v3639_v40, 0.0 }
 0x293   :  { %v3729_v19 = vadd.f32 %v3728_v21, %v3727_v48 }
 0x295   :  { %v3731_v63 = vadd.f32 %v3730_v8, %v3729_v19 }
 0x297   :  { %v3733_v44 = vadd.f32 %v3732_v36, %v3731_v63 }
 0x29b   :  { %v4385_v9 = vpop.f32.mrf.mxu0 }
 0x29c   :  { %v3480_v10 = vadd.f32 %v4385_v9, %v8674_v54 }
 0x29d   :  { %v3471_v47 = vpop.f32.mrf.mxu0 }
 0x29e   :  { %v3472_v51 = vadd.f32 %v8674_v54, %v3471_v47  ;;  %v3644_v27 = vmax.f32 %v3480_v10, 0.0 }
 0x29f   :  { %v4386_v2 = vpop.f32.mrf.mxu0 }
 0x2a0   :  { %v3642_v60 = vmax.f32 %v3472_v51, 0.0  ;;  %v3483_v31 = vadd.f32 %v4386_v2, %v8674_v54  ;;  %v3738_v29 = vsel %vm3678_vm11, %v3644_v27, 0.0 }
 0x2a1   :  { %v3474_v61 = vpop.f32.mrf.mxu0 }
 0x2a2   :  { %v3734_v12 = vsel %vm3678_vm11, %v3642_v60, 0.0  ;;  %v3475_v5 = vadd.f32 %v8674_v54, %v3474_v61  ;;  %v3645_v45 = vmax.f32 %v3483_v31, 0.0 }
 0x2a3   :  { %v3735_v35 = vadd.f32 %v3734_v12, %v3733_v44 }
 0x2a4   :  { %v3643_v23 = vmax.f32 %v3475_v5, 0.0  ;;  %v3740_v6 = vsel %vm3678_vm11, %v3645_v45, 0.0 }
 0x2a6   :  { %v3736_v52 = vsel %vm3678_vm11, %v3643_v23, 0.0 }
 0x2a7   :  { %v3737_v34 = vadd.f32 %v3736_v52, %v3735_v35 }
 0x2a9   :  { %v3739_v55 = vadd.f32 %v3738_v29, %v3737_v34 }
 0x2ab   :  { %v8870_v20 = vadd.f32 %v3740_v6, %v3739_v55 }
 0x2af   :  { %v4389_v50 = vpop.f32.mrf.mxu0 }
 0x2b0   :  { %v3496_v22 = vadd.f32 %v4389_v50, %v8674_v54 }
 0x2b1   :  { %v3487_v26 = vpop.f32.mrf.mxu0 }
 0x2b2   :  { %v3488_v57 = vadd.f32 %v8674_v54, %v3487_v26  ;;  %v3648_v56 = vmax.f32 %v3496_v22, 0.0 }
 0x2b3   :  { %v4390_v0 = vpop.f32.mrf.mxu0 }
 0x2b4   :  { %v3646_v38 = vmax.f32 %v3488_v57, 0.0  ;;  %v3499_v33 = vadd.f32 %v4390_v0, %v8674_v54  ;;  %v3751_v49 = vsel %vm3678_vm11, %v3648_v56, 0.0 }
 0x2b5   :  { %v3490_v7 = vpop.f32.mrf.mxu0 }
 0x2b6   :  { %v3491_v15 = vadd.f32 %v8674_v54, %v3490_v7  ;;  %v3748_v28 = vsel %vm3678_vm11, %v3646_v38, 0.0  ;;  %v3649_v25 = vmax.f32 %v3499_v33, 0.0 }
 0x2b8   :  { %v3647_v46 = vmax.f32 %v3491_v15, 0.0  ;;  %v3753_v43 = vsel %vm3678_vm11, %v3649_v25, 0.0 }
 0x2ba   :  { %v3749_v32 = vsel %vm3678_vm11, %v3647_v46, 0.0 }
 0x2bb   :  { %v3750_v11 = vadd.f32 %v3749_v32, %v3748_v28 }
 0x2bd   :  { %v3752_v42 = vadd.f32 %v3751_v49, %v3750_v11 }
 0x2bf   :  { %v3754_v40 = vadd.f32 %v3753_v43, %v3752_v42 }
 0x2c3   :  { %v4393_v1 = vpop.f32.mrf.mxu1 }
 0x2c4   :  { %v3512_v48 = vadd.f32 %v4393_v1, %v8674_v54 }
 0x2c5   :  { %v3503_v37 = vpop.f32.mrf.mxu1 }
 0x2c6   :  { %v3504_v14 = vadd.f32 %v8674_v54, %v3503_v37  ;;  %v3652_v8 = vmax.f32 %v3512_v48, 0.0 }
 0x2c7   :  { %v4394_v4 = vpop.f32.mrf.mxu1 }
 0x2c8   :  { %v3650_v16 = vmax.f32 %v3504_v14, 0.0  ;;  %v3515_v63 = vadd.f32 %v4394_v4, %v8674_v54  ;;  %v3759_v51 = vsel %vm3678_vm11, %v3652_v8, 0.0 }
 0x2c9   :  { %v3506_v39 = vpop.f32.mrf.mxu1 }
 0x2ca   :  { %v3507_v3 = vadd.f32 %v8674_v54, %v3506_v39  ;;  %v3755_v53 = vsel %vm3678_vm11, %v3650_v16, 0.0  ;;  %v3653_v2 = vmax.f32 %v3515_v63, 0.0 }
 0x2cb   :  { %v3756_v21 = vadd.f32 %v3755_v53, %v3754_v40 }
 0x2cc   :  { %v3651_v17 = vmax.f32 %v3507_v3, 0.0  ;;  %v3761_v31 = vsel %vm3678_vm11, %v3653_v2, 0.0 }
 0x2ce   :  { %v3757_v41 = vsel %vm3678_vm11, %v3651_v17, 0.0 }
 0x2cf   :  { %v3758_v44 = vadd.f32 %v3757_v41, %v3756_v21 }
 0x2d1   :  { %v3760_v60 = vadd.f32 %v3759_v51, %v3758_v44 }
 0x2d3   :  { %v3762_v27 = vadd.f32 %v3761_v31, %v3760_v60 }
 0x2d7   :  { %v4397_v30 = vpop.f32.mrf.mxu1 }
 0x2d8   :  { %v3528_v5 = vadd.f32 %v4397_v30, %v8674_v54 }
 0x2d9   :  { %v3519_v59 = vpop.f32.mrf.mxu1 }
 0x2da   :  { %v3520_v36 = vadd.f32 %v8674_v54, %v3519_v59  ;;  %v3656_v34 = vmax.f32 %v3528_v5, 0.0 }
 0x2db   :  { %v4398_v13 = vpop.f32.mrf.mxu1 }
 0x2dc   :  { %v3654_v10 = vmax.f32 %v3520_v36, 0.0  ;;  %v3531_v29 = vadd.f32 %v4398_v13, %v8674_v54  ;;  %v3767_v50 = vsel %vm3678_vm11, %v3656_v34, 0.0 }
 0x2dd   :  { %v3522_v18 = vpop.f32.mrf.mxu1 }
 0x2de   :  { %v3523_v9 = vadd.f32 %v8674_v54, %v3522_v18  ;;  %v3763_v35 = vsel %vm3678_vm11, %v3654_v10, 0.0  ;;  %v3657_v26 = vmax.f32 %v3531_v29, 0.0  ;;  %v5737_v18 = vld [vmem:[%s8939_s2] ss:$0 sm:$0xff] }
 0x2df   :  { %v3764_v52 = vadd.f32 %v3763_v35, %v3762_v27 }
 0x2e0   :  { %v3655_v61 = vmax.f32 %v3523_v9, 0.0  ;;  %v3769_v4 = vsel %vm3678_vm11, %v3657_v26, 0.0 }
 0x2e2   :  { %v3765_v45 = vsel %vm3678_vm11, %v3655_v61, 0.0 }
 0x2e3   :  { %v3766_v6 = vadd.f32 %v3765_v45, %v3764_v52 }
 0x2e5   :  { %v3768_v0 = vadd.f32 %v3767_v50, %v3766_v6 }
 0x2e7   :  { %v3770_v57 = vadd.f32 %v3769_v4, %v3768_v0 }
 0x2eb   :  { %v4401_v62 = vpop.f32.mrf.mxu1 }
 0x2ec   :  { %v3544_v15 = vadd.f32 %v4401_v62, %v8674_v54 }
 0x2ed   :  { %v3535_v19 = vpop.f32.mrf.mxu1 }
 0x2ee   :  { %v3536_v55 = vadd.f32 %v8674_v54, %v3535_v19  ;;  %v3660_v59 = vmax.f32 %v3544_v15, 0.0 }
 0x2ef   :  { %v4402_v47 = vpop.f32.mrf.mxu1 }
 0x2f0   :  { %v3658_v1 = vmax.f32 %v3536_v55, 0.0  ;;  %v3547_v32 = vadd.f32 %v4402_v47, %v8674_v54  ;;  %v3775_v11 = vsel %vm3678_vm11, %v3660_v59, 0.0 }
 0x2f1   :  { %v3538_v12 = vpop.f32.mrf.mxu1 }
 0x2f2   :  { %v3539_v24 = vadd.f32 %v8674_v54, %v3538_v12  ;;  %v3771_v39 = vsel %vm3678_vm11, %v3658_v1, 0.0  ;;  %v3661_v13 = vmax.f32 %v3547_v32, 0.0 }
 0x2f3   :  { %v3772_v22 = vadd.f32 %v3771_v39, %v3770_v57 }
 0x2f4   :  { %v3659_v7 = vmax.f32 %v3539_v24, 0.0  ;;  %v3777_v42 = vsel %vm3678_vm11, %v3661_v13, 0.0 }
 0x2f6   :  { %v3773_v46 = vsel %vm3678_vm11, %v3659_v7, 0.0 }
 0x2f7   :  { %v3774_v28 = vadd.f32 %v3773_v46, %v3772_v22  ;;  %v3742_v46 = vrot.slane %v8870_v20, 4 }
 0x2f9   :  { %v3776_v49 = vadd.f32 %v3775_v11, %v3774_v28  ;;  %v3743_v11 = vadd.f32 %v3742_v46, %v8870_v20 }
 0x2fb   :  { %v3778_v43 = vadd.f32 %v3777_v42, %v3776_v49 }
 0x2ff   :  { %v4405_v23 = vpop.f32.mrf.mxu1 }
 0x300   :  { %v3560_v17 = vadd.f32 %v5737_v18, %v4405_v23 }
 0x301   :  { %v3551_v58 = vpop.f32.mrf.mxu1 }
 0x302   :  { %v3552_v56 = vadd.f32 %v8674_v54, %v3551_v58  ;;  %v3664_v40 = vmax.f32 %v3560_v17, 0.0 }
 0x303   :  { %v4406_v37 = vpop.f32.mrf.mxu1 }
 0x304   :  { %v3662_v3 = vmax.f32 %v3552_v56, 0.0  ;;  %v3563_v41 = vadd.f32 %v5737_v18, %v4406_v37  ;;  %v3783_v63 = vsel %vm3678_vm11, %v3664_v40, 0.0 }
 0x305   :  { %v3554_v30 = vpop.f32.mrf.mxu1 }
 0x306   :  { %v3555_v33 = vadd.f32 %v8674_v54, %v3554_v30  ;;  %v3779_v62 = vsel %vm3678_vm11, %v3662_v3, 0.0  ;;  %v3665_v36 = vmax.f32 %v3563_v41, 0.0 }
 0x307   :  { %v3780_v48 = vadd.f32 %v3779_v62, %v3778_v43  ;;  %v3744_v43 = vrot.slane %v3743_v11, 2 }
 0x308   :  { %v3663_v25 = vmax.f32 %v3555_v33, 0.0  ;;  %v3785_v10 = vsel %vm3678_vm11, %v3665_v36, 0.0 }
 0x30a   :  { %v3781_v54 = vsel %vm3678_vm11, %v3663_v25, 0.0 }
 0x30b   :  { %v3782_v19 = vadd.f32 %v3781_v54, %v3780_v48 }
 0x30d   :  { %v3784_v9 = vadd.f32 %v3783_v63, %v3782_v19 }
 0x30f   :  { %v3786_v12 = vadd.f32 %v3785_v10, %v3784_v9 }
 0x313   :  { %v4409_v38 = vpop.f32.mrf.mxu1 }
 0x314   :  { %v3576_v60 = vadd.f32 %v5737_v18, %v4409_v38 }
 0x315   :  { %v3567_v14 = vpop.f32.mrf.mxu1 }
 0x316   :  { %v3568_v21 = vadd.f32 %v5737_v18, %v3567_v14  ;;  %v3668_v23 = vmax.f32 %v3576_v60, 0.0 }
 0x317   :  { %v4410_v16 = vpop.f32.mrf.mxu1 }
 0x318   :  { %v3666_v44 = vmax.f32 %v3568_v21, 0.0  ;;  %v3579_v45 = vadd.f32 %v5737_v18, %v4410_v16  ;;  %v3791_v55 = vsel %vm3678_vm11, %v3668_v23, 0.0  ;;  %v3745_v21 = vadd.f32 %v3744_v43, %v3743_v11  ;;  %v4312_v23 = vld [vmem:[%s8941_s4] ss:$0 sm:$0xff] }
 0x319   :  { %v3570_v53 = vpop.f32.mrf.mxu1 }
 0x31a   :  { %v3571_v8 = vadd.f32 %v5737_v18, %v3570_v53  ;;  %v3787_v61 = vsel %vm3678_vm11, %v3666_v44, 0.0  ;;  %v3669_v6 = vmax.f32 %v3579_v45, 0.0  ;;  %v3746_v63 = vrot.slane %v3745_v21, 1 }
 0x31b   :  { %v3788_v35 = vadd.f32 %v3787_v61, %v3786_v12 }
 0x31c   :  { %v3667_v51 = vmax.f32 %v3571_v8, 0.0  ;;  %v3793_v26 = vsel %vm3678_vm11, %v3669_v6, 0.0 }
 0x31e   :  { %v3789_v5 = vsel %vm3678_vm11, %v3667_v51, 0.0 }
 0x31f   :  { %v3790_v34 = vadd.f32 %v3789_v5, %v3788_v35 }
 0x321   :  { %v3792_v24 = vadd.f32 %v3791_v55, %v3790_v34 }
 0x323   :  { %v3794_v37 = vadd.f32 %v3793_v26, %v3792_v24 }
 0x327   :  { %v4413_v47 = vpop.f32.mrf.mxu1 }
 0x328   :  { %v3592_v1 = vadd.f32 %v5737_v18, %v4413_v47 }
 0x329   :  { %v3583_v2 = vpop.f32.mrf.mxu1 }
 0x32a   :  { %v3584_v52 = vadd.f32 %v5737_v18, %v3583_v2  ;;  %v3672_v15 = vmax.f32 %v3592_v1, 0.0 }
 0x32b   :  { %v4414_v31 = vpop.f32.mrf.mxu1 }
 0x32c   :  { %v3670_v58 = vmax.f32 %v3584_v52, 0.0  ;;  %v3595_v39 = vadd.f32 %v5737_v18, %v4414_v31  ;;  %v3799_v38 = vsel %vm3678_vm11, %v3672_v15, 0.0 }
 0x32d   :  { %v3586_v27 = vpop.f32.mrf.mxu1 }
 0x32e   :  { %v3587_v29 = vadd.f32 %v5737_v18, %v3586_v27  ;;  %v3795_v0 = vsel %vm3678_vm11, %v3670_v58, 0.0  ;;  %v3673_v59 = vmax.f32 %v3595_v39, 0.0 }
 0x32f   :  { %v3796_v4 = vadd.f32 %v3795_v0, %v3794_v37 }
 0x330   :  { %v3671_v50 = vmax.f32 %v3587_v29, 0.0  ;;  %v3801_v3 = vsel %vm3678_vm11, %v3673_v59, 0.0 }
 0x332   :  { %v3797_v7 = vsel %vm3678_vm11, %v3671_v50, 0.0 }
 0x333   :  { %v3798_v57 = vadd.f32 %v3797_v7, %v3796_v4 }
 0x335   :  { %v3800_v56 = vadd.f32 %v3799_v38, %v3798_v57 }
 0x337   :  { %v3802_v42 = vadd.f32 %v3801_v3, %v3800_v56 }
 0x33b   :  { %v4417_v30 = vpop.f32.mrf.mxu1 }
 0x33c   :  { %v3608_v33 = vadd.f32 %v5737_v18, %v4417_v30 }
 0x33d   :  { %v3599_v22 = vpop.f32.mrf.mxu1 }
 0x33e   :  { %v3600_v32 = vadd.f32 %v5737_v18, %v3599_v22  ;;  %v3676_v17 = vmax.f32 %v3608_v33, 0.0 }
 0x33f   :  { %v4418_v28 = vpop.f32.mrf.mxu1 }
 0x340   :  { %v3674_v14 = vmax.f32 %v3600_v32, 0.0  ;;  %v3611_v25 = vadd.f32 %v5737_v18, %v4418_v28  ;;  %v3807_v41 = vsel %vm3678_vm11, %v3676_v17, 0.0 }
 0x341   :  { %v3602_v13 = vpop.f32.mrf.mxu1 }
 0x342   :  { %v3803_v49 = vsel %vm3678_vm11, %v3674_v14, 0.0  ;;  %v3603_v16 = vadd.f32 %v5737_v18, %v3602_v13  ;;  %v3677_v48 = vmax.f32 %v3611_v25, 0.0  ;;  %v3747_v18 = vadd.f32 %v3746_v63, %v3745_v21 }
 0x343   :  { %v3804_v54 = vadd.f32 %v3803_v49, %v3802_v42 }
 0x344   :  { %v3675_v62 = vmax.f32 %v3603_v16, 0.0  ;;  %v3809_v19 = vsel %vm3678_vm11, %v3677_v48, 0.0  ;;  %v3818_v51 = vmul.f32 0.00390625, %v3747_v18 }
 0x346   :  { %v3805_v53 = vsel %vm3678_vm11, %v3675_v62, 0.0  ;;  %v3820_v60 = vpack.c.bf16 %v3818_v51, %v3818_v51 }
 0x347   :  { %v3806_v40 = vadd.f32 %v3805_v53, %v3804_v54 }
 0x348   :  { %v3833_v31 = vunpack.c.l.b16 %v3820_v60 }
 0x349   :  { %v3808_v20 = vadd.f32 %v3807_v41, %v3806_v40 }
 0x34b   :  { %v3810_v8 = vadd.f32 %v3809_v19, %v3808_v20 }
 0x34d   :  { %v3811_v36 = vrot.slane %v3810_v8, 4 }
 0x34f   :  { %v3812_v44 = vadd.f32 %v3811_v36, %v3810_v8 }
 0x351   :  { %v3813_v9 = vrot.slane %v3812_v44, 2 }
 0x353   :  { %v3814_v47 = vadd.f32 %v3813_v9, %v3812_v44 }
 0x355   :  { %v3815_v2 = vrot.slane %v3814_v47, 1 }
 0x357   :  { %v3816_v10 = vadd.f32 %v3815_v2, %v3814_v47 }
 0x359   :  { %v3819_v61 = vmul.f32 0.00390625, %v3816_v10 }
 0x35b   :  { %v3821_v12 = vpack.c.bf16 %v3819_v61, %v3819_v61 }
 0x35d   :  { %v3834_v5 = vunpack.c.l.b16 %v3821_v12 }
 0x35f   :  { %v3836_v35 = vsel %vm3835_vm13, %v3834_v5, %v3833_v31 }
 0x360   :  { %v3837_v27 = vpack.c.b16 %v3836_v35, %v3836_v35 }
 0x362   :  { %4422 = vmatmul.mubr.msk.bf16.vlgmr.msra.gmra.mxu1 %vm3678_vm11, %v3837_v27 }
 0x422   :  { %v3881_v45 = vpop.f32.mrf.mxu1 }
 0x423   :  { %v3882_v52 = vadd.f32 %v4312_v23, %v3881_v45 }
 0x424   :  { %v4423_v34 = vpop.f32.mrf.mxu1 }
 0x425   :  { %3888 = vst.msk [vmem:[%s8942_s5] sm:$0x3] %vm3887_vm14, %v3882_v52 }
 0x426   :  { %v3884_v29 = vpop.f32.mrf.mxu1 }
 0x428   :  { %v4424_v55 = vpop.f32.mrf.mxu1 }

</bundles_post_ra>
